<compile_context>
chip_gen: v5e
topology: v5e:2x2
jax: 0.10.0
libtpu: 0.0.40
codegen_flags: <defaults>
</compile_context>

<pallas_src>
import functools

import jax
import jax.numpy as jnp
from jax.experimental import pallas as pl
from jax.experimental.pallas import tpu as pltpu


# ----------------------------- Pallas kernel --------------------------------
def _cspl_kernel(x_ref, w1_ref, s1_ref, b1_ref,
                 wb1_ref, sb1_ref, bb1_ref,
                 wb2_ref, sb2_ref, bb2_ref,
                 w3_ref, w2o_ref, sbn_ref, bbn_ref,
                 o_ref, up_ref, *, n_bn, k, shortcut):
    """Fused YOLOBottleneckCSPL for one image tile.

    x_ref : (1, H, W, C1)      input image (NHWC)
    w*_ref: folded conv / BN parameters (channels-last matmul form)
    o_ref : (1, H, W, C2)      output image (NHWC)
    up_ref: (H+2p, W+2p, c_)   VMEM halo scratch for the 3x3 conv
    """
    _, H, W, C1 = x_ref.shape
    c_ = w1_ref.shape[1]
    c2o = w2o_ref.shape[1]          # c2 - c_
    pad = k // 2
    HW = H * W

    x2d = x_ref[0].reshape(HW, C1)

    # cv1 : 1x1 conv + folded BN + ReLU  ->  t (H*W, c_)
    t = jnp.dot(x2d, w1_ref[...], preferred_element_type=jnp.float32)
    t = jnp.maximum(t * s1_ref[...] + b1_ref[...], 0.0)

    # Zero the halo scratch once; only its interior is rewritten per bottleneck,
    # so the zero border provides the conv's "same" padding.
    up_ref[...] = jnp.zeros_like(up_ref)

    # m : stack of YOLOBottleneck(c_, c_, e=1.0)
    z = t
    for i in range(n_bn):
        # bottleneck cv1 : 1x1 conv + BN + ReLU
        u = jnp.dot(z, wb1_ref[i], preferred_element_type=jnp.float32)
        u = jnp.maximum(u * sb1_ref[i] + bb1_ref[i], 0.0)

        # bottleneck cv2 : k x k conv (stride 1, pad k//2) + BN + ReLU
        up_ref[pad:pad + H, pad:pad + W, :] = u.reshape(H, W, c_)
        acc = jnp.zeros((HW, c_), jnp.float32)
        for dh in range(k):
            for dw in range(k):
                tap = up_ref[dh:dh + H, dw:dw + W, :].reshape(HW, c_)
                acc = acc + jnp.dot(tap, wb2_ref[i * k * k + dh * k + dw],
                                    preferred_element_type=jnp.float32)
        v = jnp.maximum(acc * sb2_ref[i] + bb2_ref[i], 0.0)

        z = (z + v) if shortcut else v          # residual add inside the bottleneck

    # cv3 / cv2 (plain 1x1 convs) + outer BN + ReLU on concat([y1, y2])
    y1 = jnp.dot(z, w3_ref[...], preferred_element_type=jnp.float32)
    y1 = jnp.maximum(y1 * sbn_ref[:, :c_] + bbn_ref[:, :c_], 0.0)
    y2 = jnp.dot(x2d, w2o_ref[...], preferred_element_type=jnp.float32)
    y2 = jnp.maximum(y2 * sbn_ref[:, c_:] + bbn_ref[:, c_:], 0.0)

    o_ref[0, :, :, :c_] = y1.reshape(H, W, c_).astype(o_ref.dtype)
    o_ref[0, :, :, c_:] = y2.reshape(H, W, c2o).astype(o_ref.dtype)


# ------------------------------- wrapper -------------------------------------
@functools.partial(jax.jit, static_argnames=("n", "k", "shortcut"))
def yolo_bottleneck_cspl(x_nchw, params, *, n=1, k=3, shortcut=True):
    w1, s1, b1, wb1, sb1, bb1, wb2, sb2, bb2, w3, w2o, sbn, bbn = params
    N, C1, H, W = x_nchw.shape
    c_ = w1.shape[1]
    c2 = sbn.shape[1]
    pad = k // 2

    x = jnp.transpose(x_nchw, (0, 2, 3, 1))           # NCHW -> NHWC (channels on lanes)

    kernel = functools.partial(_cspl_kernel, n_bn=n, k=k, shortcut=shortcut)

    def full_spec(arr):
        # whole-array block, constant index map -> stays resident in VMEM across the grid
        return pl.BlockSpec(arr.shape, lambda i: (0,) * arr.ndim)

    weights = (w1, s1, b1, wb1, sb1, bb1, wb2, sb2, bb2, w3, w2o, sbn, bbn)
    in_specs = [pl.BlockSpec((1, H, W, C1), lambda i: (i, 0, 0, 0))]
    in_specs += [full_spec(a) for a in weights]

    out = pl.pallas_call(
        kernel,
        out_shape=jax.ShapeDtypeStruct((N, H, W, c2), jnp.float32),
        grid=(N,),
        in_specs=in_specs,
        out_specs=pl.BlockSpec((1, H, W, c2), lambda i: (i, 0, 0, 0)),
        scratch_shapes=[pltpu.VMEM((H + 2 * pad, W + 2 * pad, c_), jnp.float32)],
        compiler_params=pltpu.CompilerParams(dimension_semantics=("parallel",)),
    )(x, *weights)

    return jnp.transpose(out, (0, 3, 1, 2))            # NHWC -> NCHW


# -------------------------- parameter initialization -------------------------
def init_params(key, c1, c2, n=1, k=3, e=0.5, eps=1e-5):
    """Random weights in the kernel's layout: 1x1 convs as (Cin, Cout), kxk conv as
    (k*k, Cin, Cout); BatchNorm (eval) folded into (1, C) scale / bias."""
    c_ = int(c2 * e)
    keys = iter(jax.random.split(key, 8 + 4 * n))

    def conv_w(kk_, cin, cout, ksz=1):
        return 0.1 * jax.random.normal(kk_, (ksz, ksz, cin, cout), jnp.float32)

    def bn_fold(kk_, c):
        kg, kb, km, kv = jax.random.split(kk_, 4)
        gamma = 1.0 + 0.1 * jax.random.normal(kg, (c,), jnp.float32)
        beta = 0.1 * jax.random.normal(kb, (c,), jnp.float32)
        mean = 0.1 * jax.random.normal(km, (c,), jnp.float32)
        var = jnp.abs(jax.random.normal(kv, (c,), jnp.float32)) + 0.5
        scale = gamma / jnp.sqrt(var + eps)
        bias = beta - mean * scale
        return scale.reshape(1, c), bias.reshape(1, c)

    w1 = conv_w(next(keys), c1, c_, 1)[0, 0]                     # cv1
    s1, b1 = bn_fold(next(keys), c_)

    wb1_l, sb1_l, bb1_l, wb2_l, sb2_l, bb2_l = [], [], [], [], [], []
    for _ in range(n):                                           # bottleneck stack
        wb1_l.append(conv_w(next(keys), c_, c_, 1)[0, 0])
        s, b = bn_fold(next(keys), c_); sb1_l.append(s); bb1_l.append(b)
        wb2_l.append(conv_w(next(keys), c_, c_, k).reshape(k * k, c_, c_))
        s, b = bn_fold(next(keys), c_); sb2_l.append(s); bb2_l.append(b)
    wb1 = jnp.stack(wb1_l); sb1 = jnp.stack(sb1_l); bb1 = jnp.stack(bb1_l)
    wb2 = jnp.concatenate(wb2_l, axis=0)                         # (n*k*k, c_, c_)
    sb2 = jnp.stack(sb2_l); bb2 = jnp.stack(bb2_l)

    w3 = conv_w(next(keys), c_, c_, 1)[0, 0]                     # cv3 (no BN/act)
    w2o = conv_w(next(keys), c1, c2 - c_, 1)[0, 0]               # cv2 (no BN/act)
    sbn, bbn = bn_fold(next(keys), c2)                           # outer BN
    return (w1, s1, b1, wb1, sb1, bb1, wb2, sb2, bb2, w3, w2o, sbn, bbn)


# ------------------------------ pure-JAX reference ---------------------------
def reference(x, params, n=1, k=3, shortcut=True):
    w1, s1, b1, wb1, sb1, bb1, wb2, sb2, bb2, w3, w2o, sbn, bbn = params
    dn = ("NCHW", "OIHW", "NCHW")
    hi = jax.lax.Precision.HIGHEST

    def conv1x1(v, w_io):
        w = jnp.transpose(w_io, (1, 0))[:, :, None, None]
        return jax.lax.conv_general_dilated(v, w, (1, 1), ((0, 0), (0, 0)),
                                            dimension_numbers=dn, precision=hi)

    def bn_relu(v, s, b):
        return jnp.maximum(v * s.reshape(1, -1, 1, 1) + b.reshape(1, -1, 1, 1), 0.0)

    c_ = w1.shape[1]
    pad = k // 2

    t = bn_relu(conv1x1(x, w1), s1, b1)                     # cv1
    z = t
    for i in range(n):                                       # m
        u = bn_relu(conv1x1(z, wb1[i]), sb1[i], bb1[i])
        wb = wb2[i * k * k:(i + 1) * k * k].reshape(k, k, c_, c_)
        w_oihw = jnp.transpose(wb, (3, 2, 0, 1))
        v = jax.lax.conv_general_dilated(u, w_oihw, (1, 1), ((pad, pad), (pad, pad)),
                                         dimension_numbers=dn, precision=hi)
        v = bn_relu(v, sb2[i], bb2[i])
        z = (z + v) if shortcut else v
    y1 = conv1x1(z, w3)                                      # cv3
    y2 = conv1x1(x, w2o)                                     # cv2
    y = jnp.concatenate([y1, y2], axis=1)
    return bn_relu(y, sbn, bbn)                              # outer BN + ReLU


if __name__ == "__main__":
    key = jax.random.PRNGKey(0)

    configs = [
        # (N, C1, C2, H, W, n, shortcut) -- lane-dense main config + an awkward-channel one
        dict(N=2, C1=128, C2=128, H=16, W=16, n=1, shortcut=True),
        dict(N=2, C1=32, C2=48, H=16, W=16, n=2, shortcut=False),
    ]

    ok = True
    for idx, cfg in enumerate(configs):
        kx, kp = jax.random.split(jax.random.fold_in(key, idx))
        x = jax.random.normal(kx, (cfg["N"], cfg["C1"], cfg["H"], cfg["W"]), jnp.float32)
        params = init_params(kp, cfg["C1"], cfg["C2"], n=cfg["n"], k=3, e=0.5)

        y = yolo_bottleneck_cspl(x, params, n=cfg["n"], k=3, shortcut=cfg["shortcut"])
        y = jax.block_until_ready(y)

        y_ref = reference(x, params, n=cfg["n"], k=3, shortcut=cfg["shortcut"])
        ok = ok and bool(jnp.allclose(y, y_ref, atol=5e-3, rtol=5e-3))

    assert ok
    print("KERNEL_OK")
</pallas_src>

<mosaic_0001>
module attributes {stable_mosaic.version = 11 : i64} {
  func.func @_cspl_kernel(%arg0: i32, %arg1: memref<1x16x16x128xf32, #tpu.memory_space<vmem>>, %arg2: memref<128x64xf32, #tpu.memory_space<vmem>>, %arg3: memref<1x64xf32, #tpu.memory_space<vmem>>, %arg4: memref<1x64xf32, #tpu.memory_space<vmem>>, %arg5: memref<1x64x64xf32, #tpu.memory_space<vmem>>, %arg6: memref<1x1x64xf32, #tpu.memory_space<vmem>>, %arg7: memref<1x1x64xf32, #tpu.memory_space<vmem>>, %arg8: memref<9x64x64xf32, #tpu.memory_space<vmem>>, %arg9: memref<1x1x64xf32, #tpu.memory_space<vmem>>, %arg10: memref<1x1x64xf32, #tpu.memory_space<vmem>>, %arg11: memref<64x64xf32, #tpu.memory_space<vmem>>, %arg12: memref<128x64xf32, #tpu.memory_space<vmem>>, %arg13: memref<1x128xf32, #tpu.memory_space<vmem>>, %arg14: memref<1x128xf32, #tpu.memory_space<vmem>>, %arg15: memref<1x16x16x128xf32, #tpu.memory_space<vmem>>, %arg16: memref<18x18x64xf32, #tpu.memory_space<vmem>>) attributes {dimension_semantics = [#tpu.dimension_semantics<parallel>], iteration_bounds = array<i64: 2>, scalar_prefetch = 0 : i64, scratch_operands = 1 : i64, tpu.core_type = #tpu.core_type<tc>, window_params = [{transform_indices = @transform_0, window_bounds = array<i64: 1, 16, 16, 128>}, {pipeline_mode = #tpu.pipeline_mode<synchronous>, transform_indices = @transform_1, window_bounds = array<i64: 128, 64>}, {pipeline_mode = #tpu.pipeline_mode<synchronous>, transform_indices = @transform_2, window_bounds = array<i64: 1, 64>}, {pipeline_mode = #tpu.pipeline_mode<synchronous>, transform_indices = @transform_3, window_bounds = array<i64: 1, 64>}, {pipeline_mode = #tpu.pipeline_mode<synchronous>, transform_indices = @transform_4, window_bounds = array<i64: 1, 64, 64>}, {pipeline_mode = #tpu.pipeline_mode<synchronous>, transform_indices = @transform_5, window_bounds = array<i64: 1, 1, 64>}, {pipeline_mode = #tpu.pipeline_mode<synchronous>, transform_indices = @transform_6, window_bounds = array<i64: 1, 1, 64>}, {pipeline_mode = #tpu.pipeline_mode<synchronous>, transform_indices = @transform_7, window_bounds = array<i64: 9, 64, 64>}, {pipeline_mode = #tpu.pipeline_mode<synchronous>, transform_indices = @transform_8, window_bounds = array<i64: 1, 1, 64>}, {pipeline_mode = #tpu.pipeline_mode<synchronous>, transform_indices = @transform_9, window_bounds = array<i64: 1, 1, 64>}, {pipeline_mode = #tpu.pipeline_mode<synchronous>, transform_indices = @transform_10, window_bounds = array<i64: 64, 64>}, {pipeline_mode = #tpu.pipeline_mode<synchronous>, transform_indices = @transform_11, window_bounds = array<i64: 128, 64>}, {pipeline_mode = #tpu.pipeline_mode<synchronous>, transform_indices = @transform_12, window_bounds = array<i64: 1, 128>}, {pipeline_mode = #tpu.pipeline_mode<synchronous>, transform_indices = @transform_13, window_bounds = array<i64: 1, 128>}, {transform_indices = @transform_14, window_bounds = array<i64: 1, 16, 16, 128>}]} {
    %c0 = arith.constant 0 : index
    %c0_0 = arith.constant 0 : index
    %c0_1 = arith.constant 0 : index
    %c0_2 = arith.constant 0 : index
    %0 = vector.load %arg1[%c0, %c0_0, %c0_1, %c0_2] : memref<1x16x16x128xf32, #tpu.memory_space<vmem>>, vector<1x16x16x128xf32>
    %1 = vector.shape_cast %0 : vector<1x16x16x128xf32> to vector<16x16x128xf32>
    %2 = vector.shape_cast %1 : vector<16x16x128xf32> to vector<256x128xf32>
    %c0_3 = arith.constant 0 : index
    %c0_4 = arith.constant 0 : index
    %3 = vector.load %arg2[%c0_3, %c0_4] : memref<128x64xf32, #tpu.memory_space<vmem>>, vector<128x64xf32>
    %cst = arith.constant dense<0.000000e+00> : vector<256x64xf32>
    %4 = tpu.matmul %2, %3, %cst {dimension_numbers = #tpu.dot_dimension_numbers<[1], [0], [0], [1], [0, 0, 1, 1], [], []>} : vector<256x128xf32>, vector<128x64xf32>, vector<256x64xf32> -> vector<256x64xf32>
    %c0_5 = arith.constant 0 : index
    %c0_6 = arith.constant 0 : index
    %5 = vector.load %arg3[%c0_5, %c0_6] : memref<1x64xf32, #tpu.memory_space<vmem>>, vector<1x64xf32>
    %6 = vector.broadcast %5 : vector<1x64xf32> to vector<256x64xf32>
    %7 = arith.mulf %4, %6 : vector<256x64xf32>
    %c0_7 = arith.constant 0 : index
    %c0_8 = arith.constant 0 : index
    %8 = vector.load %arg4[%c0_7, %c0_8] : memref<1x64xf32, #tpu.memory_space<vmem>>, vector<1x64xf32>
    %9 = vector.broadcast %8 : vector<1x64xf32> to vector<256x64xf32>
    %10 = arith.addf %7, %9 : vector<256x64xf32>
    %cst_9 = arith.constant 0.000000e+00 : f32
    %11 = vector.broadcast %cst_9 : f32 to vector<256x64xf32>
    %12 = arith.maximumf %10, %11 : vector<256x64xf32>
    %cst_10 = arith.constant 0.000000e+00 : f32
    %13 = vector.broadcast %cst_10 : f32 to vector<18x18x64xf32>
    %c0_11 = arith.constant 0 : index
    %c0_12 = arith.constant 0 : index
    %c0_13 = arith.constant 0 : index
    %14 = vector.load %arg16[%c0_11, %c0_12, %c0_13] : memref<18x18x64xf32, #tpu.memory_space<vmem>>, vector<18x18x64xf32>
    tpu.vector_store %arg16[%c0_11, %c0_12, %c0_13], %13 {strides = array<i32>} : memref<18x18x64xf32, #tpu.memory_space<vmem>>, vector<18x18x64xf32>,
    %c0_14 = arith.constant 0 : index
    %c0_15 = arith.constant 0 : index
    %c0_16 = arith.constant 0 : index
    %15 = vector.load %arg5[%c0_14, %c0_15, %c0_16] : memref<1x64x64xf32, #tpu.memory_space<vmem>>, vector<1x64x64xf32>
    %16 = vector.shape_cast %15 : vector<1x64x64xf32> to vector<64x64xf32>
    %cst_17 = arith.constant dense<0.000000e+00> : vector<256x64xf32>
    %17 = tpu.matmul %12, %16, %cst_17 {dimension_numbers = #tpu.dot_dimension_numbers<[1], [0], [0], [1], [0, 0, 1, 1], [], []>} : vector<256x64xf32>, vector<64x64xf32>, vector<256x64xf32> -> vector<256x64xf32>
    %c0_18 = arith.constant 0 : index
    %c0_19 = arith.constant 0 : index
    %c0_20 = arith.constant 0 : index
    %18 = vector.load %arg6[%c0_18, %c0_19, %c0_20] : memref<1x1x64xf32, #tpu.memory_space<vmem>>, vector<1x1x64xf32>
    %19 = vector.shape_cast %18 : vector<1x1x64xf32> to vector<1x64xf32>
    %20 = vector.broadcast %19 : vector<1x64xf32> to vector<256x64xf32>
    %21 = arith.mulf %17, %20 : vector<256x64xf32>
    %c0_21 = arith.constant 0 : index
    %c0_22 = arith.constant 0 : index
    %c0_23 = arith.constant 0 : index
    %22 = vector.load %arg7[%c0_21, %c0_22, %c0_23] : memref<1x1x64xf32, #tpu.memory_space<vmem>>, vector<1x1x64xf32>
    %23 = vector.shape_cast %22 : vector<1x1x64xf32> to vector<1x64xf32>
    %24 = vector.broadcast %23 : vector<1x64xf32> to vector<256x64xf32>
    %25 = arith.addf %21, %24 : vector<256x64xf32>
    %cst_24 = arith.constant 0.000000e+00 : f32
    %26 = vector.broadcast %cst_24 : f32 to vector<256x64xf32>
    %27 = arith.maximumf %25, %26 : vector<256x64xf32>
    %28 = vector.shape_cast %27 : vector<256x64xf32> to vector<16x16x64xf32>
    %c1 = arith.constant 1 : index
    %c1_25 = arith.constant 1 : index
    %c0_26 = arith.constant 0 : index
    %29 = vector.load %arg16[%c1, %c1_25, %c0_26] : memref<18x18x64xf32, #tpu.memory_space<vmem>>, vector<16x16x64xf32>
    tpu.vector_store %arg16[%c1, %c1_25, %c0_26], %28 {strides = array<i32>} : memref<18x18x64xf32, #tpu.memory_space<vmem>>, vector<16x16x64xf32>,
    %cst_27 = arith.constant 0.000000e+00 : f32
    %30 = vector.broadcast %cst_27 : f32 to vector<256x64xf32>
    %c0_28 = arith.constant 0 : index
    %c0_29 = arith.constant 0 : index
    %c0_30 = arith.constant 0 : index
    %31 = vector.load %arg16[%c0_28, %c0_29, %c0_30] : memref<18x18x64xf32, #tpu.memory_space<vmem>>, vector<16x16x64xf32>
    %32 = vector.shape_cast %31 : vector<16x16x64xf32> to vector<256x64xf32>
    %c0_31 = arith.constant 0 : index
    %c0_32 = arith.constant 0 : index
    %c0_33 = arith.constant 0 : index
    %33 = vector.load %arg8[%c0_31, %c0_32, %c0_33] : memref<9x64x64xf32, #tpu.memory_space<vmem>>, vector<1x64x64xf32>
    %34 = vector.shape_cast %33 : vector<1x64x64xf32> to vector<64x64xf32>
    %cst_34 = arith.constant dense<0.000000e+00> : vector<256x64xf32>
    %35 = tpu.matmul %32, %34, %cst_34 {dimension_numbers = #tpu.dot_dimension_numbers<[1], [0], [0], [1], [0, 0, 1, 1], [], []>} : vector<256x64xf32>, vector<64x64xf32>, vector<256x64xf32> -> vector<256x64xf32>
    %36 = arith.addf %30, %35 : vector<256x64xf32>
    %c0_35 = arith.constant 0 : index
    %c1_36 = arith.constant 1 : index
    %c0_37 = arith.constant 0 : index
    %37 = vector.load %arg16[%c0_35, %c1_36, %c0_37] : memref<18x18x64xf32, #tpu.memory_space<vmem>>, vector<16x16x64xf32>
    %38 = vector.shape_cast %37 : vector<16x16x64xf32> to vector<256x64xf32>
    %c1_38 = arith.constant 1 : index
    %c0_39 = arith.constant 0 : index
    %c0_40 = arith.constant 0 : index
    %39 = vector.load %arg8[%c1_38, %c0_39, %c0_40] : memref<9x64x64xf32, #tpu.memory_space<vmem>>, vector<1x64x64xf32>
    %40 = vector.shape_cast %39 : vector<1x64x64xf32> to vector<64x64xf32>
    %cst_41 = arith.constant dense<0.000000e+00> : vector<256x64xf32>
    %41 = tpu.matmul %38, %40, %cst_41 {dimension_numbers = #tpu.dot_dimension_numbers<[1], [0], [0], [1], [0, 0, 1, 1], [], []>} : vector<256x64xf32>, vector<64x64xf32>, vector<256x64xf32> -> vector<256x64xf32>
    %42 = arith.addf %36, %41 : vector<256x64xf32>
    %c0_42 = arith.constant 0 : index
    %c2 = arith.constant 2 : index
    %c0_43 = arith.constant 0 : index
    %43 = vector.load %arg16[%c0_42, %c2, %c0_43] : memref<18x18x64xf32, #tpu.memory_space<vmem>>, vector<16x16x64xf32>
    %44 = vector.shape_cast %43 : vector<16x16x64xf32> to vector<256x64xf32>
    %c2_44 = arith.constant 2 : index
    %c0_45 = arith.constant 0 : index
    %c0_46 = arith.constant 0 : index
    %45 = vector.load %arg8[%c2_44, %c0_45, %c0_46] : memref<9x64x64xf32, #tpu.memory_space<vmem>>, vector<1x64x64xf32>
    %46 = vector.shape_cast %45 : vector<1x64x64xf32> to vector<64x64xf32>
    %cst_47 = arith.constant dense<0.000000e+00> : vector<256x64xf32>
    %47 = tpu.matmul %44, %46, %cst_47 {dimension_numbers = #tpu.dot_dimension_numbers<[1], [0], [0], [1], [0, 0, 1, 1], [], []>} : vector<256x64xf32>, vector<64x64xf32>, vector<256x64xf32> -> vector<256x64xf32>
    %48 = arith.addf %42, %47 : vector<256x64xf32>
    %c1_48 = arith.constant 1 : index
    %c0_49 = arith.constant 0 : index
    %c0_50 = arith.constant 0 : index
    %49 = vector.load %arg16[%c1_48, %c0_49, %c0_50] : memref<18x18x64xf32, #tpu.memory_space<vmem>>, vector<16x16x64xf32>
    %50 = vector.shape_cast %49 : vector<16x16x64xf32> to vector<256x64xf32>
    %c3 = arith.constant 3 : index
    %c0_51 = arith.constant 0 : index
    %c0_52 = arith.constant 0 : index
    %51 = vector.load %arg8[%c3, %c0_51, %c0_52] : memref<9x64x64xf32, #tpu.memory_space<vmem>>, vector<1x64x64xf32>
    %52 = vector.shape_cast %51 : vector<1x64x64xf32> to vector<64x64xf32>
    %cst_53 = arith.constant dense<0.000000e+00> : vector<256x64xf32>
    %53 = tpu.matmul %50, %52, %cst_53 {dimension_numbers = #tpu.dot_dimension_numbers<[1], [0], [0], [1], [0, 0, 1, 1], [], []>} : vector<256x64xf32>, vector<64x64xf32>, vector<256x64xf32> -> vector<256x64xf32>
    %54 = arith.addf %48, %53 : vector<256x64xf32>
    %c1_54 = arith.constant 1 : index
    %c1_55 = arith.constant 1 : index
    %c0_56 = arith.constant 0 : index
    %55 = vector.load %arg16[%c1_54, %c1_55, %c0_56] : memref<18x18x64xf32, #tpu.memory_space<vmem>>, vector<16x16x64xf32>
    %56 = vector.shape_cast %55 : vector<16x16x64xf32> to vector<256x64xf32>
    %c4 = arith.constant 4 : index
    %c0_57 = arith.constant 0 : index
    %c0_58 = arith.constant 0 : index
    %57 = vector.load %arg8[%c4, %c0_57, %c0_58] : memref<9x64x64xf32, #tpu.memory_space<vmem>>, vector<1x64x64xf32>
    %58 = vector.shape_cast %57 : vector<1x64x64xf32> to vector<64x64xf32>
    %cst_59 = arith.constant dense<0.000000e+00> : vector<256x64xf32>
    %59 = tpu.matmul %56, %58, %cst_59 {dimension_numbers = #tpu.dot_dimension_numbers<[1], [0], [0], [1], [0, 0, 1, 1], [], []>} : vector<256x64xf32>, vector<64x64xf32>, vector<256x64xf32> -> vector<256x64xf32>
    %60 = arith.addf %54, %59 : vector<256x64xf32>
    %c1_60 = arith.constant 1 : index
    %c2_61 = arith.constant 2 : index
    %c0_62 = arith.constant 0 : index
    %61 = vector.load %arg16[%c1_60, %c2_61, %c0_62] : memref<18x18x64xf32, #tpu.memory_space<vmem>>, vector<16x16x64xf32>
    %62 = vector.shape_cast %61 : vector<16x16x64xf32> to vector<256x64xf32>
    %c5 = arith.constant 5 : index
    %c0_63 = arith.constant 0 : index
    %c0_64 = arith.constant 0 : index
    %63 = vector.load %arg8[%c5, %c0_63, %c0_64] : memref<9x64x64xf32, #tpu.memory_space<vmem>>, vector<1x64x64xf32>
    %64 = vector.shape_cast %63 : vector<1x64x64xf32> to vector<64x64xf32>
    %cst_65 = arith.constant dense<0.000000e+00> : vector<256x64xf32>
    %65 = tpu.matmul %62, %64, %cst_65 {dimension_numbers = #tpu.dot_dimension_numbers<[1], [0], [0], [1], [0, 0, 1, 1], [], []>} : vector<256x64xf32>, vector<64x64xf32>, vector<256x64xf32> -> vector<256x64xf32>
    %66 = arith.addf %60, %65 : vector<256x64xf32>
    %c2_66 = arith.constant 2 : index
    %c0_67 = arith.constant 0 : index
    %c0_68 = arith.constant 0 : index
    %67 = vector.load %arg16[%c2_66, %c0_67, %c0_68] : memref<18x18x64xf32, #tpu.memory_space<vmem>>, vector<16x16x64xf32>
    %68 = vector.shape_cast %67 : vector<16x16x64xf32> to vector<256x64xf32>
    %c6 = arith.constant 6 : index
    %c0_69 = arith.constant 0 : index
    %c0_70 = arith.constant 0 : index
    %69 = vector.load %arg8[%c6, %c0_69, %c0_70] : memref<9x64x64xf32, #tpu.memory_space<vmem>>, vector<1x64x64xf32>
    %70 = vector.shape_cast %69 : vector<1x64x64xf32> to vector<64x64xf32>
    %cst_71 = arith.constant dense<0.000000e+00> : vector<256x64xf32>
    %71 = tpu.matmul %68, %70, %cst_71 {dimension_numbers = #tpu.dot_dimension_numbers<[1], [0], [0], [1], [0, 0, 1, 1], [], []>} : vector<256x64xf32>, vector<64x64xf32>, vector<256x64xf32> -> vector<256x64xf32>
    %72 = arith.addf %66, %71 : vector<256x64xf32>
    %c2_72 = arith.constant 2 : index
    %c1_73 = arith.constant 1 : index
    %c0_74 = arith.constant 0 : index
    %73 = vector.load %arg16[%c2_72, %c1_73, %c0_74] : memref<18x18x64xf32, #tpu.memory_space<vmem>>, vector<16x16x64xf32>
    %74 = vector.shape_cast %73 : vector<16x16x64xf32> to vector<256x64xf32>
    %c7 = arith.constant 7 : index
    %c0_75 = arith.constant 0 : index
    %c0_76 = arith.constant 0 : index
    %75 = vector.load %arg8[%c7, %c0_75, %c0_76] : memref<9x64x64xf32, #tpu.memory_space<vmem>>, vector<1x64x64xf32>
    %76 = vector.shape_cast %75 : vector<1x64x64xf32> to vector<64x64xf32>
    %cst_77 = arith.constant dense<0.000000e+00> : vector<256x64xf32>
    %77 = tpu.matmul %74, %76, %cst_77 {dimension_numbers = #tpu.dot_dimension_numbers<[1], [0], [0], [1], [0, 0, 1, 1], [], []>} : vector<256x64xf32>, vector<64x64xf32>, vector<256x64xf32> -> vector<256x64xf32>
    %78 = arith.addf %72, %77 : vector<256x64xf32>
    %c2_78 = arith.constant 2 : index
    %c2_79 = arith.constant 2 : index
    %c0_80 = arith.constant 0 : index
    %79 = vector.load %arg16[%c2_78, %c2_79, %c0_80] : memref<18x18x64xf32, #tpu.memory_space<vmem>>, vector<16x16x64xf32>
    %80 = vector.shape_cast %79 : vector<16x16x64xf32> to vector<256x64xf32>
    %c8 = arith.constant 8 : index
    %c0_81 = arith.constant 0 : index
    %c0_82 = arith.constant 0 : index
    %81 = vector.load %arg8[%c8, %c0_81, %c0_82] : memref<9x64x64xf32, #tpu.memory_space<vmem>>, vector<1x64x64xf32>
    %82 = vector.shape_cast %81 : vector<1x64x64xf32> to vector<64x64xf32>
    %cst_83 = arith.constant dense<0.000000e+00> : vector<256x64xf32>
    %83 = tpu.matmul %80, %82, %cst_83 {dimension_numbers = #tpu.dot_dimension_numbers<[1], [0], [0], [1], [0, 0, 1, 1], [], []>} : vector<256x64xf32>, vector<64x64xf32>, vector<256x64xf32> -> vector<256x64xf32>
    %84 = arith.addf %78, %83 : vector<256x64xf32>
    %c0_84 = arith.constant 0 : index
    %c0_85 = arith.constant 0 : index
    %c0_86 = arith.constant 0 : index
    %85 = vector.load %arg9[%c0_84, %c0_85, %c0_86] : memref<1x1x64xf32, #tpu.memory_space<vmem>>, vector<1x1x64xf32>
    %86 = vector.shape_cast %85 : vector<1x1x64xf32> to vector<1x64xf32>
    %87 = vector.broadcast %86 : vector<1x64xf32> to vector<256x64xf32>
    %88 = arith.mulf %84, %87 : vector<256x64xf32>
    %c0_87 = arith.constant 0 : index
    %c0_88 = arith.constant 0 : index
    %c0_89 = arith.constant 0 : index
    %89 = vector.load %arg10[%c0_87, %c0_88, %c0_89] : memref<1x1x64xf32, #tpu.memory_space<vmem>>, vector<1x1x64xf32>
    %90 = vector.shape_cast %89 : vector<1x1x64xf32> to vector<1x64xf32>
    %91 = vector.broadcast %90 : vector<1x64xf32> to vector<256x64xf32>
    %92 = arith.addf %88, %91 : vector<256x64xf32>
    %cst_90 = arith.constant 0.000000e+00 : f32
    %93 = vector.broadcast %cst_90 : f32 to vector<256x64xf32>
    %94 = arith.maximumf %92, %93 : vector<256x64xf32>
    %95 = arith.addf %12, %94 : vector<256x64xf32>
    %c0_91 = arith.constant 0 : index
    %c0_92 = arith.constant 0 : index
    %96 = vector.load %arg11[%c0_91, %c0_92] : memref<64x64xf32, #tpu.memory_space<vmem>>, vector<64x64xf32>
    %cst_93 = arith.constant dense<0.000000e+00> : vector<256x64xf32>
    %97 = tpu.matmul %95, %96, %cst_93 {dimension_numbers = #tpu.dot_dimension_numbers<[1], [0], [0], [1], [0, 0, 1, 1], [], []>} : vector<256x64xf32>, vector<64x64xf32>, vector<256x64xf32> -> vector<256x64xf32>
    %c0_94 = arith.constant 0 : index
    %c0_95 = arith.constant 0 : index
    %98 = vector.load %arg13[%c0_94, %c0_95] : memref<1x128xf32, #tpu.memory_space<vmem>>, vector<1x64xf32>
    %99 = vector.broadcast %98 : vector<1x64xf32> to vector<256x64xf32>
    %100 = arith.mulf %97, %99 : vector<256x64xf32>
    %c0_96 = arith.constant 0 : index
    %c0_97 = arith.constant 0 : index
    %101 = vector.load %arg14[%c0_96, %c0_97] : memref<1x128xf32, #tpu.memory_space<vmem>>, vector<1x64xf32>
    %102 = vector.broadcast %101 : vector<1x64xf32> to vector<256x64xf32>
    %103 = arith.addf %100, %102 : vector<256x64xf32>
    %cst_98 = arith.constant 0.000000e+00 : f32
    %104 = vector.broadcast %cst_98 : f32 to vector<256x64xf32>
    %105 = arith.maximumf %103, %104 : vector<256x64xf32>
    %c0_99 = arith.constant 0 : index
    %c0_100 = arith.constant 0 : index
    %106 = vector.load %arg12[%c0_99, %c0_100] : memref<128x64xf32, #tpu.memory_space<vmem>>, vector<128x64xf32>
    %cst_101 = arith.constant dense<0.000000e+00> : vector<256x64xf32>
    %107 = tpu.matmul %2, %106, %cst_101 {dimension_numbers = #tpu.dot_dimension_numbers<[1], [0], [0], [1], [0, 0, 1, 1], [], []>} : vector<256x128xf32>, vector<128x64xf32>, vector<256x64xf32> -> vector<256x64xf32>
    %c0_102 = arith.constant 0 : index
    %c64 = arith.constant 64 : index
    %108 = vector.load %arg13[%c0_102, %c64] : memref<1x128xf32, #tpu.memory_space<vmem>>, vector<1x64xf32>
    %109 = vector.broadcast %108 : vector<1x64xf32> to vector<256x64xf32>
    %110 = arith.mulf %107, %109 : vector<256x64xf32>
    %c0_103 = arith.constant 0 : index
    %c64_104 = arith.constant 64 : index
    %111 = vector.load %arg14[%c0_103, %c64_104] : memref<1x128xf32, #tpu.memory_space<vmem>>, vector<1x64xf32>
    %112 = vector.broadcast %111 : vector<1x64xf32> to vector<256x64xf32>
    %113 = arith.addf %110, %112 : vector<256x64xf32>
    %cst_105 = arith.constant 0.000000e+00 : f32
    %114 = vector.broadcast %cst_105 : f32 to vector<256x64xf32>
    %115 = arith.maximumf %113, %114 : vector<256x64xf32>
    %116 = vector.shape_cast %105 : vector<256x64xf32> to vector<16x16x64xf32>
    %c0_106 = arith.constant 0 : index
    %c0_107 = arith.constant 0 : index
    %c0_108 = arith.constant 0 : index
    %c0_109 = arith.constant 0 : index
    %117 = vector.load %arg15[%c0_106, %c0_107, %c0_108, %c0_109] : memref<1x16x16x128xf32, #tpu.memory_space<vmem>>, vector<1x16x16x64xf32>
    %118 = vector.shape_cast %117 : vector<1x16x16x64xf32> to vector<16x16x64xf32>
    %119 = vector.shape_cast %116 : vector<16x16x64xf32> to vector<1x16x16x64xf32>
    tpu.vector_store %arg15[%c0_106, %c0_107, %c0_108, %c0_109], %119 {strides = array<i32>} : memref<1x16x16x128xf32, #tpu.memory_space<vmem>>, vector<1x16x16x64xf32>,
    %120 = vector.shape_cast %115 : vector<256x64xf32> to vector<16x16x64xf32>
    %c0_110 = arith.constant 0 : index
    %c0_111 = arith.constant 0 : index
    %c0_112 = arith.constant 0 : index
    %c64_113 = arith.constant 64 : index
    %121 = vector.load %arg15[%c0_110, %c0_111, %c0_112, %c64_113] : memref<1x16x16x128xf32, #tpu.memory_space<vmem>>, vector<1x16x16x64xf32>
    %122 = vector.shape_cast %121 : vector<1x16x16x64xf32> to vector<16x16x64xf32>
    %123 = vector.shape_cast %120 : vector<16x16x64xf32> to vector<1x16x16x64xf32>
    tpu.vector_store %arg15[%c0_110, %c0_111, %c0_112, %c64_113], %123 {strides = array<i32>} : memref<1x16x16x128xf32, #tpu.memory_space<vmem>>, vector<1x16x16x64xf32>,
    return
  }
  func.func @transform_0(%arg0: i32) -> (i32, i32, i32, i32) {
    %c0_i32 = arith.constant 0 : i32
    %c0_i32_0 = arith.constant 0 : i32
    %c0_i32_1 = arith.constant 0 : i32
    %c0_i32_2 = arith.constant 0 : i32
    return %arg0, %c0_i32, %c0_i32_0, %c0_i32_1 : i32, i32, i32, i32
  }
  func.func @transform_1(%arg0: i32) -> (i32, i32) {
    %c0_i32 = arith.constant 0 : i32
    %c0_i32_0 = arith.constant 0 : i32
    %c0_i32_1 = arith.constant 0 : i32
    return %c0_i32, %c0_i32_0 : i32, i32
  }
  func.func @transform_2(%arg0: i32) -> (i32, i32) {
    %c0_i32 = arith.constant 0 : i32
    %c0_i32_0 = arith.constant 0 : i32
    %c0_i32_1 = arith.constant 0 : i32
    return %c0_i32, %c0_i32_0 : i32, i32
  }
  func.func @transform_3(%arg0: i32) -> (i32, i32) {
    %c0_i32 = arith.constant 0 : i32
    %c0_i32_0 = arith.constant 0 : i32
    %c0_i32_1 = arith.constant 0 : i32
    return %c0_i32, %c0_i32_0 : i32, i32
  }
  func.func @transform_4(%arg0: i32) -> (i32, i32, i32) {
    %c0_i32 = arith.constant 0 : i32
    %c0_i32_0 = arith.constant 0 : i32
    %c0_i32_1 = arith.constant 0 : i32
    %c0_i32_2 = arith.constant 0 : i32
    return %c0_i32, %c0_i32_0, %c0_i32_1 : i32, i32, i32
  }
  func.func @transform_5(%arg0: i32) -> (i32, i32, i32) {
    %c0_i32 = arith.constant 0 : i32
    %c0_i32_0 = arith.constant 0 : i32
    %c0_i32_1 = arith.constant 0 : i32
    %c0_i32_2 = arith.constant 0 : i32
    return %c0_i32, %c0_i32_0, %c0_i32_1 : i32, i32, i32
  }
  func.func @transform_6(%arg0: i32) -> (i32, i32, i32) {
    %c0_i32 = arith.constant 0 : i32
    %c0_i32_0 = arith.constant 0 : i32
    %c0_i32_1 = arith.constant 0 : i32
    %c0_i32_2 = arith.constant 0 : i32
    return %c0_i32, %c0_i32_0, %c0_i32_1 : i32, i32, i32
  }
  func.func @transform_7(%arg0: i32) -> (i32, i32, i32) {
    %c0_i32 = arith.constant 0 : i32
    %c0_i32_0 = arith.constant 0 : i32
    %c0_i32_1 = arith.constant 0 : i32
    %c0_i32_2 = arith.constant 0 : i32
    return %c0_i32, %c0_i32_0, %c0_i32_1 : i32, i32, i32
  }
  func.func @transform_8(%arg0: i32) -> (i32, i32, i32) {
    %c0_i32 = arith.constant 0 : i32
    %c0_i32_0 = arith.constant 0 : i32
    %c0_i32_1 = arith.constant 0 : i32
    %c0_i32_2 = arith.constant 0 : i32
    return %c0_i32, %c0_i32_0, %c0_i32_1 : i32, i32, i32
  }
  func.func @transform_9(%arg0: i32) -> (i32, i32, i32) {
    %c0_i32 = arith.constant 0 : i32
    %c0_i32_0 = arith.constant 0 : i32
    %c0_i32_1 = arith.constant 0 : i32
    %c0_i32_2 = arith.constant 0 : i32
    return %c0_i32, %c0_i32_0, %c0_i32_1 : i32, i32, i32
  }
  func.func @transform_10(%arg0: i32) -> (i32, i32) {
    %c0_i32 = arith.constant 0 : i32
    %c0_i32_0 = arith.constant 0 : i32
    %c0_i32_1 = arith.constant 0 : i32
    return %c0_i32, %c0_i32_0 : i32, i32
  }
  func.func @transform_11(%arg0: i32) -> (i32, i32) {
    %c0_i32 = arith.constant 0 : i32
    %c0_i32_0 = arith.constant 0 : i32
    %c0_i32_1 = arith.constant 0 : i32
    return %c0_i32, %c0_i32_0 : i32, i32
  }
  func.func @transform_12(%arg0: i32) -> (i32, i32) {
    %c0_i32 = arith.constant 0 : i32
    %c0_i32_0 = arith.constant 0 : i32
    %c0_i32_1 = arith.constant 0 : i32
    return %c0_i32, %c0_i32_0 : i32, i32
  }
  func.func @transform_13(%arg0: i32) -> (i32, i32) {
    %c0_i32 = arith.constant 0 : i32
    %c0_i32_0 = arith.constant 0 : i32
    %c0_i32_1 = arith.constant 0 : i32
    return %c0_i32, %c0_i32_0 : i32, i32
  }
  func.func @transform_14(%arg0: i32) -> (i32, i32, i32, i32) {
    %c0_i32 = arith.constant 0 : i32
    %c0_i32_0 = arith.constant 0 : i32
    %c0_i32_1 = arith.constant 0 : i32
    %c0_i32_2 = arith.constant 0 : i32
    return %arg0, %c0_i32, %c0_i32_0, %c0_i32_1 : i32, i32, i32, i32
  }
}

</mosaic_0001>

<bundles_post_ra>
// kernel: yolo_bottleneck_cspl.1
= control target key start
LH: loop header
LB: loop body
LE: loop exit
PB: predicated region body
PF: predicated region fallthrough
CT: control target
= control target key end

     0   :  { %s7496_s0 = inlined_call_operand.hbm [shape: f32[2,16,16,128], index: 0, kind: input, shape index: {}]   ;;  %s7497_s1 = inlined_call_operand.vmem [shape: f32[128,64], index: 1, kind: input, shape index: {}]   ;;  %s7498_s2 = inlined_call_operand.vmem [shape: f32[1,64], index: 2, kind: input, shape index: {}]   ;;  %s7499_s3 = inlined_call_operand.vmem [shape: f32[1,64], index: 3, kind: input, shape index: {}]   ;;  %s7500_s4 = inlined_call_operand.vmem [shape: f32[1,64,64], index: 4, kind: input, shape index: {}]   ;;  %s7501_s5 = inlined_call_operand.vmem [shape: f32[1,1,64], index: 5, kind: input, shape index: {}]   ;;  %s7502_s6 = inlined_call_operand.vmem [shape: f32[1,1,64], index: 6, kind: input, shape index: {}]   ;;  %s7503_s7 = inlined_call_operand.hbm [shape: f32[9,64,64], index: 7, kind: input, shape index: {}]   ;;  %s7504_s8 = inlined_call_operand.vmem [shape: f32[1,1,64], index: 8, kind: input, shape index: {}]   ;;  %s7505_s9 = inlined_call_operand.vmem [shape: f32[1,1,64], index: 9, kind: input, shape index: {}]   ;;  %s7506_s10 = inlined_call_operand.vmem [shape: f32[64,64], index: 10, kind: input, shape index: {}]   ;;  %s7507_s11 = inlined_call_operand.vmem [shape: f32[128,64], index: 11, kind: input, shape index: {}]   ;;  %s7508_s12 = inlined_call_operand.vmem [shape: f32[1,128], index: 12, kind: input, shape index: {}]   ;;  %s7509_s13 = inlined_call_operand.vmem [shape: f32[1,128], index: 13, kind: input, shape index: {}]   ;;  %s7510_s14 = inlined_call_operand.hbm [shape: f32[2,16,16,128], index: 14, kind: output, shape index: {}]  }
   0x1   :  { %7609 = sst [smem:[#allocation78_spill]] %s7496_s0 }
   0x2   :  { %7610 = sst [smem:[#allocation79_spill]] %s7497_s1 }
   0x3   :  { %7611 = sst [smem:[#allocation80_spill]] %s7503_s7 }
   0x4   :  { %7612 = sst [smem:[#allocation81_spill]] %s7504_s8 }
   0x5   :  { %7613 = sst [smem:[#allocation82_spill]] %s7505_s9 }
   0x6   :  { %7614 = sst [smem:[#allocation83_spill]] %s7510_s14 }
   0x7   :  { %19 = vsyncpa [#allocation4], 0 }
   0x8   :  { %21 = vsyncpa [#allocation4 + $0x1], 0 }
   0x9   :  { %22 = vsyncpa [#allocation7], 0 }
   0xa   :  { %23 = vsyncpa [#allocation5], 0 }
   0xb   :  { %25 = vsyncpa [#allocation5 + $0x1], 0  ;;  %s5349_s29 = smov 0   ;;  %s5351_s30 = smov 0  }
   0xc   :  { %s5353_s15 = smov 0   ;;  %s5355_s16 = smov 0  }
   0xd LB: > { %7615 = sst [smem:[#allocation12_spill]] %s5253_s29  ;;  %s5370_s17 = sadd.s32 4294967295, %s5265_s16   ;;  %s5265_s16 = sphi %s5355_s16, %s7797_s16   ;;  %s5261_s15 = sphi %s5353_s15, %s7796_s15   ;;  %s5257_s30 = sphi %s5351_s30, %s7795_s30   ;;  %s5253_s29 = sphi %s5349_s29, %s7794_s29  }
   0xe   : > { %7616 = sst [smem:[#allocation13_spill]] %s5261_s15  ;;  %s4634_s18 = sadd.s32 4294967294, %s5265_s16  }
   0xf   : > { %p51_p0 = scmp.ne.s32.totalorder %s5257_s30, %s5253_s29  ;;  %p52_p1 = scmp.eq.s32.totalorder %s5370_s17, 0 }
  0x10   : > { %p348_p2 = scmp.eq.s32.totalorder %s5370_s17, 1  ;;  %p354_p3 = scmp.eq.s32.totalorder %s4634_s18, 1 }
  0x11   : > { %p5379_p4 = por %p52_p1, %p51_p0  ;;  %p4635_p5 = scmp.ge.s32.totalorder %s5265_s16, 1 }
  0x12   : > { %p5384_p6 = por %p354_p3, %p51_p0  ;;  %p361_p7 = scmp.lt.s32.totalorder %s5265_s16, 3 }
  0x13   : > { %s7620_s7 = sld [smem:[#allocation80_spill]]  ;;  %s5267_s25 = smov [#allocation6]  }
  0x14   : > { %s7618_s20 = scalar_select %p5384_p6, 1, 0 }
  0x15   : > { %p5392_p8 = pnand %p4635_p5, %p361_p7  ;;  %s392_s26 = sshll.u32 %s5267_s25, 4  ;;  %s393_s26 = int_to_ptr.vmem [resolvable:$true] %s392_s26 }
  0x16   : > { %7619 = sst [smem:[#allocation14_spill]] %s7618_s20  ;;  %s5402_s27 = sadd.s32 1, %s5265_s16  }
  0x17   : > { %p5036_p9 = pneg %p5392_p8  ;;  %s7516_s28 = smov 128  }
  0x18   : > { %s7517_s18 = smov 8   ;;  %s35_s21 = ssub.s32 %s5265_s16, %s5402_s27 }
  0x19   : > { %s390_s23 = sshll.u32 %s7620_s7, 4  ;;  %p5037_p10 = pnand %p5036_p9, %p52_p1  ;;  %s391_s23 = int_to_ptr.hbm [resolvable:$true] %s390_s23 }
  0x1a   : > { %s38_s22 = sadd.s32 1, %s5261_s15  ;;  %p36_p12 = scmp.eq.s32.totalorder %s35_s21, 0 }
  0x1b   : > { %5039 = dma.hbm_to_vmem [thread:$0]  (!%p5037_p10), %s391_s23, 9216, %s393_s26, [#allocation7], %s7516_s28, %s7516_s28, %s7517_s18  }
  0x1c   : > { %p45_p13 = scmp.ne.s32.totalorder %s5261_s15, %s5257_s30  ;;  %p46_p0 = scmp.eq.s32.totalorder %s5265_s16, 0 }
  0x1d   : > { %s5414_s25 = scalar_select %p36_p12, %s5261_s15, %s38_s22  }
  0x1e   : > { %p5418_p3 = por %p348_p2, %p45_p13  ;;  %p5049_p5 = scmp.lt.s32.totalorder %s5265_s16, 2 }
  0x1f   : > { %7622 = sst [smem:[#allocation15_spill]] %s5414_s25  ;;  %s424_s20 = sand.u32 1, %s5261_s15  }
  0x20   : > { %s5002_s29 = sshll.u32 %s5265_s16, 8  ;;  %p47_p7 = por %p46_p0, %p45_p13 }
  0x21   : > { %s4638_s14 = sshll.u32 %s424_s20, 8  ;;  %s7624_s0 = sld [smem:[#allocation78_spill]] }
  0x22   : > { %s428_s21 = scalar_lea.vmem [#allocation3], %s4638_s14  ;;  %p5428_p9 = pnand %p5049_p5, %p47_p7 }
  0x23   : > { %s436_s28 = sshll.u32 %s428_s21, 4  ;;  %s425_s18 = scalar_lea.sflag [#allocation4], %s424_s20  ;;  %s437_s28 = int_to_ptr.vmem [resolvable:$true] %s436_s28 }
  0x24   : > { %p5169_p10 = pneg %p5428_p9 }
  0x27   : > { %s433_s23 = scalar_lea.hbm %s7624_s0, %s5002_s29  ;;  %s5172_s14 = scalar_lea.hbm %s7624_s0, 512 }
  0x28   : > { %s434_s26 = sshll.u32 %s433_s23, 4  ;;  %s435_s26 = int_to_ptr.hbm [resolvable:$true] %s434_s26 }
  0x29   : > { %s5165_s25 = sshra.s32 %s435_s26, 4  ;;  %s5166_s25 = int_to_ptr.hbm [resolvable:$true] %s5165_s25 }
  0x2a   : > { %s5167_s15 = scalar_lea.hbm %s5166_s25, 256  ;;  %p5173_p0 = scmp.lt.s32.totalorder %s5166_s25, %s7624_s0 }
  0x2b   : > { %p5168_p2 = scmp.ne.s32.totalorder %s5166_s25, %s5167_s15  ;;  %p5174_p5 = scmp.lt.s32.totalorder %s5172_s14, %s5167_s15 }
  0x2d   : > { %p5170_p12 = pnand %p5169_p10, %p5168_p2  ;;  %p5175_p7 = por %p5174_p5, %p5173_p0 }
  0x2f   : > { %p5171_p13 = pneg %p5170_p12 }
  0x31   : > { %p5176_p11 = pnand %p5175_p7, %p5171_p13 }
  0x33   : > { %5179 = shalt.err (!%p5176_p11)
}
  0x34   : > { %s7626_s20 = smov 8   ;;  %s7627_s21 = smov 128  }
  0x35   : > { %5043 = dma.hbm_to_vmem [thread:$0]  (!%p5428_p9), %s435_s26, 4096, %s437_s28, %s425_s18, %s7627_s21, %s7627_s21, %s7626_s20  }
  0x36   : > { %448 = sbr.rel (%p5392_p8) target bundleno = 1531 (0x5fb), region = 76 }
  0x3b   : > { %s5448_s8 = sand.u32 1, %s5257_s30  }
  0x3c   : > { %s4642_s15 = sshll.u32 %s5448_s8, 8  ;;  %s451_s25 = scalar_lea.sflag [#allocation4], %s5448_s8 }
  0x3d   : > { %s5454_s9 = scalar_lea.vmem [#allocation3], %s4642_s15 }
  0x3e   : > { %5240 = dma.done.wait (%p5379_p4), %s451_s25, 4096  }
  0x3f   : > { %5242 = vsyncadd (%p5379_p4), %s451_s25, 4294963200 }
  0x40   : > { %5244 = dma.done.wait (%p52_p1), [#allocation7], 9216  }
  0x41   : > { %5246 = vsyncadd (%p52_p1), [#allocation7], 4294958080  ;;  %s7628_s1 = sld [smem:[#allocation79_spill]]  ;;  %v833_v4 = vld [vmem:[%s7500_s4 + $0x38] sm:$0xff]  ;;  %v505_v17 = vld [vmem:[%s5454_s9] sm:$0xff]  ;;  %vm770_vm0 = vcmask 523264  }
  0x42   : > { %5004 = vmatpush.msra.mxu1 %v833_v4  ;;  %5005 = vmatpush.msra.mxu2 %v833_v4  ;;  %v832_v18 = vld [vmem:[%s7500_s4 + $0x30] sm:$0xff]  ;;  %v506_v19 = vld [vmem:[%s5454_s9 + $0x8] sm:$0xff]  ;;  %v507_v20 = vld [vmem:[%s5454_s9 + $0x10] sm:$0xff]  ;;  %vm773_vm1 = vcmask 517120   ;;  %s5271_s22 = smov 64   ;;  %s7721_s26 = sld [smem:[#allocation81_spill]] }
  0x43   : > { %5006 = vmatpush.msra.mxu3 %v833_v4  ;;  %v508_v21 = vld [vmem:[%s5454_s9 + $0x18] sm:$0xff]  ;;  %v509_v22 = vld [vmem:[%s5454_s9 + $0x20] sm:$0xff]  ;;  %v510_v24 = vld [vmem:[%s5454_s9 + $0x28] sm:$0xff]  ;;  %s7722_s29 = sld [smem:[#allocation82_spill]]  ;;  %vm4502_vm2 = vcmask 1048064   ;;  %s7134_s24 = scalar_lea.vmem [#allocation8], %s4642_s15 }
  0x44   : > { %5007 = vmatpush.msra.mxu1 %v832_v18  ;;  %5008 = vmatpush.msra.mxu2 %v832_v18  ;;  %v831_v23 = vld [vmem:[%s7500_s4 + $0x28] sm:$0xff]  ;;  %v511_v25 = vld [vmem:[%s5454_s9 + $0x30] sm:$0xff]  ;;  %v513_v27 = vld [vmem:[%s5454_s9 + $0x40] sm:$0xff]  ;;  %s4548_s21 = sshll.u32 %s7134_s24, 4  ;;  %s4549_s21 = int_to_ptr.vmem [resolvable:$true] %s4548_s21 }
  0x45   : > { %5009 = vmatpush.msra.mxu3 %v832_v18  ;;  %v512_v26 = vld [vmem:[%s5454_s9 + $0x38] sm:$0xff]  ;;  %v830_v28 = vld [vmem:[%s7500_s4 + $0x20] sm:$0xff]  ;;  %v514_v29 = vld [vmem:[%s5454_s9 + $0x48] sm:$0xff] }
  0x46   : > { %5010 = vmatpush.msra.mxu1 %v831_v23  ;;  %5011 = vmatpush.msra.mxu2 %v831_v23  ;;  %v515_v30 = vld [vmem:[%s5454_s9 + $0x50] sm:$0xff]  ;;  %v516_v31 = vld [vmem:[%s5454_s9 + $0x58] sm:$0xff]  ;;  %v517_v32 = vld [vmem:[%s5454_s9 + $0x60] sm:$0xff] }
  0x47   : > { %v552_v0 = vld [vmem:[%s7628_s1 + $0x78] sm:$0xff]  ;;  %v551_v1 = vld [vmem:[%s7628_s1 + $0x70] sm:$0xff]  ;;  %v550_v2 = vld [vmem:[%s7628_s1 + $0x68] sm:$0xff]  ;;  %5012 = vmatpush.msra.mxu3 %v831_v23 }
  0x48   : > { %553 = vmatpush.msra.mxu0 %v552_v0  ;;  %v549_v3 = vld [vmem:[%s7628_s1 + $0x60] sm:$0xff]  ;;  %v548_v5 = vld [vmem:[%s7628_s1 + $0x58] sm:$0xff]  ;;  %v547_v6 = vld [vmem:[%s7628_s1 + $0x50] sm:$0xff]  ;;  %5013 = vmatpush.msra.mxu1 %v830_v28 }
  0x49   : > { %v546_v7 = vld [vmem:[%s7628_s1 + $0x48] sm:$0xff]  ;;  %v545_v8 = vld [vmem:[%s7628_s1 + $0x40] sm:$0xff]  ;;  %v544_v9 = vld [vmem:[%s7628_s1 + $0x38] sm:$0xff]  ;;  %5014 = vmatpush.msra.mxu2 %v830_v28  ;;  %5015 = vmatpush.msra.mxu3 %v830_v28  ;;  %s7723_s23 = smov %s7722_s29 }
  0x4a   : > { %554 = vmatpush.msra.mxu0 %v551_v1  ;;  %v543_v10 = vld [vmem:[%s7628_s1 + $0x30] sm:$0xff]  ;;  %v542_v11 = vld [vmem:[%s7628_s1 + $0x28] sm:$0xff]  ;;  %v541_v12 = vld [vmem:[%s7628_s1 + $0x20] sm:$0xff] }
  0x4b   : > { %v540_v13 = vld [vmem:[%s7628_s1 + $0x18] sm:$0xff]  ;;  %v539_v14 = vld [vmem:[%s7628_s1 + $0x10] sm:$0xff]  ;;  %v538_v15 = vld [vmem:[%s7628_s1 + $0x8] sm:$0xff] }
  0x4c   : > { %555 = vmatpush.msra.mxu0 %v550_v2  ;;  %v537_v16 = vld [vmem:[%s7628_s1] sm:$0xff]  ;;  %v518_v33 = vld [vmem:[%s5454_s9 + $0x68] sm:$0xff]  ;;  %v520_v36 = vld [vmem:[%s5454_s9 + $0x78] sm:$0xff] }
  0x4d   : > { %v829_v34 = vld [vmem:[%s7500_s4 + $0x18] sm:$0xff]  ;;  %v519_v35 = vld [vmem:[%s5454_s9 + $0x70] sm:$0xff]  ;;  %v521_v38 = vld [vmem:[%s5454_s9 + $0x80] sm:$0xff] }
  0x4e   : > { %556 = vmatpush.msra.mxu0 %v549_v3  ;;  %5016 = vmatpush.msra.mxu1 %v829_v34  ;;  %v522_v40 = vld [vmem:[%s5454_s9 + $0x88] sm:$0xff]  ;;  %v828_v41 = vld [vmem:[%s7500_s4 + $0x10] sm:$0xff]  ;;  %v827_v42 = vld [vmem:[%s7500_s4 + $0x8] sm:$0xff] }
  0x4f   : > { %5017 = vmatpush.msra.mxu2 %v829_v34  ;;  %5018 = vmatpush.msra.mxu3 %v829_v34  ;;  %v826_v43 = vld [vmem:[%s7500_s4] sm:$0xff]  ;;  %v524_v47 = vld [vmem:[%s5454_s9 + $0x98] sm:$0xff]  ;;  %v525_v49 = vld [vmem:[%s5454_s9 + $0xa0] sm:$0xff] }
  0x50   : > { %557 = vmatpush.msra.mxu0 %v548_v5  ;;  %5019 = vmatpush.msra.mxu1 %v828_v41  ;;  %v523_v45 = vld [vmem:[%s5454_s9 + $0x90] sm:$0xff]  ;;  %v526_v52 = vld [vmem:[%s5454_s9 + $0xa8] sm:$0xff]  ;;  %v528_v63 = vld [vmem:[%s5454_s9 + $0xb8] sm:$0xff] }
  0x51   : > { %5020 = vmatpush.msra.mxu2 %v828_v41  ;;  %5021 = vmatpush.msra.mxu3 %v828_v41  ;;  %v5570_v50 = vld [vmem:[%s7498_s2] ss:$0 sm:$0xff] }
  0x52   : > { %558 = vmatpush.msra.mxu0 %v547_v6  ;;  %5022 = vmatpush.msra.mxu1 %v827_v42  ;;  %v5576_v53 = vld [vmem:[%s7499_s3] ss:$0 sm:$0xff] }
  0x53   : > { %5023 = vmatpush.msra.mxu2 %v827_v42  ;;  %5024 = vmatpush.msra.mxu3 %v827_v42  ;;  %v527_v58 = vld [vmem:[%s5454_s9 + $0xb0] sm:$0xff] }
  0x54   : > { %559 = vmatpush.msra.mxu0 %v546_v7  ;;  %5025 = vmatpush.msra.mxu1 %v826_v43 }
  0x55   : > { %5026 = vmatpush.msra.mxu2 %v826_v43  ;;  %5027 = vmatpush.msra.mxu3 %v826_v43 }
  0x56   : > { %560 = vmatpush.msra.mxu0 %v545_v8 }
  0x58   : > { %561 = vmatpush.msra.mxu0 %v544_v9  ;;  %v530_v9 = vld [vmem:[%s5454_s9 + $0xc8] sm:$0xff] }
  0x5a   : > { %562 = vmatpush.msra.mxu0 %v543_v10 }
  0x5c   : > { %563 = vmatpush.msra.mxu0 %v542_v11 }
  0x5e   : > { %564 = vmatpush.msra.mxu0 %v541_v12 }
  0x60   : > { %565 = vmatpush.msra.mxu0 %v540_v13 }
  0x62   : > { %566 = vmatpush.msra.mxu0 %v539_v14  ;;  %v531_v14 = vld [vmem:[%s5454_s9 + $0xd0] sm:$0xff] }
  0x64   : > { %567 = vmatpush.msra.mxu0 %v538_v15 }
  0x66   : > { %568 = vmatpush.msra.mxu0 %v537_v16 }
  0x67   : > { %569 = vmatmul.f32.vlgmr.msra.gmra.mxu0 %v505_v17 }
  0x68   : > { %938 = vmatpush.msrb.mxu0 %v833_v4  ;;  %v529_v4 = vld [vmem:[%s5454_s9 + $0xc0] sm:$0xff] }
  0x6a   : > { %939 = vmatpush.msrb.mxu0 %v832_v18 }
  0x6c   : > { %940 = vmatpush.msrb.mxu0 %v831_v23 }
  0x6e   : > { %941 = vmatpush.msrb.mxu0 %v830_v28 }
  0x6f   : > { %572 = vmatmul.f32.gmra.mxu0 %v506_v19  ;;  %v532_v19 = vld [vmem:[%s5454_s9 + $0xd8] sm:$0xff] }
  0x70   : > { %942 = vmatpush.msrb.mxu0 %v829_v34  ;;  %v535_v34 = vld [vmem:[%s5454_s9 + $0xf0] sm:$0xff] }
  0x72   : > { %943 = vmatpush.msrb.mxu0 %v828_v41  ;;  %v536_v41 = vld [vmem:[%s5454_s9 + $0xf8] sm:$0xff] }
  0x74   : > { %944 = vmatpush.msrb.mxu0 %v827_v42 }
  0x76   : > { %945 = vmatpush.msrb.mxu0 %v826_v43 }
  0x77   : > { %575 = vmatmul.f32.gmra.mxu0 %v507_v20 }
  0x7f   : > { %578 = vmatmul.f32.gmra.mxu0 %v508_v21 }
  0x87   : > { %581 = vmatmul.f32.gmra.mxu0 %v509_v22 }
  0x8f   : > { %584 = vmatmul.f32.gmra.mxu0 %v510_v24  ;;  %v533_v24 = vld [vmem:[%s5454_s9 + $0xe0] sm:$0xff] }
  0x97   : > { %587 = vmatmul.f32.gmra.mxu0 %v511_v25 }
  0x9f   : > { %590 = vmatmul.f32.gmra.mxu0 %v512_v26 }
  0xa7   : > { %593 = vmatmul.f32.gmra.mxu0 %v513_v27 }
  0xaf   : > { %596 = vmatmul.f32.gmra.mxu0 %v514_v29  ;;  %v534_v29 = vld [vmem:[%s5454_s9 + $0xe8] sm:$0xff] }
  0xb7   : > { %599 = vmatmul.f32.gmra.mxu0 %v515_v30 }
  0xbf   : > { %602 = vmatmul.f32.gmra.mxu0 %v516_v31 }
  0xc7   : > { %605 = vmatmul.f32.gmra.mxu0 %v517_v32 }
  0xcf   : > { %608 = vmatmul.f32.gmra.mxu0 %v518_v33 }
  0xd7   : > { %611 = vmatmul.f32.gmra.mxu0 %v519_v35 }
  0xdf   : > { %614 = vmatmul.f32.gmra.mxu0 %v520_v36 }
  0xe4   : > { %v5543_v37 = vpop.f32.mrf.mxu0 }
  0xe5   : > { %v670_v42 = vmul.f32 %v5570_v50, %v5543_v37 }
  0xe7   : > { %617 = vmatmul.f32.gmra.mxu0 %v521_v38 }
  0xec   : > { %v5546_v39 = vpop.f32.mrf.mxu0 }
  0xed   : > { %v671_v37 = vmul.f32 %v5570_v50, %v5546_v39 }
  0xef   : > { %620 = vmatmul.f32.gmra.mxu0 %v522_v40 }
  0xf4   : > { %v5558_v44 = vpop.f32.mrf.mxu0 }
  0xf7   : > { %623 = vmatmul.f32.gmra.mxu0 %v523_v45 }
  0xfc   : > { %v5561_v46 = vpop.f32.mrf.mxu0 }
  0xff   : > { %626 = vmatmul.f32.gmra.mxu0 %v524_v47  ;;  %v5675_v47 = vadd.f32 %v5576_v53, %v670_v42 }
 0x101   : > { %7640 = vst [vmem:[#allocation27_spill] sm:$0xff] %v5675_v47 }
 0x104   : > { %v5564_v48 = vpop.f32.mrf.mxu0 }
 0x107   : > { %629 = vmatmul.f32.gmra.mxu0 %v525_v49 }
 0x10c   : > { %v585_v51 = vpop.f32.mrf.mxu0 }
 0x10d   : > { %v675_v54 = vmul.f32 %v5570_v50, %v585_v51 }
 0x10f   : > { %v5580_v55 = vadd.f32 %v5576_v53, %v675_v54  ;;  %632 = vmatmul.f32.gmra.mxu0 %v526_v52  ;;  %v7550_v52 = vmax.f32 %v5675_v47, 0.0 }
 0x111   : > { %7629 = vst [vmem:[#allocation16_spill] sm:$0xff] %v5580_v55  ;;  %v7545_v56 = vmax.f32 %v5580_v55, 0.0 }
 0x113   : > { %4650 = vmatmul.msk.f32.vlgmr.msra.gmra.mxu1 %vm770_vm0, %v7545_v56 }
 0x114   : > { %v588_v57 = vpop.f32.mrf.mxu0 }
 0x115   : > { %v676_v59 = vmul.f32 %v5570_v50, %v588_v57 }
 0x117   : > { %v5589_v60 = vadd.f32 %v5576_v53, %v676_v59  ;;  %635 = vmatmul.f32.gmra.mxu0 %v527_v58  ;;  %v5692_v58 = vadd.f32 %v5576_v53, %v671_v37  ;;  %v5835_v37 = vld [vmem:[%s7502_s6] ss:$0 sm:$0xff] }
 0x119   : > { %7630 = vst [vmem:[#allocation17_spill] sm:$0xff] %v5589_v60  ;;  %v7544_v61 = vmax.f32 %v5589_v60, 0.0  ;;  %v7549_v39 = vmax.f32 %v5692_v58, 0.0 }
 0x11a   : > { %7642 = vst [vmem:[#allocation29_spill] sm:$0xff] %v5692_v58  ;;  %v1994_v58 = vld [vmem:[#allocation6 + $0xc0] sm:$0xff] }
 0x11b   : > { %4651 = vmatmul.msk.f32.gmra.mxu1 %vm770_vm0, %v7544_v61 }
 0x11c   : > { %v591_v62 = vpop.f32.mrf.mxu0 }
 0x11d   : > { %v677_v0 = vmul.f32 %v5570_v50, %v591_v62 }
 0x11f   : > { %v5598_v1 = vadd.f32 %v5576_v53, %v677_v0  ;;  %638 = vmatmul.f32.gmra.mxu0 %v528_v63  ;;  %v672_v63 = vmul.f32 %v5570_v50, %v5558_v44 }
 0x121   : > { %7631 = vst [vmem:[#allocation18_spill] sm:$0xff] %v5598_v1  ;;  %v7543_v2 = vmax.f32 %v5598_v1, 0.0 }
 0x123   : > { %4652 = vmatmul.msk.f32.gmra.mxu1 %vm770_vm0, %v7543_v2 }
 0x124   : > { %v594_v3 = vpop.f32.mrf.mxu0 }
 0x125   : > { %v678_v5 = vmul.f32 %v5570_v50, %v594_v3 }
 0x127   : > { %v5607_v6 = vadd.f32 %v5576_v53, %v678_v5  ;;  %641 = vmatmul.f32.gmra.mxu0 %v529_v4  ;;  %v5270_v4 = vmov 0.0   ;;  %v5711_v5 = vadd.f32 %v5576_v53, %v672_v63 }
 0x128   : > { %782 = vst.msk [vmem:[#allocation2 + $0x50] sm:$0xff] %vm770_vm0, %v5270_v4 }
 0x129   : > { %7632 = vst [vmem:[#allocation19_spill] sm:$0xff] %v5607_v6  ;;  %v7542_v7 = vmax.f32 %v5607_v6, 0.0 }
 0x12a   : > { %7644 = vst [vmem:[#allocation31_spill] sm:$0xff] %v5711_v5 }
 0x12b   : > { %4653 = vmatmul.msk.f32.gmra.mxu1 %vm770_vm0, %v7542_v7  ;;  %783 = vst.msk [vmem:[#allocation2 + $0x58] sm:$0x3] %vm773_vm1, %v5270_v4 }
 0x12c   : > { %v597_v8 = vpop.f32.mrf.mxu0  ;;  %771 = vst.msk [vmem:[#allocation2] sm:$0xff] %vm770_vm0, %v5270_v4 }
 0x12d   : > { %v679_v10 = vmul.f32 %v5570_v50, %v597_v8  ;;  %772 = vst.msk [vmem:[#allocation2 + $0x8] sm:$0xff] %vm770_vm0, %v5270_v4 }
 0x12e   : > { %774 = vst.msk [vmem:[#allocation2 + $0x10] sm:$0x3] %vm773_vm1, %v5270_v4 }
 0x12f   : > { %v5616_v11 = vadd.f32 %v5576_v53, %v679_v10  ;;  %644 = vmatmul.f32.gmra.mxu0 %v530_v9  ;;  %v7548_v9 = vmax.f32 %v5711_v5, 0.0  ;;  %v673_v10 = vmul.f32 %v5570_v50, %v5561_v46  ;;  %775 = vst.msk [vmem:[#allocation2 + $0x18] sm:$0xff] %vm770_vm0, %v5270_v4 }
 0x130   : > { %776 = vst.msk [vmem:[#allocation2 + $0x20] sm:$0xff] %vm770_vm0, %v5270_v4 }
 0x131   : > { %7633 = vst [vmem:[#allocation20_spill] sm:$0xff] %v5616_v11  ;;  %v7541_v12 = vmax.f32 %v5616_v11, 0.0  ;;  %v5744_v46 = vadd.f32 %v5576_v53, %v673_v10 }
 0x132   : > { %777 = vst.msk [vmem:[#allocation2 + $0x28] sm:$0x3] %vm773_vm1, %v5270_v4 }
 0x133   : > { %4654 = vmatmul.msk.f32.gmra.mxu1 %vm770_vm0, %v7541_v12  ;;  %778 = vst.msk [vmem:[#allocation2 + $0x30] sm:$0xff] %vm770_vm0, %v5270_v4 }
 0x134   : > { %v600_v13 = vpop.f32.mrf.mxu0  ;;  %7646 = vst [vmem:[#allocation33_spill] sm:$0xff] %v5744_v46 }
 0x135   : > { %v680_v15 = vmul.f32 %v5570_v50, %v600_v13  ;;  %779 = vst.msk [vmem:[#allocation2 + $0x38] sm:$0xff] %vm770_vm0, %v5270_v4 }
 0x136   : > { %780 = vst.msk [vmem:[#allocation2 + $0x40] sm:$0x3] %vm773_vm1, %v5270_v4 }
 0x137   : > { %v5625_v16 = vadd.f32 %v5576_v53, %v680_v15  ;;  %647 = vmatmul.f32.gmra.mxu0 %v531_v14  ;;  %781 = vst.msk [vmem:[#allocation2 + $0x48] sm:$0xff] %vm770_vm0, %v5270_v4 }
 0x138   : > { %784 = vst.msk [vmem:[#allocation2 + $0x60] sm:$0xff] %vm770_vm0, %v5270_v4 }
 0x139   : > { %7634 = vst [vmem:[#allocation21_spill] sm:$0xff] %v5625_v16  ;;  %v7540_v17 = vmax.f32 %v5625_v16, 0.0 }
 0x13a   : > { %785 = vst.msk [vmem:[#allocation2 + $0x68] sm:$0xff] %vm770_vm0, %v5270_v4 }
 0x13b   : > { %4655 = vmatmul.msk.f32.gmra.mxu1 %vm770_vm0, %v7540_v17  ;;  %786 = vst.msk [vmem:[#allocation2 + $0x70] sm:$0x3] %vm773_vm1, %v5270_v4 }
 0x13c   : > { %v603_v18 = vpop.f32.mrf.mxu0  ;;  %787 = vst.msk [vmem:[#allocation2 + $0x78] sm:$0xff] %vm770_vm0, %v5270_v4 }
 0x13d   : > { %v681_v20 = vmul.f32 %v5570_v50, %v603_v18  ;;  %788 = vst.msk [vmem:[#allocation2 + $0x80] sm:$0xff] %vm770_vm0, %v5270_v4 }
 0x13e   : > { %789 = vst.msk [vmem:[#allocation2 + $0x88] sm:$0x3] %vm773_vm1, %v5270_v4 }
 0x13f   : > { %v5634_v21 = vadd.f32 %v5576_v53, %v681_v20  ;;  %650 = vmatmul.f32.gmra.mxu0 %v532_v19  ;;  %v7547_v19 = vmax.f32 %v5744_v46, 0.0  ;;  %v674_v20 = vmul.f32 %v5570_v50, %v5564_v48  ;;  %790 = vst.msk [vmem:[#allocation2 + $0x90] sm:$0xff] %vm770_vm0, %v5270_v4 }
 0x140   : > { %791 = vst.msk [vmem:[#allocation2 + $0x98] sm:$0xff] %vm770_vm0, %v5270_v4 }
 0x141   : > { %7635 = vst [vmem:[#allocation22_spill] sm:$0xff] %v5634_v21  ;;  %v7539_v22 = vmax.f32 %v5634_v21, 0.0  ;;  %v5777_v48 = vadd.f32 %v5576_v53, %v674_v20 }
 0x142   : > { %792 = vst.msk [vmem:[#allocation2 + $0xa0] sm:$0x3] %vm773_vm1, %v5270_v4 }
 0x143   : > { %4656 = vmatmul.msk.f32.gmra.mxu1 %vm770_vm0, %v7539_v22  ;;  %7648 = vst [vmem:[#allocation35_spill] sm:$0xff] %v5777_v48 }
 0x144   : > { %v606_v23 = vpop.f32.mrf.mxu0  ;;  %793 = vst.msk [vmem:[#allocation2 + $0xa8] sm:$0xff] %vm770_vm0, %v5270_v4 }
 0x145   : > { %v682_v25 = vmul.f32 %v5570_v50, %v606_v23  ;;  %794 = vst.msk [vmem:[#allocation2 + $0xb0] sm:$0xff] %vm770_vm0, %v5270_v4 }
 0x146   : > { %795 = vst.msk [vmem:[#allocation2 + $0xb8] sm:$0x3] %vm773_vm1, %v5270_v4 }
 0x147   : > { %v5643_v26 = vadd.f32 %v5576_v53, %v682_v25  ;;  %653 = vmatmul.f32.gmra.mxu0 %v533_v24  ;;  %796 = vst.msk [vmem:[#allocation2 + $0xc0] sm:$0xff] %vm770_vm0, %v5270_v4 }
 0x148   : > { %797 = vst.msk [vmem:[#allocation2 + $0xc8] sm:$0xff] %vm770_vm0, %v5270_v4 }
 0x149   : > { %7636 = vst [vmem:[#allocation23_spill] sm:$0xff] %v5643_v26  ;;  %v7538_v27 = vmax.f32 %v5643_v26, 0.0 }
 0x14a   : > { %798 = vst.msk [vmem:[#allocation2 + $0xd0] sm:$0x3] %vm773_vm1, %v5270_v4 }
 0x14b   : > { %4657 = vmatmul.msk.f32.gmra.mxu1 %vm770_vm0, %v7538_v27  ;;  %799 = vst.msk [vmem:[#allocation2 + $0xd8] sm:$0xff] %vm770_vm0, %v5270_v4 }
 0x14c   : > { %v609_v28 = vpop.f32.mrf.mxu0  ;;  %800 = vst.msk [vmem:[#allocation2 + $0xe0] sm:$0xff] %vm770_vm0, %v5270_v4 }
 0x14d   : > { %v683_v30 = vmul.f32 %v5570_v50, %v609_v28  ;;  %801 = vst.msk [vmem:[#allocation2 + $0xe8] sm:$0x3] %vm773_vm1, %v5270_v4 }
 0x14e   : > { %802 = vst.msk [vmem:[#allocation2 + $0xf0] sm:$0xff] %vm770_vm0, %v5270_v4 }
 0x14f   : > { %v5652_v31 = vadd.f32 %v5576_v53, %v683_v30  ;;  %656 = vmatmul.f32.gmra.mxu0 %v534_v29  ;;  %v7546_v29 = vmax.f32 %v5777_v48, 0.0  ;;  %803 = vst.msk [vmem:[#allocation2 + $0xf8] sm:$0xff] %vm770_vm0, %v5270_v4 }
 0x150   : > { %804 = vst.msk [vmem:[#allocation2 + $0x100] sm:$0x3] %vm773_vm1, %v5270_v4 }
 0x151   : > { %7637 = vst [vmem:[#allocation24_spill] sm:$0xff] %v5652_v31  ;;  %v7537_v32 = vmax.f32 %v5652_v31, 0.0  ;;  %v1995_v31 = vld [vmem:[#allocation6 + $0xc8] sm:$0xff] }
 0x152   : > { %805 = vst.msk [vmem:[#allocation2 + $0x108] sm:$0xff] %vm770_vm0, %v5270_v4 }
 0x153   : > { %4658 = vmatmul.msk.f32.gmra.mxu1 %vm770_vm0, %v7537_v32  ;;  %806 = vst.msk [vmem:[#allocation2 + $0x110] sm:$0xff] %vm770_vm0, %v5270_v4 }
 0x154   : > { %v612_v33 = vpop.f32.mrf.mxu0  ;;  %807 = vst.msk [vmem:[#allocation2 + $0x118] sm:$0x3] %vm773_vm1, %v5270_v4 }
 0x155   : > { %v684_v35 = vmul.f32 %v5570_v50, %v612_v33  ;;  %808 = vst.msk [vmem:[#allocation2 + $0x120] sm:$0xff] %vm770_vm0, %v5270_v4 }
 0x156   : > { %809 = vst.msk [vmem:[#allocation2 + $0x128] sm:$0xff] %vm770_vm0, %v5270_v4 }
 0x157   : > { %v5661_v36 = vadd.f32 %v5576_v53, %v684_v35  ;;  %659 = vmatmul.f32.gmra.mxu0 %v535_v34  ;;  %v1260_v34 = vld [vmem:[#allocation6 + $0x78] sm:$0xff]  ;;  %810 = vst.msk [vmem:[#allocation2 + $0x130] sm:$0x3] %vm773_vm1, %v5270_v4 }
 0x158   : > { %v1219_v35 = vld [vmem:[#allocation6 + $0x38] sm:$0xff]  ;;  %1365 = vmatpush.msrb.mxu2 %v1260_v34  ;;  %811 = vst.msk [vmem:[#allocation2 + $0x138] sm:$0xff] %vm770_vm0, %v5270_v4 }
 0x159   : > { %7638 = vst [vmem:[#allocation25_spill] sm:$0xff] %v5661_v36  ;;  %v7536_v38 = vmax.f32 %v5661_v36, 0.0  ;;  %1574 = vmatpush.msrb.mxu3 %v1219_v35 }
 0x15a   : > { %812 = vst.msk [vmem:[#allocation2 + $0x140] sm:$0xff] %vm770_vm0, %v5270_v4 }
 0x15b   : > { %4659 = vmatmul.msk.f32.vlgmr.msra.gmra.mxu2 %vm770_vm0, %v7536_v38  ;;  %813 = vst.msk [vmem:[#allocation2 + $0x148] sm:$0x3] %vm773_vm1, %v5270_v4 }
 0x15c   : > { %v615_v40 = vpop.f32.mrf.mxu0  ;;  %814 = vst.msk [vmem:[#allocation2 + $0x150] sm:$0xff] %vm770_vm0, %v5270_v4 }
 0x15d   : > { %v685_v43 = vmul.f32 %v5570_v50, %v615_v40  ;;  %815 = vst.msk [vmem:[#allocation2 + $0x158] sm:$0xff] %vm770_vm0, %v5270_v4 }
 0x15e   : > { %816 = vst.msk [vmem:[#allocation2 + $0x160] sm:$0x3] %vm773_vm1, %v5270_v4 }
 0x15f   : > { %v5672_v45 = vadd.f32 %v5576_v53, %v685_v43  ;;  %662 = vmatmul.f32.gmra.mxu0 %v536_v41  ;;  %v5823_v43 = vld [vmem:[%s7501_s5] ss:$0 sm:$0xff]  ;;  %817 = vst.msk [vmem:[#allocation2 + $0x168] sm:$0xff] %vm770_vm0, %v5270_v4 }
 0x160   : > { %818 = vst.msk [vmem:[#allocation2 + $0x170] sm:$0xff] %vm770_vm0, %v5270_v4 }
 0x161   : > { %7639 = vst [vmem:[#allocation26_spill] sm:$0xff] %v5672_v45  ;;  %v7535_v49 = vmax.f32 %v5672_v45, 0.0 }
 0x162   : > { %819 = vst.msk [vmem:[#allocation2 + $0x178] sm:$0x3] %vm773_vm1, %v5270_v4 }
 0x163   : > { %4660 = vmatmul.msk.f32.gmra.mxu2 %vm770_vm0, %v7535_v49  ;;  %820 = vst.msk [vmem:[#allocation2 + $0x180] sm:$0xff] %vm770_vm0, %v5270_v4 }
 0x164   : > { %v618_v51 = vpop.f32.mrf.mxu0  ;;  %821 = vst.msk [vmem:[#allocation2 + $0x188] sm:$0xff] %vm770_vm0, %v5270_v4 }
 0x165   : > { %v686_v54 = vmul.f32 %v5570_v50, %v618_v51  ;;  %822 = vst.msk [vmem:[#allocation2 + $0x190] sm:$0x3] %vm773_vm1, %v5270_v4 }
 0x166   : > { %823 = vst.msk [vmem:[#allocation2 + $0x198] sm:$0xff] %vm770_vm0, %v5270_v4 }
 0x167   : > { %v5686_v57 = vadd.f32 %v5576_v53, %v686_v54  ;;  %4645 = vmatmul.msk.f32.vlgmr.msrb.gmra.mxu0 %vm770_vm0, %v7550_v52  ;;  %v1259_v54 = vld [vmem:[#allocation6 + $0x70] sm:$0xff]  ;;  %824 = vst.msk [vmem:[#allocation2 + $0x1a0] sm:$0xff] %vm770_vm0, %v5270_v4 }
 0x168   : > { %1366 = vmatpush.msrb.mxu2 %v1259_v54  ;;  %825 = vst.msk [vmem:[#allocation2 + $0x1a8] sm:$0x3] %vm773_vm1, %v5270_v4 }
 0x169   : > { %7641 = vst [vmem:[#allocation28_spill] sm:$0xff] %v5686_v57  ;;  %v7534_v59 = vmax.f32 %v5686_v57, 0.0 }
 0x16b   : > { %4661 = vmatmul.msk.f32.gmra.mxu2 %vm770_vm0, %v7534_v59 }
 0x16c   : > { %v621_v62 = vpop.f32.mrf.mxu0 }
 0x16d   : > { %v687_v0 = vmul.f32 %v5570_v50, %v621_v62  ;;  %v1218_v62 = vld [vmem:[#allocation6 + $0x30] sm:$0xff] }
 0x16e   : > { %1575 = vmatpush.msrb.mxu3 %v1218_v62 }
 0x16f   : > { %v5703_v3 = vadd.f32 %v5576_v53, %v687_v0  ;;  %4646 = vmatmul.msk.f32.gmra.mxu0 %vm770_vm0, %v7549_v39 }
 0x171   : > { %7643 = vst [vmem:[#allocation30_spill] sm:$0xff] %v5703_v3  ;;  %v7532_v8 = vmax.f32 %v5703_v3, 0.0 }
 0x173   : > { %4662 = vmatmul.msk.f32.gmra.mxu2 %vm770_vm0, %v7532_v8 }
 0x174   : > { %v624_v44 = vpop.f32.mrf.mxu0 }
 0x175   : > { %v688_v13 = vmul.f32 %v5570_v50, %v624_v44 }
 0x177   : > { %v5734_v14 = vadd.f32 %v5576_v53, %v688_v13  ;;  %4647 = vmatmul.msk.f32.gmra.mxu0 %vm770_vm0, %v7548_v9 }
 0x179   : > { %7645 = vst [vmem:[#allocation32_spill] sm:$0xff] %v5734_v14  ;;  %v7529_v15 = vmax.f32 %v5734_v14, 0.0 }
 0x17b   : > { %4663 = vmatmul.msk.f32.gmra.mxu2 %vm770_vm0, %v7529_v15 }
 0x17c   : > { %v627_v18 = vpop.f32.mrf.mxu0 }
 0x17d   : > { %v689_v23 = vmul.f32 %v5570_v50, %v627_v18 }
 0x17f   : > { %v5767_v24 = vadd.f32 %v5576_v53, %v689_v23  ;;  %4648 = vmatmul.msk.f32.gmra.mxu0 %vm770_vm0, %v7547_v19 }
 0x181   : > { %7647 = vst [vmem:[#allocation34_spill] sm:$0xff] %v5767_v24  ;;  %v7527_v25 = vmax.f32 %v5767_v24, 0.0 }
 0x183   : > { %4664 = vmatmul.msk.f32.gmra.mxu2 %vm770_vm0, %v7527_v25  ;;  %v2001_v25 = vld [vmem:[#allocation6 + $0xf8] sm:$0xff] }
 0x184   : > { %v630_v28 = vpop.f32.mrf.mxu0 }
 0x185   : > { %v690_v30 = vmul.f32 %v5570_v50, %v630_v28  ;;  %v1258_v28 = vld [vmem:[#allocation6 + $0x68] sm:$0xff] }
 0x186   : > { %1367 = vmatpush.msrb.mxu2 %v1258_v28 }
 0x187   : > { %v5798_v33 = vadd.f32 %v5576_v53, %v690_v30  ;;  %4649 = vmatmul.msk.f32.gmra.mxu0 %vm770_vm0, %v7546_v29  ;;  %v1217_v30 = vld [vmem:[#allocation6 + $0x28] sm:$0xff] }
 0x188   : > { %1576 = vmatpush.msrb.mxu3 %v1217_v30 }
 0x189   : > { %7649 = vst [vmem:[#allocation36_spill] sm:$0xff] %v5798_v33  ;;  %v7526_v40 = vmax.f32 %v5798_v33, 0.0 }
 0x18b   : > { %4665 = vmatmul.msk.f32.gmra.mxu2 %vm770_vm0, %v7526_v40  ;;  %v1713_v40 = vld [vmem:[#allocation6 + $0x88] sm:$0xff] }
 0x18c   : > { %v633_v41 = vpop.f32.mrf.mxu0 }
 0x18d   : > { %v691_v42 = vmul.f32 %v5570_v50, %v633_v41 }
 0x18f   : > { %v5830_v51 = vadd.f32 %v5576_v53, %v691_v42 }
 0x190   : > { %v962_v63 = vpop.f32.mrf.mxu1 }
 0x191   : > { %7650 = vst [vmem:[#allocation37_spill] sm:$0xff] %v5830_v51  ;;  %v1052_v0 = vmul.f32 %v5823_v43, %v962_v63  ;;  %v7522_v44 = vmax.f32 %v5830_v51, 0.0 }
 0x193   : > { %v1088_v10 = vadd.f32 %v5835_v37, %v1052_v0  ;;  %4666 = vmatmul.msk.f32.gmra.mxu2 %vm770_vm0, %v7522_v44  ;;  %v1257_v0 = vld [vmem:[#allocation6 + $0x60] sm:$0xff] }
 0x194   : > { %v636_v13 = vpop.f32.mrf.mxu0  ;;  %1368 = vmatpush.msrb.mxu2 %v1257_v0  ;;  %v1256_v0 = vld [vmem:[#allocation6 + $0x58] sm:$0xff] }
 0x195   : > { %v1120_v18 = vmax.f32 %v1088_v10, 0.0  ;;  %v692_v20 = vmul.f32 %v5570_v50, %v636_v13  ;;  %v1216_v10 = vld [vmem:[#allocation6 + $0x20] sm:$0xff]  ;;  %v1719_v13 = vld [vmem:[#allocation6 + $0xb8] sm:$0xff] }
 0x196   : > { %1577 = vmatpush.msrb.mxu3 %v1216_v10  ;;  %1824 = vmatpush.msrb.mxu1 %v1719_v13  ;;  %v1215_v10 = vld [vmem:[#allocation6 + $0x18] sm:$0xff] }
 0x197   : > { %1153 = vst.msk [vmem:[#allocation2 + $0x51] sm:$0xff] %vm770_vm0, %v1120_v18  ;;  %v5862_v23 = vadd.f32 %v5576_v53, %v692_v20  ;;  %1369 = vmatpush.msrb.mxu2 %v1256_v0  ;;  %v1255_v0 = vld [vmem:[#allocation6 + $0x50] sm:$0xff] }
 0x198   : > { %v965_v34 = vpop.f32.mrf.mxu1  ;;  %1578 = vmatpush.msrb.mxu3 %v1215_v10 }
 0x199   : > { %7651 = vst [vmem:[#allocation38_spill] sm:$0xff] %v5862_v23  ;;  %v7521_v35 = vmax.f32 %v5862_v23, 0.0  ;;  %v1053_v41 = vmul.f32 %v5823_v43, %v965_v34  ;;  %1370 = vmatpush.msrb.mxu2 %v1255_v0  ;;  %v1717_v0 = vld [vmem:[#allocation6 + $0xa8] sm:$0xff] }
 0x19b   : > { %4667 = vmatmul.msk.f32.gmra.mxu2 %vm770_vm0, %v7521_v35  ;;  %v1089_v62 = vadd.f32 %v5835_v37, %v1053_v41  ;;  %v1716_v35 = vld [vmem:[#allocation6 + $0xa0] sm:$0xff] }
 0x19c   : > { %v639_v42 = vpop.f32.mrf.mxu0 }
 0x19d   : > { %v693_v54 = vmul.f32 %v5570_v50, %v639_v42  ;;  %v1121_v30 = vmax.f32 %v1089_v62, 0.0 }
 0x19e   : > { %v1686_v17 = vld [vmem:[#allocation2 + $0x52] sm:$0xff] }
 0x19f   : > { %v5888_v63 = vadd.f32 %v5576_v53, %v693_v54  ;;  %1154 = vst.msk [vmem:[#allocation2 + $0x61] sm:$0xff] %vm770_vm0, %v1121_v30 }
 0x1a0   : > { %v968_v18 = vpop.f32.mrf.mxu1 }
 0x1a1   : > { %7652 = vst [vmem:[#allocation39_spill] sm:$0xff] %v5888_v63  ;;  %v1054_v20 = vmul.f32 %v5823_v43, %v968_v18  ;;  %v7520_v28 = vmax.f32 %v5888_v63, 0.0 }
 0x1a3   : > { %v1090_v34 = vadd.f32 %v5835_v37, %v1054_v20  ;;  %4668 = vmatmul.msk.f32.vlgmr.msra.gmra.mxu3 %vm770_vm0, %v7520_v28 }
 0x1a4   : > { %v642_v41 = vpop.f32.mrf.mxu0 }
 0x1a5   : > { %v1122_v42 = vmax.f32 %v1090_v34, 0.0  ;;  %v694_v54 = vmul.f32 %v5570_v50, %v642_v41 }
 0x1a7   : > { %v5913_v62 = vadd.f32 %v5576_v53, %v694_v54  ;;  %1155 = vst.msk [vmem:[#allocation2 + $0x69] sm:$0xff] %vm770_vm0, %v1122_v42  ;;  %v1718_v54 = vld [vmem:[#allocation6 + $0xb0] sm:$0xff] }
 0x1a8   : > { %v971_v13 = vpop.f32.mrf.mxu1  ;;  %1825 = vmatpush.msrb.mxu1 %v1718_v54  ;;  %v1214_v54 = vld [vmem:[#allocation6 + $0x10] sm:$0xff] }
 0x1a9   : > { %7653 = vst [vmem:[#allocation40_spill] sm:$0xff] %v5913_v62  ;;  %v1055_v18 = vmul.f32 %v5823_v43, %v971_v13  ;;  %v7519_v20 = vmax.f32 %v5913_v62, 0.0  ;;  %1579 = vmatpush.msrb.mxu3 %v1214_v54  ;;  %v1996_v62 = vld [vmem:[#allocation6 + $0xd0] sm:$0xff] }
 0x1aa   : > { %1826 = vmatpush.msrb.mxu1 %v1717_v0 }
 0x1ab   : > { %v1091_v34 = vadd.f32 %v5835_v37, %v1055_v18  ;;  %4669 = vmatmul.msk.f32.gmra.mxu3 %vm770_vm0, %v7519_v20 }
 0x1ac   : > { %v645_v4 = vpop.f32.mrf.mxu0  ;;  %1827 = vmatpush.msrb.mxu1 %v1716_v35 }
 0x1ad   : > { %v1123_v30 = vmax.f32 %v1091_v34, 0.0  ;;  %v695_v41 = vmul.f32 %v5570_v50, %v645_v4 }
 0x1ae   : > { %v1687_v7 = vld [vmem:[#allocation2 + $0x62] sm:$0xff] }
 0x1af   : > { %1156 = vst.msk [vmem:[#allocation2 + $0x79] sm:$0xff] %vm770_vm0, %v1123_v30  ;;  %v5925_v42 = vadd.f32 %v5576_v53, %v695_v41  ;;  %v6123_v56 = vld [vmem:[#allocation2 + $0x68] sm:$0xff] }
 0x1b0   : > { %v974_v10 = vpop.f32.mrf.mxu1 }
 0x1b1   : > { %7654 = vst [vmem:[#allocation41_spill] sm:$0xff] %v5925_v42  ;;  %v1056_v13 = vmul.f32 %v5823_v43, %v974_v10  ;;  %v7523_v18 = vmax.f32 %v5925_v42, 0.0  ;;  %v1254_v10 = vld [vmem:[#allocation6 + $0x48] sm:$0xff]  ;;  %v2844_v42 = vld [vmem:[#allocation6 + $0x198] sm:$0xff] }
 0x1b2   : > { %1371 = vmatpush.msrb.mxu2 %v1254_v10 }
 0x1b3   : > { %v1092_v20 = vadd.f32 %v5835_v37, %v1056_v13  ;;  %4670 = vmatmul.msk.f32.gmra.mxu3 %vm770_vm0, %v7523_v18  ;;  %v1213_v13 = vld [vmem:[#allocation6 + $0x8] sm:$0xff] }
 0x1b4   : > { %v648_v34 = vpop.f32.mrf.mxu0  ;;  %1580 = vmatpush.msrb.mxu3 %v1213_v13 }
 0x1b5   : > { %v1124_v4 = vmax.f32 %v1092_v20, 0.0  ;;  %v696_v30 = vmul.f32 %v5570_v50, %v648_v34 }
 0x1b6   : > { %v6121_v61 = vld [vmem:[#allocation2 + $0x79] sm:$0xff] }
 0x1b7   : > { %1157 = vst.msk [vmem:[#allocation2 + $0x81] sm:$0xff] %vm770_vm0, %v1124_v4  ;;  %v5936_v41 = vadd.f32 %v5576_v53, %v696_v30 }
 0x1b8   : > { %v977_v28 = vpop.f32.mrf.mxu1 }
 0x1b9   : > { %7655 = vst [vmem:[#allocation42_spill] sm:$0xff] %v5936_v41  ;;  %v1057_v44 = vmul.f32 %v5823_v43, %v977_v28  ;;  %v7524_v18 = vmax.f32 %v5936_v41, 0.0 }
 0x1bb   : > { %v1093_v20 = vadd.f32 %v5835_v37, %v1057_v44  ;;  %4671 = vmatmul.msk.f32.gmra.mxu3 %vm770_vm0, %v7524_v18  ;;  %v1220_v18 = vld [vmem:[#allocation2 + $0x1] sm:$0xff] }
 0x1bc   : > { %v651_v34 = vpop.f32.mrf.mxu0 }
 0x1bd   : > { %v1125_v4 = vmax.f32 %v1093_v20, 0.0  ;;  %v697_v30 = vmul.f32 %v5570_v50, %v651_v34  ;;  %v1253_v34 = vld [vmem:[#allocation6 + $0x40] sm:$0xff] }
 0x1be   : > { %1372 = vmatpush.msrb.mxu2 %v1253_v34  ;;  %v1690_v9 = vld [vmem:[#allocation2 + $0x82] sm:$0xff] }
 0x1bf   : > { %1158 = vst.msk [vmem:[#allocation2 + $0x91] sm:$0xff] %vm770_vm0, %v1125_v4  ;;  %v5947_v54 = vadd.f32 %v5576_v53, %v697_v30  ;;  %v1212_v4 = vld [vmem:[#allocation6] sm:$0xff]  ;;  %v1715_v30 = vld [vmem:[#allocation6 + $0x98] sm:$0xff]  ;;  %4677 = vmatmul.msk.f32.vlgmr.msrb.gmra.mxu2 %vm770_vm0, %v1220_v18 }
 0x1c0   : > { %v980_v28 = vpop.f32.mrf.mxu1  ;;  %1581 = vmatpush.msrb.mxu3 %v1212_v4  ;;  %1828 = vmatpush.msrb.mxu1 %v1715_v30  ;;  %v1221_v18 = vld [vmem:[#allocation2 + $0x9] sm:$0xff] }
 0x1c1   : > { %7656 = vst [vmem:[#allocation43_spill] sm:$0xff] %v5947_v54  ;;  %v1058_v0 = vmul.f32 %v5823_v43, %v980_v28  ;;  %v7525_v35 = vmax.f32 %v5947_v54, 0.0  ;;  %2106 = vmatpush.msra.mxu2 %v2001_v25 }
 0x1c3   : > { %v1094_v44 = vadd.f32 %v5835_v37, %v1058_v0  ;;  %4672 = vmatmul.msk.f32.gmra.mxu3 %vm770_vm0, %v7525_v35 }
 0x1c4   : > { %v654_v10 = vpop.f32.mrf.mxu0 }
 0x1c5   : > { %v1126_v13 = vmax.f32 %v1094_v44, 0.0  ;;  %v698_v20 = vmul.f32 %v5570_v50, %v654_v10 }
 0x1c7   : > { %1159 = vst.msk [vmem:[#allocation2 + $0x99] sm:$0xff] %vm770_vm0, %v1126_v13  ;;  %v5958_v28 = vadd.f32 %v5576_v53, %v698_v20  ;;  %v1714_v20 = vld [vmem:[#allocation6 + $0x90] sm:$0xff]  ;;  %4678 = vmatmul.msk.f32.gmra.mxu2 %vm770_vm0, %v1221_v18 }
 0x1c8   : > { %v983_v0 = vpop.f32.mrf.mxu1  ;;  %1829 = vmatpush.msrb.mxu1 %v1714_v20  ;;  %v2564_v18 = vld [vmem:[#allocation6 + $0x170] sm:$0xff] }
 0x1c9   : > { %7657 = vst [vmem:[#allocation44_spill] sm:$0xff] %v5958_v28  ;;  %v1059_v35 = vmul.f32 %v5823_v43, %v983_v0  ;;  %v7528_v44 = vmax.f32 %v5958_v28, 0.0  ;;  %v2283_v0 = vld [vmem:[#allocation6 + $0x138] sm:$0xff] }
 0x1ca   : > { %1830 = vmatpush.msrb.mxu1 %v1713_v40  ;;  %2388 = vmatpush.msra.mxu3 %v2283_v0  ;;  %v2563_v0 = vld [vmem:[#allocation6 + $0x168] sm:$0xff] }
 0x1cb   : > { %v1095_v10 = vadd.f32 %v5835_v37, %v1059_v35  ;;  %4673 = vmatmul.msk.f32.gmra.mxu3 %vm770_vm0, %v7528_v44  ;;  %v1712_v35 = vld [vmem:[#allocation6 + $0x80] sm:$0xff] }
 0x1cc   : > { %v657_v34 = vpop.f32.mrf.mxu0  ;;  %1831 = vmatpush.msrb.mxu1 %v1712_v35  ;;  %v2562_v35 = vld [vmem:[#allocation6 + $0x160] sm:$0xff] }
 0x1cd   : > { %v1127_v4 = vmax.f32 %v1095_v10, 0.0  ;;  %v699_v13 = vmul.f32 %v5570_v50, %v657_v34  ;;  %v1679_v10 = vld [vmem:[#allocation2 + $0x2] sm:$0xff] }
 0x1ce   : > { %4741 = vmatmul.msk.f32.vlgmr.msrb.gmra.mxu1 %vm770_vm0, %v1679_v10  ;;  %v2561_v10 = vld [vmem:[#allocation6 + $0x158] sm:$0xff]  ;;  %v1691_v52 = vld [vmem:[#allocation2 + $0x92] sm:$0xff] }
 0x1cf   : > { %1160 = vst.msk [vmem:[#allocation2 + $0xa9] sm:$0xff] %vm770_vm0, %v1127_v4  ;;  %v5970_v30 = vadd.f32 %v5576_v53, %v699_v13  ;;  %v2565_v4 = vld [vmem:[#allocation6 + $0x178] sm:$0xff] }
 0x1d0   : > { %v986_v44 = vpop.f32.mrf.mxu1  ;;  %2670 = vmatpush.msra.mxu0 %v2565_v4 }
 0x1d1   : > { %7658 = vst [vmem:[#allocation45_spill] sm:$0xff] %v5970_v30  ;;  %v1060_v34 = vmul.f32 %v5823_v43, %v986_v44  ;;  %v7530_v15 = vmax.f32 %v5970_v30, 0.0  ;;  %v6175_v30 = vld [vmem:[#allocation2 + $0x98] sm:$0xff] }
 0x1d2   : > { %2671 = vmatpush.msra.mxu0 %v2564_v18 }
 0x1d3   : > { %v1096_v25 = vadd.f32 %v5835_v37, %v1060_v34  ;;  %4674 = vmatmul.msk.f32.gmra.mxu3 %vm770_vm0, %v7530_v15  ;;  %v1680_v34 = vld [vmem:[#allocation2 + $0xa] sm:$0xff] }
 0x1d4   : > { %v660_v13 = vpop.f32.mrf.mxu0  ;;  %2672 = vmatpush.msra.mxu0 %v2563_v0 }
 0x1d5   : > { %v1128_v20 = vmax.f32 %v1096_v25, 0.0  ;;  %v700_v40 = vmul.f32 %v5570_v50, %v660_v13  ;;  %v2560_v13 = vld [vmem:[#allocation6 + $0x150] sm:$0xff] }
 0x1d6   : > { %2673 = vmatpush.msra.mxu0 %v2562_v35  ;;  %4742 = vmatmul.msk.f32.gmra.mxu1 %vm770_vm0, %v1680_v34  ;;  %v2558_v35 = vld [vmem:[#allocation6 + $0x140] sm:$0xff] }
 0x1d7   : > { %1161 = vst.msk [vmem:[#allocation2 + $0xb1] sm:$0xff] %vm770_vm0, %v1128_v20  ;;  %v5983_v44 = vadd.f32 %v5576_v53, %v700_v40  ;;  %v2559_v20 = vld [vmem:[#allocation6 + $0x148] sm:$0xff] }
 0x1d8   : > { %2674 = vmatpush.msra.mxu0 %v2561_v10 }
 0x1d9   : > { %7659 = vst [vmem:[#allocation46_spill] sm:$0xff] %v5983_v44  ;;  %v7531_v15 = vmax.f32 %v5983_v44, 0.0  ;;  %v6173_v44 = vld [vmem:[#allocation2 + $0xa9] sm:$0xff] }
 0x1da   : > { %2675 = vmatpush.msra.mxu0 %v2560_v13  ;;  %v1180_v13 = vld [vmem:[#allocation2] sm:$0xff] }
 0x1db   : > { %4675 = vmatmul.msk.f32.gmra.mxu3 %vm770_vm0, %v7531_v15 }
 0x1dc   : > { %v663_v25 = vpop.f32.mrf.mxu0  ;;  %2676 = vmatpush.msra.mxu0 %v2559_v20 }
 0x1dd   : > { %v701_v4 = vmul.f32 %v5570_v50, %v663_v25 }
 0x1de   : > { %v989_v40 = vpop.f32.mrf.mxu2  ;;  %2677 = vmatpush.msra.mxu0 %v2558_v35  ;;  %v2848_v35 = vld [vmem:[#allocation6 + $0x1b8] sm:$0xff] }
 0x1df   : > { %v5992_v18 = vadd.f32 %v5576_v53, %v701_v4  ;;  %v1061_v0 = vmul.f32 %v5823_v43, %v989_v40  ;;  %2953 = vmatpush.msra.mxu1 %v2848_v35 }
 0x1e1   : > { %7660 = vst [vmem:[#allocation47_spill] sm:$0xff] %v5992_v18  ;;  %v1097_v15 = vadd.f32 %v5835_v37, %v1061_v0  ;;  %v7533_v34 = vmax.f32 %v5992_v18, 0.0 }
 0x1e3   : > { %v1129_v8 = vmax.f32 %v1097_v15, 0.0  ;;  %4676 = vmatmul.msk.f32.gmra.mxu3 %vm770_vm0, %v7533_v34  ;;  %v2282_v34 = vld [vmem:[#allocation6 + $0x130] sm:$0xff] }
 0x1e4   : > { %v947_v50 = vpop.f32.mrf.mxu0  ;;  %2389 = vmatpush.msra.mxu3 %v2282_v34 }
 0x1e5   : > { %1162 = vst.msk [vmem:[#allocation2 + $0xc1] sm:$0xff] %vm770_vm0, %v1129_v8  ;;  %v1047_v53 = vmul.f32 %v5823_v43, %v947_v50  ;;  %v2000_v50 = vld [vmem:[#allocation6 + $0xf0] sm:$0xff] }
 0x1e6   : > { %v992_v10 = vpop.f32.mrf.mxu2  ;;  %2107 = vmatpush.msra.mxu2 %v2000_v50 }
 0x1e7   : > { %v1083_v25 = vadd.f32 %v5835_v37, %v1047_v53  ;;  %v1062_v4 = vmul.f32 %v5823_v43, %v992_v10 }
 0x1e9   : > { %v1115_v20 = vmax.f32 %v1083_v25, 0.0  ;;  %v1098_v40 = vadd.f32 %v5835_v37, %v1062_v4  ;;  %v1181_v4 = vld [vmem:[#allocation2 + $0x8] sm:$0xff] }
 0x1eb   : > { %1148 = vst.msk [vmem:[#allocation2 + $0x19] sm:$0xff] %vm770_vm0, %v1115_v20  ;;  %v1130_v15 = vmax.f32 %v1098_v40, 0.0  ;;  %4709 = vmatmul.msk.f32.vlgmr.msrb.gmra.mxu3 %vm770_vm0, %v1180_v13 }
 0x1ec   : > { %v950_v0 = vpop.f32.mrf.mxu0  ;;  %v6218_v23 = vld [vmem:[#allocation2 + $0xc0] sm:$0xff] }
 0x1ed   : > { %1163 = vst.msk [vmem:[#allocation2 + $0xc9] sm:$0xff] %vm770_vm0, %v1130_v15  ;;  %v1048_v8 = vmul.f32 %v5823_v43, %v950_v0 }
 0x1ee   : > { %v995_v53 = vpop.f32.mrf.mxu2 }
 0x1ef   : > { %v1084_v10 = vadd.f32 %v5835_v37, %v1048_v8  ;;  %v1063_v25 = vmul.f32 %v5823_v43, %v995_v53 }
 0x1f1   : > { %v1116_v20 = vmax.f32 %v1084_v10, 0.0  ;;  %v1099_v13 = vadd.f32 %v5835_v37, %v1063_v25 }
 0x1f2   : > { %v6012_v40 = vld [vmem:[#allocation2 + $0x19] sm:$0xff] }
 0x1f3   : > { %1149 = vst.msk [vmem:[#allocation2 + $0x21] sm:$0xff] %vm770_vm0, %v1116_v20  ;;  %v1131_v15 = vmax.f32 %v1099_v13, 0.0  ;;  %4679 = vmatmul.msk.f32.gmra.mxu2 %vm770_vm0, %v6012_v40  ;;  %4710 = vmatmul.msk.f32.gmra.mxu3 %vm770_vm0, %v1181_v4  ;;  %v6025_v20 = vld [vmem:[#allocation2 + $0x18] sm:$0xff] }
 0x1f4   : > { %v953_v0 = vpop.f32.mrf.mxu0  ;;  %v6216_v63 = vld [vmem:[#allocation2 + $0xc9] sm:$0xff] }
 0x1f5   : > { %1164 = vst.msk [vmem:[#allocation2 + $0xd9] sm:$0xff] %vm770_vm0, %v1131_v15  ;;  %v1049_v8 = vmul.f32 %v5823_v43, %v953_v0 }
 0x1f6   : > { %v998_v34 = vpop.f32.mrf.mxu2 }
 0x1f7   : > { %v1085_v35 = vadd.f32 %v5835_v37, %v1049_v8  ;;  %v1064_v50 = vmul.f32 %v5823_v43, %v998_v34 }
 0x1f9   : > { %v1117_v53 = vmax.f32 %v1085_v35, 0.0  ;;  %v1100_v10 = vadd.f32 %v5835_v37, %v1064_v50 }
 0x1fa   : > { %v6023_v25 = vld [vmem:[#allocation2 + $0x21] sm:$0xff] }
 0x1fb   : > { %v1681_v13 = vld [vmem:[#allocation2 + $0x1a] sm:$0xff]  ;;  %1150 = vst.msk [vmem:[#allocation2 + $0x31] sm:$0xff] %vm770_vm0, %v1117_v53  ;;  %v1132_v4 = vmax.f32 %v1100_v10, 0.0  ;;  %4680 = vmatmul.msk.f32.gmra.mxu2 %vm770_vm0, %v6023_v25  ;;  %4711 = vmatmul.msk.f32.gmra.mxu3 %vm770_vm0, %v6025_v20 }
 0x1fc   : > { %4743 = vmatmul.msk.f32.gmra.mxu1 %vm770_vm0, %v1681_v13  ;;  %4837 = vmatmul.msk.f32.vlgmr.msra.gmra.mxu0 %vm770_vm0, %v1681_v13  ;;  %v956_v15 = vpop.f32.mrf.mxu0  ;;  %v6041_v59 = vld [vmem:[#allocation2 + $0x20] sm:$0xff]  ;;  %v6243_v14 = vld [vmem:[#allocation2 + $0xd8] sm:$0xff] }
 0x1fd   : > { %1165 = vst.msk [vmem:[#allocation2 + $0xe1] sm:$0xff] %vm770_vm0, %v1132_v4  ;;  %v1050_v0 = vmul.f32 %v5823_v43, %v956_v15  ;;  %v1682_v4 = vld [vmem:[#allocation2 + $0x22] sm:$0xff] }
 0x1fe   : > { %v1001_v8 = vpop.f32.mrf.mxu2 }
 0x1ff   : > { %v1086_v34 = vadd.f32 %v5835_v37, %v1050_v0  ;;  %v1065_v35 = vmul.f32 %v5823_v43, %v1001_v8 }
 0x201   : > { %v1118_v50 = vmax.f32 %v1086_v34, 0.0  ;;  %v1101_v53 = vadd.f32 %v5835_v37, %v1065_v35 }
 0x202   : > { %v6039_v10 = vld [vmem:[#allocation2 + $0x31] sm:$0xff] }
 0x203   : > { %1151 = vst.msk [vmem:[#allocation2 + $0x39] sm:$0xff] %vm770_vm0, %v1118_v50  ;;  %v1133_v13 = vmax.f32 %v1101_v53, 0.0  ;;  %4681 = vmatmul.msk.f32.gmra.mxu2 %vm770_vm0, %v6039_v10  ;;  %4712 = vmatmul.msk.f32.gmra.mxu3 %vm770_vm0, %v6041_v59  ;;  %v6057_v38 = vld [vmem:[#allocation2 + $0x30] sm:$0xff] }
 0x204   : > { %4744 = vmatmul.msk.f32.gmra.mxu1 %vm770_vm0, %v1682_v4  ;;  %4838 = vmatmul.msk.f32.gmra.mxu0 %vm770_vm0, %v1682_v4  ;;  %v959_v15 = vpop.f32.mrf.mxu0  ;;  %v6241_v24 = vld [vmem:[#allocation2 + $0xe1] sm:$0xff] }
 0x205   : > { %1166 = vst.msk [vmem:[#allocation2 + $0xf1] sm:$0xff] %vm770_vm0, %v1133_v13  ;;  %v1051_v0 = vmul.f32 %v5823_v43, %v959_v15  ;;  %v2847_v13 = vld [vmem:[#allocation6 + $0x1b0] sm:$0xff]  ;;  %v1999_v15 = vld [vmem:[#allocation6 + $0xe8] sm:$0xff] }
 0x206   : > { %v1004_v8 = vpop.f32.mrf.mxu2  ;;  %2954 = vmatpush.msra.mxu1 %v2847_v13  ;;  %2108 = vmatpush.msra.mxu2 %v1999_v15  ;;  %v1697_v3 = vld [vmem:[#allocation2 + $0xda] sm:$0xff]  ;;  %v1698_v36 = vld [vmem:[#allocation2 + $0xe2] sm:$0xff] }
 0x207   : > { %v1087_v34 = vadd.f32 %v5835_v37, %v1051_v0  ;;  %v1066_v35 = vmul.f32 %v5823_v43, %v1004_v8  ;;  %v2281_v0 = vld [vmem:[#allocation6 + $0x128] sm:$0xff]  ;;  %v6255_v45 = vld [vmem:[#allocation2 + $0xe0] sm:$0xff] }
 0x208   : > { %2390 = vmatpush.msra.mxu3 %v2281_v0  ;;  %v6082_v0 = vld [vmem:[#allocation2 + $0x51] sm:$0xff] }
 0x209   : > { %v1119_v50 = vmax.f32 %v1087_v34, 0.0  ;;  %v1102_v53 = vadd.f32 %v5835_v37, %v1066_v35 }
 0x20a   : > { %v6055_v49 = vld [vmem:[#allocation2 + $0x39] sm:$0xff] }
 0x20b   : > { %v1683_v32 = vld [vmem:[#allocation2 + $0x32] sm:$0xff]  ;;  %1152 = vst.msk [vmem:[#allocation2 + $0x49] sm:$0xff] %vm770_vm0, %v1119_v50  ;;  %v1134_v4 = vmax.f32 %v1102_v53, 0.0  ;;  %4682 = vmatmul.msk.f32.gmra.mxu2 %vm770_vm0, %v6055_v49  ;;  %4713 = vmatmul.msk.f32.gmra.mxu3 %vm770_vm0, %v6057_v38 }
 0x20c   : > { %4745 = vmatmul.msk.f32.gmra.mxu1 %vm770_vm0, %v1683_v32  ;;  %4839 = vmatmul.msk.f32.gmra.mxu0 %vm770_vm0, %v1683_v32  ;;  %v6071_v53 = vld [vmem:[#allocation2 + $0x38] sm:$0xff]  ;;  %v6267_v16 = vld [vmem:[#allocation2 + $0xf0] sm:$0xff] }
 0x20d   : > { %1167 = vst.msk [vmem:[#allocation2 + $0xf9] sm:$0xff] %vm770_vm0, %v1134_v4  ;;  %v1684_v32 = vld [vmem:[#allocation2 + $0x3a] sm:$0xff]  ;;  %v6253_v57 = vld [vmem:[#allocation2 + $0xf1] sm:$0xff] }
 0x20e   : > { %v1007_v8 = vpop.f32.mrf.mxu2 }
 0x20f   : > { %v1067_v34 = vmul.f32 %v5823_v43, %v1007_v8 }
 0x211   : > { %v1103_v35 = vadd.f32 %v5835_v37, %v1067_v34 }
 0x212   : > { %v6069_v50 = vld [vmem:[#allocation2 + $0x49] sm:$0xff] }
 0x213   : > { %v1135_v27 = vmax.f32 %v1103_v35, 0.0  ;;  %4683 = vmatmul.msk.f32.gmra.mxu2 %vm770_vm0, %v6069_v50  ;;  %4714 = vmatmul.msk.f32.gmra.mxu3 %vm770_vm0, %v6071_v53  ;;  %v6084_v8 = vld [vmem:[#allocation2 + $0x48] sm:$0xff] }
 0x214   : > { %4746 = vmatmul.msk.f32.gmra.mxu1 %vm770_vm0, %v1684_v32  ;;  %4840 = vmatmul.msk.f32.gmra.mxu0 %vm770_vm0, %v1684_v32  ;;  %v1685_v35 = vld [vmem:[#allocation2 + $0x4a] sm:$0xff]  ;;  %v6265_v21 = vld [vmem:[#allocation2 + $0xf9] sm:$0xff] }
 0x215   : > { %1168 = vst.msk [vmem:[#allocation2 + $0x109] sm:$0xff] %vm770_vm0, %v1135_v27  ;;  %v6279_v6 = vld [vmem:[#allocation2 + $0xf8] sm:$0xff] }
 0x216   : > { %v1010_v4 = vpop.f32.mrf.mxu2  ;;  %v1700_v1 = vld [vmem:[#allocation2 + $0xfa] sm:$0xff] }
 0x217   : > { %v1068_v13 = vmul.f32 %v5823_v43, %v1010_v4 }
 0x219   : > { %v1104_v15 = vadd.f32 %v5835_v37, %v1068_v13  ;;  %v6095_v13 = vld [vmem:[#allocation2 + $0x61] sm:$0xff] }
 0x21b   : > { %v1136_v34 = vmax.f32 %v1104_v15, 0.0  ;;  %4684 = vmatmul.msk.f32.gmra.mxu2 %vm770_vm0, %v6082_v0  ;;  %4715 = vmatmul.msk.f32.gmra.mxu3 %vm770_vm0, %v6084_v8  ;;  %v6097_v15 = vld [vmem:[#allocation2 + $0x50] sm:$0xff] }
 0x21c   : > { %4747 = vmatmul.msk.f32.gmra.mxu1 %vm770_vm0, %v1685_v35  ;;  %4841 = vmatmul.msk.f32.gmra.mxu0 %vm770_vm0, %v1685_v35  ;;  %v6291_v60 = vld [vmem:[#allocation2 + $0x108] sm:$0xff] }
 0x21d   : > { %1169 = vst.msk [vmem:[#allocation2 + $0x111] sm:$0xff] %vm770_vm0, %v1136_v34 }
 0x21e   : > { %v1013_v27 = vpop.f32.mrf.mxu2 }
 0x21f   : > { %v1069_v32 = vmul.f32 %v5823_v43, %v1013_v27 }
 0x221   : > { %v1105_v4 = vadd.f32 %v5835_v37, %v1069_v32  ;;  %v6108_v32 = vld [vmem:[#allocation2 + $0x69] sm:$0xff] }
 0x223   : > { %v1137_v22 = vmax.f32 %v1105_v4, 0.0  ;;  %4685 = vmatmul.msk.f32.gmra.mxu2 %vm770_vm0, %v6095_v13  ;;  %4716 = vmatmul.msk.f32.gmra.mxu3 %vm770_vm0, %v6097_v15  ;;  %v6110_v4 = vld [vmem:[#allocation2 + $0x60] sm:$0xff] }
 0x224   : > { %4748 = vmatmul.msk.f32.gmra.mxu1 %vm770_vm0, %v1686_v17  ;;  %4842 = vmatmul.msk.f32.gmra.mxu0 %vm770_vm0, %v1686_v17  ;;  %v2846_v17 = vld [vmem:[#allocation6 + $0x1a8] sm:$0xff]  ;;  %v1701_v55 = vld [vmem:[#allocation2 + $0x10a] sm:$0xff] }
 0x225   : > { %1170 = vst.msk [vmem:[#allocation2 + $0x121] sm:$0xff] %vm770_vm0, %v1137_v22  ;;  %v1998_v22 = vld [vmem:[#allocation6 + $0xe0] sm:$0xff]  ;;  %2955 = vmatpush.msra.mxu1 %v2846_v17 }
 0x226   : > { %v1016_v34 = vpop.f32.mrf.mxu3  ;;  %2109 = vmatpush.msra.mxu2 %v1998_v22  ;;  %v6303_v46 = vld [vmem:[#allocation2 + $0x110] sm:$0xff] }
 0x227   : > { %v1070_v35 = vmul.f32 %v5823_v43, %v1016_v34  ;;  %v2280_v34 = vld [vmem:[#allocation6 + $0x120] sm:$0xff] }
 0x228   : > { %2391 = vmatpush.msra.mxu3 %v2280_v34  ;;  %v6134_v34 = vld [vmem:[#allocation2 + $0x81] sm:$0xff]  ;;  %v1702_v5 = vld [vmem:[#allocation2 + $0x112] sm:$0xff] }
 0x229   : > { %v1106_v27 = vadd.f32 %v5835_v37, %v1070_v35 }
 0x22b   : > { %v1138_v12 = vmax.f32 %v1106_v27, 0.0  ;;  %4686 = vmatmul.msk.f32.gmra.mxu2 %vm770_vm0, %v6108_v32  ;;  %4717 = vmatmul.msk.f32.gmra.mxu3 %vm770_vm0, %v6110_v4 }
 0x22c   : > { %4749 = vmatmul.msk.f32.gmra.mxu1 %vm770_vm0, %v1687_v7  ;;  %4843 = vmatmul.msk.f32.gmra.mxu0 %vm770_vm0, %v1687_v7  ;;  %v1688_v7 = vld [vmem:[#allocation2 + $0x6a] sm:$0xff]  ;;  %v6301_v48 = vld [vmem:[#allocation2 + $0x121] sm:$0xff] }
 0x22d   : > { %1171 = vst.msk [vmem:[#allocation2 + $0x129] sm:$0xff] %vm770_vm0, %v1138_v12 }
 0x22e   : > { %v1019_v35 = vpop.f32.mrf.mxu3  ;;  %7666 = vst [vmem:[#allocation53_spill] sm:$0xff] %v6301_v48 }
 0x22f   : > { %v1071_v27 = vmul.f32 %v5823_v43, %v1019_v35 }
 0x231   : > { %v1107_v2 = vadd.f32 %v5835_v37, %v1071_v27  ;;  %v1689_v27 = vld [vmem:[#allocation2 + $0x7a] sm:$0xff] }
 0x233   : > { %v1139_v29 = vmax.f32 %v1107_v2, 0.0  ;;  %4687 = vmatmul.msk.f32.gmra.mxu2 %vm770_vm0, %v6121_v61  ;;  %4718 = vmatmul.msk.f32.gmra.mxu3 %vm770_vm0, %v6123_v56  ;;  %v6136_v2 = vld [vmem:[#allocation2 + $0x78] sm:$0xff] }
 0x234   : > { %4750 = vmatmul.msk.f32.gmra.mxu1 %vm770_vm0, %v1688_v7  ;;  %4844 = vmatmul.msk.f32.gmra.mxu0 %vm770_vm0, %v1688_v7 }
 0x235   : > { %1172 = vst.msk [vmem:[#allocation2 + $0x139] sm:$0xff] %vm770_vm0, %v1139_v29 }
 0x236   : > { %v1022_v12 = vpop.f32.mrf.mxu3 }
 0x237   : > { %v1072_v17 = vmul.f32 %v5823_v43, %v1022_v12 }
 0x239   : > { %v1108_v22 = vadd.f32 %v5835_v37, %v1072_v17  ;;  %v6147_v17 = vld [vmem:[#allocation2 + $0x91] sm:$0xff] }
 0x23b   : > { %v1140_v35 = vmax.f32 %v1108_v22, 0.0  ;;  %4688 = vmatmul.msk.f32.gmra.mxu2 %vm770_vm0, %v6134_v34  ;;  %4719 = vmatmul.msk.f32.gmra.mxu3 %vm770_vm0, %v6136_v2  ;;  %v6149_v22 = vld [vmem:[#allocation2 + $0x80] sm:$0xff] }
 0x23c   : > { %4751 = vmatmul.msk.f32.gmra.mxu1 %vm770_vm0, %v1689_v27  ;;  %4845 = vmatmul.msk.f32.gmra.mxu0 %vm770_vm0, %v1689_v27 }
 0x23d   : > { %1173 = vst.msk [vmem:[#allocation2 + $0x141] sm:$0xff] %vm770_vm0, %v1140_v35 }
 0x23e   : > { %v1025_v29 = vpop.f32.mrf.mxu3 }
 0x23f   : > { %v1073_v7 = vmul.f32 %v5823_v43, %v1025_v29 }
 0x241   : > { %v1109_v12 = vadd.f32 %v5835_v37, %v1073_v7  ;;  %v6160_v7 = vld [vmem:[#allocation2 + $0x99] sm:$0xff] }
 0x242   : > { %v6203_v54 = vpop.f32.mrf.mxu2 }
 0x243   : > { %v1141_v19 = vmax.f32 %v1109_v12, 0.0  ;;  %4689 = vmatmul.msk.f32.gmra.mxu2 %vm770_vm0, %v6147_v17  ;;  %4720 = vmatmul.msk.f32.gmra.mxu3 %vm770_vm0, %v6149_v22  ;;  %v6162_v12 = vld [vmem:[#allocation2 + $0x90] sm:$0xff] }
 0x244   : > { %4752 = vmatmul.msk.f32.gmra.mxu1 %vm770_vm0, %v1690_v9  ;;  %4846 = vmatmul.msk.f32.gmra.mxu0 %vm770_vm0, %v1690_v9  ;;  %v2845_v9 = vld [vmem:[#allocation6 + $0x1a0] sm:$0xff] }
 0x245   : > { %1174 = vst.msk [vmem:[#allocation2 + $0x151] sm:$0xff] %vm770_vm0, %v1141_v19  ;;  %v1997_v19 = vld [vmem:[#allocation6 + $0xd8] sm:$0xff]  ;;  %2956 = vmatpush.msra.mxu1 %v2845_v9 }
 0x246   : > { %v1028_v35 = vpop.f32.mrf.mxu3  ;;  %2110 = vmatpush.msra.mxu2 %v1997_v19 }
 0x247   : > { %v1074_v27 = vmul.f32 %v5823_v43, %v1028_v35  ;;  %v2279_v35 = vld [vmem:[#allocation6 + $0x118] sm:$0xff]  ;;  %2957 = vmatpush.msra.mxu1 %v2844_v42 }
 0x248   : > { %2392 = vmatpush.msra.mxu3 %v2279_v35  ;;  %v6186_v35 = vld [vmem:[#allocation2 + $0xb1] sm:$0xff]  ;;  %2111 = vmatpush.msra.mxu2 %v1996_v62 }
 0x249   : > { %v1110_v29 = vadd.f32 %v5835_v37, %v1074_v27 }
 0x24a   : > { %2112 = vmatpush.msra.mxu2 %v1995_v31  ;;  %v6277_v31 = vld [vmem:[#allocation2 + $0x109] sm:$0xff] }
 0x24b   : > { %v1142_v39 = vmax.f32 %v1110_v29, 0.0  ;;  %4690 = vmatmul.msk.f32.gmra.mxu2 %vm770_vm0, %v6160_v7  ;;  %4721 = vmatmul.msk.f32.gmra.mxu3 %vm770_vm0, %v6162_v12  ;;  %7662 = vst [vmem:[#allocation49_spill] sm:$0xff] %v6277_v31 }
 0x24c   : > { %4753 = vmatmul.msk.f32.gmra.mxu1 %vm770_vm0, %v1691_v52  ;;  %4847 = vmatmul.msk.f32.gmra.mxu0 %vm770_vm0, %v1691_v52  ;;  %v1692_v52 = vld [vmem:[#allocation2 + $0x9a] sm:$0xff] }
 0x24d   : > { %1175 = vst.msk [vmem:[#allocation2 + $0x159] sm:$0xff] %vm770_vm0, %v1142_v39  ;;  %2113 = vmatpush.msra.mxu2 %v1994_v58 }
 0x24e   : > { %v1031_v27 = vpop.f32.mrf.mxu3 }
 0x24f   : > { %v1075_v29 = vmul.f32 %v5823_v43, %v1031_v27 }
 0x251   : > { %v1111_v18 = vadd.f32 %v5835_v37, %v1075_v29  ;;  %v1693_v29 = vld [vmem:[#allocation2 + $0xaa] sm:$0xff] }
 0x253   : > { %v1143_v28 = vmax.f32 %v1111_v18, 0.0  ;;  %4691 = vmatmul.msk.f32.gmra.mxu2 %vm770_vm0, %v6173_v44  ;;  %4722 = vmatmul.msk.f32.gmra.mxu3 %vm770_vm0, %v6175_v30  ;;  %v6188_v18 = vld [vmem:[#allocation2 + $0xa8] sm:$0xff] }
 0x254   : > { %4754 = vmatmul.msk.f32.gmra.mxu1 %vm770_vm0, %v1692_v52  ;;  %4848 = vmatmul.msk.f32.gmra.mxu0 %vm770_vm0, %v1692_v52 }
 0x255   : > { %1176 = vst.msk [vmem:[#allocation2 + $0x169] sm:$0xff] %vm770_vm0, %v1143_v28 }
 0x256   : > { %v1034_v39 = vpop.f32.mrf.mxu3 }
 0x257   : > { %v1076_v9 = vmul.f32 %v5823_v43, %v1034_v39 }
 0x259   : > { %v1112_v19 = vadd.f32 %v5835_v37, %v1076_v9  ;;  %v6199_v9 = vld [vmem:[#allocation2 + $0xc1] sm:$0xff] }
 0x25b   : > { %v1144_v27 = vmax.f32 %v1112_v19, 0.0  ;;  %4692 = vmatmul.msk.f32.gmra.mxu2 %vm770_vm0, %v6186_v35  ;;  %4723 = vmatmul.msk.f32.gmra.mxu3 %vm770_vm0, %v6188_v18  ;;  %v6201_v19 = vld [vmem:[#allocation2 + $0xb0] sm:$0xff] }
 0x25c   : > { %4755 = vmatmul.msk.f32.gmra.mxu1 %vm770_vm0, %v1693_v29  ;;  %4849 = vmatmul.msk.f32.gmra.mxu0 %vm770_vm0, %v1693_v29  ;;  %v1694_v29 = vld [vmem:[#allocation2 + $0xb2] sm:$0xff] }
 0x25d   : > { %1177 = vst.msk [vmem:[#allocation2 + $0x171] sm:$0xff] %vm770_vm0, %v1144_v27  ;;  %v6212_v27 = vpop.f32.mrf.mxu1 }
 0x25e   : > { %v1037_v28 = vpop.f32.mrf.mxu3 }
 0x25f   : > { %v1077_v52 = vmul.f32 %v5823_v43, %v1037_v28 }
 0x261   : > { %v1113_v39 = vadd.f32 %v5835_v37, %v1077_v52 }
 0x263   : > { %v1145_v41 = vmax.f32 %v1113_v39, 0.0  ;;  %4693 = vmatmul.msk.f32.gmra.mxu2 %vm770_vm0, %v6199_v9  ;;  %4724 = vmatmul.msk.f32.gmra.mxu3 %vm770_vm0, %v6201_v19 }
 0x264   : > { %4756 = vmatmul.msk.f32.gmra.mxu1 %vm770_vm0, %v1694_v29  ;;  %4850 = vmatmul.msk.f32.gmra.mxu0 %vm770_vm0, %v1694_v29  ;;  %v6229_v29 = vld [vmem:[#allocation2 + $0xd9] sm:$0xff] }
 0x265   : > { %1178 = vst.msk [vmem:[#allocation2 + $0x181] sm:$0xff] %vm770_vm0, %v1145_v41  ;;  %v1695_v41 = vld [vmem:[#allocation2 + $0xc2] sm:$0xff]  ;;  %v1836_v62 = vpop.f32.mrf.mxu1 }
 0x266   : > { %v1040_v28 = vpop.f32.mrf.mxu3 }
 0x267   : > { %v1078_v52 = vmul.f32 %v5823_v43, %v1040_v28  ;;  %v1377_v43 = vpop.f32.mrf.mxu2  ;;  %v6231_v28 = vld [vmem:[#allocation2 + $0xc8] sm:$0xff] }
 0x269   : > { %v1114_v39 = vadd.f32 %v5835_v37, %v1078_v52  ;;  %v2278_v37 = vld [vmem:[#allocation6 + $0x110] sm:$0xff]  ;;  %v1696_v52 = vld [vmem:[#allocation2 + $0xca] sm:$0xff] }
 0x26a   : > { %2393 = vmatpush.msra.mxu3 %v2278_v37 }
 0x26b   : > { %v1146_v51 = vmax.f32 %v1114_v39, 0.0  ;;  %4694 = vmatmul.msk.f32.gmra.mxu2 %vm770_vm0, %v6216_v63  ;;  %4725 = vmatmul.msk.f32.gmra.mxu3 %vm770_vm0, %v6218_v23 }
 0x26c   : > { %4757 = vmatmul.msk.f32.gmra.mxu1 %vm770_vm0, %v1695_v41  ;;  %4851 = vmatmul.msk.f32.gmra.mxu0 %vm770_vm0, %v1695_v41 }
 0x26d   : > { %1179 = vst.msk [vmem:[#allocation2 + $0x189] sm:$0xff] %vm770_vm0, %v1146_v51 }
 0x26e   : > { %v6227_v42 = vpop.f32.mrf.mxu3 }
 0x273   : > { %4695 = vmatmul.msk.f32.gmra.mxu2 %vm770_vm0, %v6229_v29  ;;  %4726 = vmatmul.msk.f32.gmra.mxu3 %vm770_vm0, %v6231_v28 }
 0x274   : > { %4758 = vmatmul.msk.f32.gmra.mxu1 %vm770_vm0, %v1696_v52  ;;  %4852 = vmatmul.msk.f32.gmra.mxu0 %vm770_vm0, %v1696_v52 }
 0x276   : > { %v1380_v51 = vpop.f32.mrf.mxu2  ;;  %v1586_v39 = vpop.f32.mrf.mxu3 }
 0x277   : > { %v1587_v41 = vadd.f32 %v1586_v39, %v1377_v43 }
 0x279   : > { %v1839_v37 = vpop.f32.mrf.mxu1  ;;  %v6239_v33 = vadd.f32 %v1836_v62, %v1587_v41 }
 0x27b   : > { %4696 = vmatmul.msk.f32.gmra.mxu2 %vm770_vm0, %v6241_v24  ;;  %4727 = vmatmul.msk.f32.gmra.mxu3 %vm770_vm0, %v6243_v14 }
 0x27c   : > { %4759 = vmatmul.msk.f32.gmra.mxu1 %vm770_vm0, %v1697_v3  ;;  %4853 = vmatmul.msk.f32.gmra.mxu0 %vm770_vm0, %v1697_v3 }
 0x27e   : > { %v1383_v52 = vpop.f32.mrf.mxu2  ;;  %v1589_v43 = vpop.f32.mrf.mxu3 }
 0x27f   : > { %v1590_v39 = vadd.f32 %v1589_v43, %v1380_v51 }
 0x281   : > { %v1842_v62 = vpop.f32.mrf.mxu1  ;;  %v6251_v41 = vadd.f32 %v1839_v37, %v1590_v39  ;;  %v2843_v37 = vld [vmem:[#allocation6 + $0x190] sm:$0xff] }
 0x282   : > { %2958 = vmatpush.msra.mxu1 %v2843_v37 }
 0x283   : > { %4697 = vmatmul.msk.f32.gmra.mxu2 %vm770_vm0, %v6253_v57  ;;  %4728 = vmatmul.msk.f32.gmra.mxu3 %vm770_vm0, %v6255_v45 }
 0x284   : > { %4760 = vmatmul.msk.f32.gmra.mxu1 %vm770_vm0, %v1698_v36  ;;  %4854 = vmatmul.msk.f32.gmra.mxu0 %vm770_vm0, %v1698_v36  ;;  %v1699_v36 = vld [vmem:[#allocation2 + $0xf2] sm:$0xff] }
 0x286   : > { %v1386_v3 = vpop.f32.mrf.mxu2  ;;  %v1592_v51 = vpop.f32.mrf.mxu3 }
 0x287   : > { %v1593_v43 = vadd.f32 %v1592_v51, %v1383_v52  ;;  %v2277_v52 = vld [vmem:[#allocation6 + $0x108] sm:$0xff] }
 0x288   : > { %2394 = vmatpush.msra.mxu3 %v2277_v52 }
 0x289   : > { %v1845_v39 = vpop.f32.mrf.mxu1  ;;  %v6263_v26 = vadd.f32 %v1842_v62, %v1593_v43 }
 0x28b   : > { %4698 = vmatmul.msk.f32.gmra.mxu2 %vm770_vm0, %v6265_v21  ;;  %4729 = vmatmul.msk.f32.gmra.mxu3 %vm770_vm0, %v6267_v16 }
 0x28c   : > { %4761 = vmatmul.msk.f32.gmra.mxu1 %vm770_vm0, %v1699_v36  ;;  %4855 = vmatmul.msk.f32.gmra.mxu0 %vm770_vm0, %v1699_v36 }
 0x28e   : > { %v1389_v62 = vpop.f32.mrf.mxu2  ;;  %v1595_v51 = vpop.f32.mrf.mxu3 }
 0x28f   : > { %v1596_v43 = vadd.f32 %v1595_v51, %v1386_v3 }
 0x291   : > { %v1848_v37 = vpop.f32.mrf.mxu1  ;;  %v6275_v11 = vadd.f32 %v1845_v39, %v1596_v43  ;;  %v6289_v43 = vld [vmem:[#allocation2 + $0x111] sm:$0xff] }
 0x292   : > { %7664 = vst [vmem:[#allocation51_spill] sm:$0xff] %v6289_v43 }
 0x293   : > { %7661 = vst [vmem:[#allocation48_spill] sm:$0xff] %v6275_v11  ;;  %4699 = vmatmul.msk.f32.gmra.mxu2 %vm770_vm0, %v6277_v31  ;;  %4730 = vmatmul.msk.f32.gmra.mxu3 %vm770_vm0, %v6279_v6  ;;  %v6357_v31 = vld [vmem:[#allocation2 + $0x140] sm:$0xff] }
 0x294   : > { %4762 = vmatmul.msk.f32.gmra.mxu1 %vm770_vm0, %v1700_v1  ;;  %4856 = vmatmul.msk.f32.gmra.mxu0 %vm770_vm0, %v1700_v1  ;;  %7678 = vst [vmem:[#allocation65_spill] sm:$0xff] %v6357_v31  ;;  %v6367_v11 = vld [vmem:[#allocation2 + $0x159] sm:$0xff] }
 0x295   : > { %7680 = vst [vmem:[#allocation67_spill] sm:$0xff] %v6367_v11 }
 0x296   : > { %v1392_v36 = vpop.f32.mrf.mxu2  ;;  %v1598_v3 = vpop.f32.mrf.mxu3 }
 0x297   : > { %v1599_v52 = vadd.f32 %v1598_v3, %v1389_v62 }
 0x299   : > { %v1851_v39 = vpop.f32.mrf.mxu1  ;;  %v6287_v51 = vadd.f32 %v1848_v37, %v1599_v52 }
 0x29b   : > { %7663 = vst [vmem:[#allocation50_spill] sm:$0xff] %v6287_v51  ;;  %4700 = vmatmul.msk.f32.gmra.mxu2 %vm770_vm0, %v6289_v43  ;;  %4731 = vmatmul.msk.f32.gmra.mxu3 %vm770_vm0, %v6291_v60  ;;  %v6327_v43 = vld [vmem:[#allocation2 + $0x139] sm:$0xff]  ;;  %v6341_v51 = vld [vmem:[#allocation2 + $0x141] sm:$0xff] }
 0x29c   : > { %4763 = vmatmul.msk.f32.gmra.mxu1 %vm770_vm0, %v1701_v55  ;;  %4857 = vmatmul.msk.f32.gmra.mxu0 %vm770_vm0, %v1701_v55  ;;  %7671 = vst [vmem:[#allocation58_spill] sm:$0xff] %v6327_v43 }
 0x29d   : > { %7674 = vst [vmem:[#allocation61_spill] sm:$0xff] %v6341_v51 }
 0x29e   : > { %v1395_v1 = vpop.f32.mrf.mxu2  ;;  %v1601_v62 = vpop.f32.mrf.mxu3 }
 0x29f   : > { %v1602_v3 = vadd.f32 %v1601_v62, %v1392_v36 }
 0x2a1   : > { %v1854_v37 = vpop.f32.mrf.mxu1  ;;  %v6299_v52 = vadd.f32 %v1851_v39, %v1602_v3  ;;  %v2842_v39 = vld [vmem:[#allocation6 + $0x188] sm:$0xff] }
 0x2a2   : > { %2959 = vmatpush.msra.mxu1 %v2842_v39 }
 0x2a3   : > { %7665 = vst [vmem:[#allocation52_spill] sm:$0xff] %v6299_v52  ;;  %4701 = vmatmul.msk.f32.gmra.mxu2 %vm770_vm0, %v6301_v48  ;;  %4732 = vmatmul.msk.f32.gmra.mxu3 %vm770_vm0, %v6303_v46  ;;  %v6313_v52 = vld [vmem:[#allocation2 + $0x129] sm:$0xff]  ;;  %v6315_v48 = vld [vmem:[#allocation2 + $0x120] sm:$0xff] }
 0x2a4   : > { %4764 = vmatmul.msk.f32.gmra.mxu1 %vm770_vm0, %v1702_v5  ;;  %4858 = vmatmul.msk.f32.gmra.mxu0 %vm770_vm0, %v1702_v5  ;;  %7668 = vst [vmem:[#allocation55_spill] sm:$0xff] %v6313_v52  ;;  %v1703_v5 = vld [vmem:[#allocation2 + $0x122] sm:$0xff] }
 0x2a5   : > { %7669 = vst [vmem:[#allocation56_spill] sm:$0xff] %v6315_v48 }
 0x2a6   : > { %v1398_v55 = vpop.f32.mrf.mxu2  ;;  %v1604_v36 = vpop.f32.mrf.mxu3 }
 0x2a7   : > { %v1605_v62 = vadd.f32 %v1604_v36, %v1395_v1  ;;  %v2276_v1 = vld [vmem:[#allocation6 + $0x100] sm:$0xff]  ;;  %v6323_v36 = vpop.f32.mrf.mxu0 }
 0x2a8   : > { %2395 = vmatpush.msra.mxu3 %v2276_v1 }
 0x2a9   : > { %v1857_v3 = vpop.f32.mrf.mxu1  ;;  %v6311_v47 = vadd.f32 %v1854_v37, %v1605_v62 }
 0x2ab   : > { %7667 = vst [vmem:[#allocation54_spill] sm:$0xff] %v6311_v47  ;;  %4702 = vmatmul.msk.f32.gmra.mxu2 %vm770_vm0, %v6313_v52  ;;  %4733 = vmatmul.msk.f32.gmra.mxu3 %vm770_vm0, %v6315_v48  ;;  %v6329_v52 = vld [vmem:[#allocation2 + $0x128] sm:$0xff]  ;;  %v6343_v48 = vld [vmem:[#allocation2 + $0x138] sm:$0xff] }
 0x2ac   : > { %4765 = vmatmul.msk.f32.gmra.mxu1 %vm770_vm0, %v1703_v5  ;;  %4859 = vmatmul.msk.f32.gmra.mxu0 %vm770_vm0, %v1703_v5  ;;  %7672 = vst [vmem:[#allocation59_spill] sm:$0xff] %v6329_v52  ;;  %v1704_v5 = vld [vmem:[#allocation2 + $0x12a] sm:$0xff] }
 0x2ad   : > { %7675 = vst [vmem:[#allocation62_spill] sm:$0xff] %v6343_v48 }
 0x2ae   : > { %v1401_v37 = vpop.f32.mrf.mxu2  ;;  %v1607_v62 = vpop.f32.mrf.mxu3 }
 0x2af   : > { %v1608_v39 = vadd.f32 %v1607_v62, %v1398_v55  ;;  %v6337_v62 = vpop.f32.mrf.mxu0 }
 0x2b1   : > { %v1860_v47 = vpop.f32.mrf.mxu1  ;;  %v6325_v58 = vadd.f32 %v1857_v3, %v1608_v39 }
 0x2b3   : > { %7670 = vst [vmem:[#allocation57_spill] sm:$0xff] %v6325_v58  ;;  %4703 = vmatmul.msk.f32.gmra.mxu2 %vm770_vm0, %v6327_v43  ;;  %4734 = vmatmul.msk.f32.gmra.mxu3 %vm770_vm0, %v6329_v52  ;;  %v1705_v43 = vld [vmem:[#allocation2 + $0x13a] sm:$0xff]  ;;  %v6355_v52 = vld [vmem:[#allocation2 + $0x151] sm:$0xff] }
 0x2b4   : > { %4766 = vmatmul.msk.f32.gmra.mxu1 %vm770_vm0, %v1704_v5  ;;  %4860 = vmatmul.msk.f32.gmra.mxu0 %vm770_vm0, %v1704_v5  ;;  %7677 = vst [vmem:[#allocation64_spill] sm:$0xff] %v6355_v52 }
 0x2b6   : > { %v1404_v1 = vpop.f32.mrf.mxu2  ;;  %v1610_v55 = vpop.f32.mrf.mxu3 }
 0x2b7   : > { %v1611_v3 = vadd.f32 %v1610_v55, %v1401_v37 }
 0x2b9   : > { %v1863_v39 = vpop.f32.mrf.mxu1  ;;  %v6339_v58 = vadd.f32 %v1860_v47, %v1611_v3  ;;  %v6351_v47 = vpop.f32.mrf.mxu0 }
 0x2bb   : > { %7673 = vst [vmem:[#allocation60_spill] sm:$0xff] %v6339_v58  ;;  %4704 = vmatmul.msk.f32.gmra.mxu2 %vm770_vm0, %v6341_v51  ;;  %4735 = vmatmul.msk.f32.gmra.mxu3 %vm770_vm0, %v6343_v48  ;;  %v1706_v51 = vld [vmem:[#allocation2 + $0x142] sm:$0xff] }
 0x2bc   : > { %4767 = vmatmul.msk.f32.gmra.mxu1 %vm770_vm0, %v1705_v43  ;;  %4861 = vmatmul.msk.f32.gmra.mxu0 %vm770_vm0, %v1705_v43 }
 0x2be   : > { %v1407_v5 = vpop.f32.mrf.mxu2  ;;  %v1613_v37 = vpop.f32.mrf.mxu3 }
 0x2bf   : > { %v1614_v55 = vadd.f32 %v1613_v37, %v1404_v1 }
 0x2c1   : > { %v1866_v3 = vpop.f32.mrf.mxu1  ;;  %v6353_v58 = vadd.f32 %v1863_v39, %v1614_v55  ;;  %v2841_v39 = vld [vmem:[#allocation6 + $0x180] sm:$0xff] }
 0x2c2   : > { %2960 = vmatpush.msra.mxu1 %v2841_v39 }
 0x2c3   : > { %7676 = vst [vmem:[#allocation63_spill] sm:$0xff] %v6353_v58  ;;  %4705 = vmatmul.msk.f32.gmra.mxu2 %vm770_vm0, %v6355_v52  ;;  %4736 = vmatmul.msk.f32.gmra.mxu3 %vm770_vm0, %v6357_v31  ;;  %v3130_v58 = vld [vmem:[#allocation6 + $0x1f8] sm:$0xff]  ;;  %v6369_v52 = vld [vmem:[#allocation2 + $0x150] sm:$0xff]  ;;  %v6371_v31 = vpop.f32.mrf.mxu0 }
 0x2c4   : > { %4768 = vmatmul.msk.f32.gmra.mxu1 %vm770_vm0, %v1706_v51  ;;  %4862 = vmatmul.msk.f32.gmra.mxu0 %vm770_vm0, %v1706_v51  ;;  %7681 = vst [vmem:[#allocation68_spill] sm:$0xff] %v6369_v52  ;;  %v1707_v51 = vld [vmem:[#allocation2 + $0x152] sm:$0xff] }
 0x2c5   : > { %3235 = vmatpush.msrb.mxu2 %v3130_v58  ;;  %7682 = vst [vmem:[#allocation69_spill] sm:$0xff] %v6371_v31  ;;  %v6383_v31 = vld [vmem:[#allocation2 + $0x158] sm:$0xff] }
 0x2c6   : > { %v1410_v43 = vpop.f32.mrf.mxu2  ;;  %v1616_v1 = vpop.f32.mrf.mxu3  ;;  %7685 = vst [vmem:[#allocation72_spill] sm:$0xff] %v6383_v31 }
 0x2c7   : > { %v1617_v37 = vadd.f32 %v1616_v1, %v1407_v5  ;;  %v3412_v5 = vld [vmem:[#allocation6 + $0x238] sm:$0xff] }
 0x2c8   : > { %3517 = vmatpush.msrb.mxu3 %v3412_v5 }
 0x2c9   : > { %v1869_v55 = vpop.f32.mrf.mxu1  ;;  %v6365_v48 = vadd.f32 %v1866_v3, %v1617_v37 }
 0x2cb   : > { %7679 = vst [vmem:[#allocation66_spill] sm:$0xff] %v6365_v48  ;;  %4706 = vmatmul.msk.f32.gmra.mxu2 %vm770_vm0, %v6367_v11  ;;  %4737 = vmatmul.msk.f32.gmra.mxu3 %vm770_vm0, %v6369_v52  ;;  %v6381_v48 = vld [vmem:[#allocation2 + $0x169] sm:$0xff]  ;;  %v1708_v11 = vld [vmem:[#allocation2 + $0x15a] sm:$0xff] }
 0x2cc   : > { %4769 = vmatmul.msk.f32.gmra.mxu1 %vm770_vm0, %v1707_v51  ;;  %4863 = vmatmul.msk.f32.gmra.mxu0 %vm770_vm0, %v1707_v51  ;;  %7684 = vst [vmem:[#allocation71_spill] sm:$0xff] %v6381_v48  ;;  %v6391_v51 = vpop.f32.mrf.mxu0  ;;  %v6397_v52 = vld [vmem:[#allocation2 + $0x168] sm:$0xff] }
 0x2cd   : > { %7688 = vst [vmem:[#allocation75_spill] sm:$0xff] %v6397_v52 }
 0x2ce   : > { %v1413_v3 = vpop.f32.mrf.mxu2  ;;  %v1619_v1 = vpop.f32.mrf.mxu3 }
 0x2cf   : > { %v1620_v37 = vadd.f32 %v1619_v1, %v1410_v43 }
 0x2d1   : > { %v1872_v39 = vpop.f32.mrf.mxu1  ;;  %v6379_v58 = vadd.f32 %v1869_v55, %v1620_v37 }
 0x2d3   : > { %7683 = vst [vmem:[#allocation70_spill] sm:$0xff] %v6379_v58  ;;  %4707 = vmatmul.msk.f32.gmra.mxu2 %vm770_vm0, %v6381_v48  ;;  %4738 = vmatmul.msk.f32.gmra.mxu3 %vm770_vm0, %v6383_v31  ;;  %v6395_v58 = vld [vmem:[#allocation2 + $0x171] sm:$0xff] }
 0x2d4   : > { %4770 = vmatmul.msk.f32.gmra.mxu1 %vm770_vm0, %v1708_v11  ;;  %4864 = vmatmul.msk.f32.gmra.mxu0 %vm770_vm0, %v1708_v11  ;;  %7687 = vst [vmem:[#allocation74_spill] sm:$0xff] %v6395_v58  ;;  %v1709_v48 = vld [vmem:[#allocation2 + $0x16a] sm:$0xff] }
 0x2d5   : > { %v6409_v31 = vld [vmem:[#allocation2 + $0x170] sm:$0xff] }
 0x2d6   : > { %v1416_v43 = vpop.f32.mrf.mxu2  ;;  %v1622_v55 = vpop.f32.mrf.mxu3  ;;  %7690 = vst [vmem:[#allocation77_spill] sm:$0xff] %v6409_v31 }
 0x2d7   : > { %v1623_v5 = vadd.f32 %v1622_v55, %v1413_v3 }
 0x2d9   : > { %v1875_v1 = vpop.f32.mrf.mxu1  ;;  %v6393_v37 = vadd.f32 %v1872_v39, %v1623_v5  ;;  %v6405_v39 = vpop.f32.mrf.mxu0 }
 0x2db   : > { %7686 = vst [vmem:[#allocation73_spill] sm:$0xff] %v6393_v37  ;;  %4708 = vmatmul.msk.f32.gmra.mxu2 %vm770_vm0, %v6395_v58  ;;  %4739 = vmatmul.msk.f32.gmra.mxu3 %vm770_vm0, %v6397_v52  ;;  %v1710_v58 = vld [vmem:[#allocation2 + $0x172] sm:$0xff] }
 0x2dc   : > { %4771 = vmatmul.msk.f32.gmra.mxu1 %vm770_vm0, %v1709_v48  ;;  %4865 = vmatmul.msk.f32.gmra.mxu0 %vm770_vm0, %v1709_v48 }
 0x2de   : > { %v1419_v11 = vpop.f32.mrf.mxu2  ;;  %v1625_v3 = vpop.f32.mrf.mxu3 }
 0x2df   : > { %v1626_v55 = vadd.f32 %v1625_v3, %v1416_v43 }
 0x2e1   : > { %v1878_v5 = vpop.f32.mrf.mxu1  ;;  %v6407_v37 = vadd.f32 %v1875_v1, %v1626_v55  ;;  %v4126_v1 = vld [vmem:[%s7507_s11 + $0x78] sm:$0xff] }
 0x2e2   : > { %4127 = vmatpush.msrb.mxu1 %v4126_v1 }
 0x2e3   : > { %7689 = vst [vmem:[#allocation76_spill] sm:$0xff] %v6407_v37  ;;  %4740 = vmatmul.msk.f32.gmra.mxu3 %vm770_vm0, %v6409_v31  ;;  %4773 = vmatmul.msk.f32.vlgmr.msra.gmra.mxu2 %vm770_vm0, %v6025_v20  ;;  %v3129_v37 = vld [vmem:[#allocation6 + $0x1f0] sm:$0xff]  ;;  %v6422_v31 = vpop.f32.mrf.mxu0 }
 0x2e4   : > { %4772 = vmatmul.msk.f32.gmra.mxu1 %vm770_vm0, %v1710_v58  ;;  %4866 = vmatmul.msk.f32.gmra.mxu0 %vm770_vm0, %v1710_v58  ;;  %v2555_v20 = vld [vmem:[#allocation2 + $0x182] sm:$0xff] }
 0x2e5   : > { %3236 = vmatpush.msrb.mxu2 %v3129_v37  ;;  %v3411_v58 = vld [vmem:[#allocation6 + $0x230] sm:$0xff] }
 0x2e6   : > { %v1422_v48 = vpop.f32.mrf.mxu2  ;;  %v1628_v43 = vpop.f32.mrf.mxu3  ;;  %3518 = vmatpush.msrb.mxu3 %v3411_v58 }
 0x2e7   : > { %v1629_v3 = vadd.f32 %v1628_v43, %v1419_v11 }
 0x2e9   : > { %v1881_v55 = vpop.f32.mrf.mxu1  ;;  %v6420_v52 = vadd.f32 %v1878_v5, %v1629_v3 }
 0x2eb   : > { %4774 = vmatmul.msk.f32.gmra.mxu2 %vm770_vm0, %v6041_v59  ;;  %4805 = vmatmul.msk.f32.vlgmr.msra.gmra.mxu3 %vm770_vm0, %v6012_v40  ;;  %v2556_v59 = vld [vmem:[#allocation2 + $0x18a] sm:$0xff]  ;;  %v6437_v40 = vpop.f32.mrf.mxu0 }
 0x2ec   : > { %4867 = vmatmul.msk.f32.gmra.mxu0 %vm770_vm0, %v2555_v20  ;;  %4869 = vmatmul.msk.f32.vlgmr.msra.gmra.mxu1 %vm770_vm0, %v6057_v38 }
 0x2ee   : > { %v1425_v11 = vpop.f32.mrf.mxu2  ;;  %v1631_v5 = vpop.f32.mrf.mxu3 }
 0x2ef   : > { %v1632_v43 = vadd.f32 %v1631_v5, %v1422_v48 }
 0x2f1   : > { %v1884_v3 = vpop.f32.mrf.mxu1  ;;  %v6431_v1 = vadd.f32 %v1881_v55, %v1632_v43  ;;  %v4125_v55 = vld [vmem:[%s7507_s11 + $0x70] sm:$0xff] }
 0x2f2   : > { %4128 = vmatpush.msrb.mxu1 %v4125_v55 }
 0x2f3   : > { %4775 = vmatmul.msk.f32.gmra.mxu2 %vm770_vm0, %v6057_v38  ;;  %4806 = vmatmul.msk.f32.gmra.mxu3 %vm770_vm0, %v6023_v25 }
 0x2f4   : > { %4868 = vmatmul.msk.f32.gmra.mxu0 %vm770_vm0, %v2556_v59  ;;  %4870 = vmatmul.msk.f32.gmra.mxu1 %vm770_vm0, %v6071_v53 }
 0x2f6   : > { %v1428_v37 = vpop.f32.mrf.mxu2  ;;  %v1634_v20 = vpop.f32.mrf.mxu3 }
 0x2f7   : > { %v1635_v48 = vadd.f32 %v1634_v20, %v1425_v11  ;;  %v4124_v20 = vld [vmem:[%s7507_s11 + $0x68] sm:$0xff] }
 0x2f8   : > { %4129 = vmatpush.msrb.mxu1 %v4124_v20 }
 0x2f9   : > { %v1887_v38 = vpop.f32.mrf.mxu1  ;;  %v6445_v58 = vadd.f32 %v1884_v3, %v1635_v48  ;;  %v3128_v48 = vld [vmem:[#allocation6 + $0x1e8] sm:$0xff] }
 0x2fa   : > { %3237 = vmatpush.msrb.mxu2 %v3128_v48 }
 0x2fb   : > { %4776 = vmatmul.msk.f32.gmra.mxu2 %vm770_vm0, %v6071_v53  ;;  %4807 = vmatmul.msk.f32.gmra.mxu3 %vm770_vm0, %v6039_v10 }
 0x2fc   : > { %4871 = vmatmul.msk.f32.gmra.mxu1 %vm770_vm0, %v6084_v8 }
 0x2fe   : > { %v1431_v25 = vpop.f32.mrf.mxu2  ;;  %v1637_v5 = vpop.f32.mrf.mxu3 }
 0x2ff   : > { %v1638_v11 = vadd.f32 %v1637_v5, %v1428_v37 }
 0x301   : > { %v1890_v43 = vpop.f32.mrf.mxu1  ;;  %v6453_v59 = vadd.f32 %v1887_v38, %v1638_v11 }
 0x303   : > { %4777 = vmatmul.msk.f32.gmra.mxu2 %vm770_vm0, %v6084_v8  ;;  %4808 = vmatmul.msk.f32.gmra.mxu3 %vm770_vm0, %v6055_v49  ;;  %v3410_v49 = vld [vmem:[#allocation6 + $0x228] sm:$0xff] }
 0x304   : > { %4872 = vmatmul.msk.f32.gmra.mxu1 %vm770_vm0, %v6097_v15  ;;  %3519 = vmatpush.msrb.mxu3 %v3410_v49 }
 0x306   : > { %v1434_v53 = vpop.f32.mrf.mxu2  ;;  %v1640_v10 = vpop.f32.mrf.mxu3 }
 0x307   : > { %v1641_v3 = vadd.f32 %v1640_v10, %v1431_v25  ;;  %v4123_v10 = vld [vmem:[%s7507_s11 + $0x60] sm:$0xff] }
 0x308   : > { %4130 = vmatpush.msrb.mxu1 %v4123_v10 }
 0x309   : > { %v1893_v37 = vpop.f32.mrf.mxu1  ;;  %v6464_v55 = vadd.f32 %v1890_v43, %v1641_v3 }
 0x30b   : > { %4778 = vmatmul.msk.f32.gmra.mxu2 %vm770_vm0, %v6097_v15  ;;  %4809 = vmatmul.msk.f32.gmra.mxu3 %vm770_vm0, %v6069_v50 }
 0x30c   : > { %4873 = vmatmul.msk.f32.gmra.mxu1 %vm770_vm0, %v6110_v4 }
 0x30e   : > { %v1437_v8 = vpop.f32.mrf.mxu2  ;;  %v1643_v38 = vpop.f32.mrf.mxu3 }
 0x30f   : > { %v1644_v25 = vadd.f32 %v1643_v38, %v1434_v53 }
 0x311   : > { %v1896_v5 = vpop.f32.mrf.mxu1  ;;  %v6472_v11 = vadd.f32 %v1893_v37, %v1644_v25  ;;  %v3127_v25 = vld [vmem:[#allocation6 + $0x1e0] sm:$0xff] }
 0x312   : > { %3238 = vmatpush.msrb.mxu2 %v3127_v25  ;;  %v3126_v25 = vld [vmem:[#allocation6 + $0x1d8] sm:$0xff] }
 0x313   : > { %4779 = vmatmul.msk.f32.gmra.mxu2 %vm770_vm0, %v6110_v4  ;;  %4810 = vmatmul.msk.f32.gmra.mxu3 %vm770_vm0, %v6082_v0 }
 0x314   : > { %4874 = vmatmul.msk.f32.gmra.mxu1 %vm770_vm0, %v6123_v56  ;;  %3239 = vmatpush.msrb.mxu2 %v3126_v25 }
 0x316   : > { %v1440_v50 = vpop.f32.mrf.mxu2  ;;  %v1646_v15 = vpop.f32.mrf.mxu3 }
 0x317   : > { %v1647_v43 = vadd.f32 %v1646_v15, %v1437_v8  ;;  %v4122_v8 = vld [vmem:[%s7507_s11 + $0x58] sm:$0xff] }
 0x318   : > { %4131 = vmatpush.msrb.mxu1 %v4122_v8  ;;  %v4120_v8 = vld [vmem:[%s7507_s11 + $0x48] sm:$0xff] }
 0x319   : > { %v1899_v53 = vpop.f32.mrf.mxu1  ;;  %v6483_v3 = vadd.f32 %v1896_v5, %v1647_v43 }
 0x31b   : > { %4780 = vmatmul.msk.f32.gmra.mxu2 %vm770_vm0, %v6123_v56  ;;  %4811 = vmatmul.msk.f32.gmra.mxu3 %vm770_vm0, %v6095_v13 }
 0x31c   : > { %4875 = vmatmul.msk.f32.gmra.mxu1 %vm770_vm0, %v6136_v2 }
 0x31e   : > { %v1443_v0 = vpop.f32.mrf.mxu2  ;;  %v1649_v4 = vpop.f32.mrf.mxu3 }
 0x31f   : > { %v1650_v20 = vadd.f32 %v1649_v4, %v1440_v50 }
 0x321   : > { %v1902_v37 = vpop.f32.mrf.mxu1  ;;  %v6491_v48 = vadd.f32 %v1899_v53, %v1650_v20 }
 0x323   : > { %4781 = vmatmul.msk.f32.gmra.mxu2 %vm770_vm0, %v6136_v2  ;;  %4812 = vmatmul.msk.f32.gmra.mxu3 %vm770_vm0, %v6108_v32  ;;  %v3409_v32 = vld [vmem:[#allocation6 + $0x220] sm:$0xff] }
 0x324   : > { %4876 = vmatmul.msk.f32.gmra.mxu1 %vm770_vm0, %v6149_v22  ;;  %3520 = vmatpush.msrb.mxu3 %v3409_v32 }
 0x326   : > { %v1446_v56 = vpop.f32.mrf.mxu2  ;;  %v1652_v13 = vpop.f32.mrf.mxu3 }
 0x327   : > { %v1653_v49 = vadd.f32 %v1652_v13, %v1443_v0  ;;  %v4121_v0 = vld [vmem:[%s7507_s11 + $0x50] sm:$0xff] }
 0x328   : > { %4132 = vmatpush.msrb.mxu1 %v4121_v0  ;;  %v3797_v0 = vld [vmem:[%s7506_s10 + $0x38] sm:$0xff] }
 0x329   : > { %v1905_v38 = vpop.f32.mrf.mxu1  ;;  %v6502_v5 = vadd.f32 %v1902_v37, %v1653_v49  ;;  %3902 = vmatpush.msrb.mxu0 %v3797_v0 }
 0x32a   : > { %4133 = vmatpush.msrb.mxu1 %v4120_v8 }
 0x32b   : > { %4782 = vmatmul.msk.f32.gmra.mxu2 %vm770_vm0, %v6149_v22  ;;  %4813 = vmatmul.msk.f32.gmra.mxu3 %vm770_vm0, %v6121_v61 }
 0x32c   : > { %4877 = vmatmul.msk.f32.gmra.mxu1 %vm770_vm0, %v6162_v12 }
 0x32e   : > { %v1449_v2 = vpop.f32.mrf.mxu2  ;;  %v1655_v50 = vpop.f32.mrf.mxu3 }
 0x32f   : > { %v1656_v15 = vadd.f32 %v1655_v50, %v1446_v56 }
 0x331   : > { %v1908_v43 = vpop.f32.mrf.mxu1  ;;  %v6510_v10 = vadd.f32 %v1905_v38, %v1656_v15 }
 0x333   : > { %4783 = vmatmul.msk.f32.gmra.mxu2 %vm770_vm0, %v6162_v12  ;;  %4814 = vmatmul.msk.f32.gmra.mxu3 %vm770_vm0, %v6134_v34 }
 0x334   : > { %4878 = vmatmul.msk.f32.gmra.mxu1 %vm770_vm0, %v6175_v30 }
 0x336   : > { %v1452_v61 = vpop.f32.mrf.mxu2  ;;  %v1658_v22 = vpop.f32.mrf.mxu3 }
 0x337   : > { %v1659_v53 = vadd.f32 %v1658_v22, %v1449_v2 }
 0x339   : > { %v1911_v4 = vpop.f32.mrf.mxu1  ;;  %v6521_v20 = vadd.f32 %v1908_v43, %v1659_v53  ;;  %v4119_v53 = vld [vmem:[%s7507_s11 + $0x40] sm:$0xff] }
 0x33a   : > { %4134 = vmatpush.msrb.mxu1 %v4119_v53  ;;  %v6619_v53 = vpop.f32.mrf.mxu0 }
 0x33b   : > { %4784 = vmatmul.msk.f32.gmra.mxu2 %vm770_vm0, %v6175_v30  ;;  %4815 = vmatmul.msk.f32.gmra.mxu3 %vm770_vm0, %v6147_v17 }
 0x33c   : > { %4879 = vmatmul.msk.f32.gmra.mxu1 %vm770_vm0, %v6188_v18 }
 0x33e   : > { %v1455_v34 = vpop.f32.mrf.mxu2  ;;  %v1661_v12 = vpop.f32.mrf.mxu3 }
 0x33f   : > { %v1662_v37 = vadd.f32 %v1661_v12, %v1452_v61  ;;  %v1584_v12 = vadd.f32 %v6227_v42, %v6203_v54  ;;  %v4118_v54 = vld [vmem:[%s7507_s11 + $0x38] sm:$0xff]  ;;  %v3125_v42 = vld [vmem:[#allocation6 + $0x1d0] sm:$0xff] }
 0x340   : > { %4135 = vmatpush.msrb.mxu1 %v4118_v54  ;;  %3240 = vmatpush.msrb.mxu2 %v3125_v42 }
 0x341   : > { %v1914_v56 = vpop.f32.mrf.mxu1  ;;  %v6529_v13 = vadd.f32 %v1911_v4, %v1662_v37 }
 0x343   : > { %4785 = vmatmul.msk.f32.gmra.mxu2 %vm770_vm0, %v6188_v18  ;;  %4816 = vmatmul.msk.f32.gmra.mxu3 %vm770_vm0, %v6160_v7  ;;  %v3408_v7 = vld [vmem:[#allocation6 + $0x218] sm:$0xff] }
 0x344   : > { %4880 = vmatmul.msk.f32.gmra.mxu1 %vm770_vm0, %v6201_v19  ;;  %3521 = vmatpush.msrb.mxu3 %v3408_v7 }
 0x346   : > { %v1458_v30 = vpop.f32.mrf.mxu2  ;;  %v1664_v17 = vpop.f32.mrf.mxu3 }
 0x347   : > { %v1665_v49 = vadd.f32 %v1664_v17, %v1455_v34 }
 0x349   : > { %v1917_v38 = vpop.f32.mrf.mxu1  ;;  %v6540_v32 = vadd.f32 %v1914_v56, %v1665_v49 }
 0x34b   : > { %4786 = vmatmul.msk.f32.gmra.mxu2 %vm770_vm0, %v6201_v19  ;;  %4817 = vmatmul.msk.f32.gmra.mxu3 %vm770_vm0, %v6173_v44 }
 0x34c   : > { %4881 = vmatmul.msk.f32.gmra.mxu1 %vm770_vm0, %v6218_v23 }
 0x34e   : > { %v1461_v18 = vpop.f32.mrf.mxu2  ;;  %v1667_v2 = vpop.f32.mrf.mxu3 }
 0x34f   : > { %v1668_v50 = vadd.f32 %v1667_v2, %v1458_v30 }
 0x351   : > { %v1920_v15 = vpop.f32.mrf.mxu1  ;;  %v6548_v43 = vadd.f32 %v1917_v38, %v1668_v50 }
 0x353   : > { %4787 = vmatmul.msk.f32.gmra.mxu2 %vm770_vm0, %v6218_v23  ;;  %4818 = vmatmul.msk.f32.gmra.mxu3 %vm770_vm0, %v6186_v35 }
 0x354   : > { %4882 = vmatmul.msk.f32.gmra.mxu1 %vm770_vm0, %v6231_v28 }
 0x356   : > { %v1464_v44 = vpop.f32.mrf.mxu2  ;;  %v1670_v19 = vpop.f32.mrf.mxu3 }
 0x357   : > { %v1671_v61 = vadd.f32 %v1670_v19, %v1461_v18 }
 0x359   : > { %v1923_v22 = vpop.f32.mrf.mxu1  ;;  %v6562_v4 = vadd.f32 %v1920_v15, %v1671_v61 }
 0x35b   : > { %4788 = vmatmul.msk.f32.gmra.mxu2 %vm770_vm0, %v6231_v28  ;;  %4819 = vmatmul.msk.f32.gmra.mxu3 %vm770_vm0, %v6199_v9  ;;  %v1929_v9 = vadd.f32 %v6212_v27, %v1584_v12 }
 0x35c   : > { %4883 = vmatmul.msk.f32.gmra.mxu1 %vm770_vm0, %v6243_v14 }
 0x35e   : > { %v1467_v23 = vpop.f32.mrf.mxu2  ;;  %v1673_v35 = vpop.f32.mrf.mxu3 }
 0x35f   : > { %v1674_v34 = vadd.f32 %v1673_v35, %v1464_v44 }
 0x361   : > { %v1926_v37 = vpop.f32.mrf.mxu1  ;;  %v6572_v56 = vadd.f32 %v1923_v22, %v1674_v34 }
 0x363   : > { %4789 = vmatmul.msk.f32.gmra.mxu2 %vm770_vm0, %v6243_v14  ;;  %4820 = vmatmul.msk.f32.gmra.mxu3 %vm770_vm0, %v6216_v63  ;;  %v3407_v14 = vld [vmem:[#allocation6 + $0x210] sm:$0xff] }
 0x364   : > { %4884 = vmatmul.msk.f32.gmra.mxu1 %vm770_vm0, %v6255_v45  ;;  %3522 = vmatpush.msrb.mxu3 %v3407_v14  ;;  %v7695_v14 = vld [vmem:[#allocation50_spill] sm:$0xff] }
 0x366   : > { %v1676_v28 = vpop.f32.mrf.mxu3  ;;  %v2115_v30 = vpop.f32.mrf.mxu2 }
 0x367   : > { %v1677_v17 = vadd.f32 %v1676_v28, %v1467_v23  ;;  %v2211_v49 = vadd.f32 %v2115_v30, %v1929_v9  ;;  %v3124_v28 = vld [vmem:[#allocation6 + $0x1c8] sm:$0xff] }
 0x368   : > { %3241 = vmatpush.msrb.mxu2 %v3124_v28  ;;  %v7693_v30 = vld [vmem:[#allocation49_spill] sm:$0xff] }
 0x369   : > { %v2962_v8 = vpop.f32.mrf.mxu1  ;;  %v6584_v38 = vadd.f32 %v1926_v37, %v1677_v17  ;;  %v7692_v37 = vld [vmem:[#allocation69_spill] sm:$0xff] }
 0x36b   : > { %4790 = vmatmul.msk.f32.gmra.mxu2 %vm770_vm0, %v6255_v45  ;;  %4821 = vmatmul.msk.f32.gmra.mxu3 %vm770_vm0, %v6229_v29 }
 0x36c   : > { %4885 = vmatmul.msk.f32.gmra.mxu1 %vm770_vm0, %v6267_v16 }
 0x36e   : > { %v2118_v63 = vpop.f32.mrf.mxu2  ;;  %v2397_v27 = vpop.f32.mrf.mxu3 }
 0x36f   : > { %v2212_v25 = vadd.f32 %v2118_v63, %v6239_v33  ;;  %v2493_v7 = vadd.f32 %v2397_v27, %v2211_v49  ;;  %v7694_v49 = vld [vmem:[#allocation56_spill] sm:$0xff] }
 0x371   : > { %v2775_v18 = vadd.f32 %v6323_v36, %v2493_v7  ;;  %v2965_v2 = vpop.f32.mrf.mxu1 }
 0x373   : > { %4791 = vmatmul.msk.f32.gmra.mxu2 %vm770_vm0, %v6267_v16  ;;  %4822 = vmatmul.msk.f32.gmra.mxu3 %vm770_vm0, %v6241_v24  ;;  %v6598_v45 = vadd.f32 %v2962_v8, %v2775_v18  ;;  %v4117_v16 = vld [vmem:[%s7507_s11 + $0x30] sm:$0xff]  ;;  %v3406_v8 = vld [vmem:[#allocation6 + $0x208] sm:$0xff] }
 0x374   : > { %4886 = vmatmul.msk.f32.gmra.mxu1 %vm770_vm0, %v6279_v6  ;;  %v3796_v24 = vld [vmem:[%s7506_s10 + $0x30] sm:$0xff]  ;;  %3523 = vmatpush.msrb.mxu3 %v3406_v8 }
 0x375   : > { %4136 = vmatpush.msrb.mxu1 %v4117_v16  ;;  %3903 = vmatpush.msrb.mxu0 %v3796_v24  ;;  %v4115_v24 = vld [vmem:[%s7507_s11 + $0x20] sm:$0xff] }
 0x376   : > { %v2121_v29 = vpop.f32.mrf.mxu2  ;;  %v2400_v50 = vpop.f32.mrf.mxu3 }
 0x377   : > { %v2213_v15 = vadd.f32 %v2121_v29, %v6251_v41  ;;  %v2494_v33 = vadd.f32 %v2400_v50, %v2212_v25 }
 0x379   : > { %v2776_v44 = vadd.f32 %v6337_v62, %v2494_v33  ;;  %v2968_v36 = vpop.f32.mrf.mxu1  ;;  %v7698_v33 = vld [vmem:[#allocation52_spill] sm:$0xff] }
 0x37b   : > { %4792 = vmatmul.msk.f32.gmra.mxu2 %vm770_vm0, %v6279_v6  ;;  %4823 = vmatmul.msk.f32.gmra.mxu3 %vm770_vm0, %v6253_v57  ;;  %v6614_v41 = vadd.f32 %v2965_v2, %v2776_v44  ;;  %v7697_v2 = vld [vmem:[#allocation59_spill] sm:$0xff] }
 0x37c   : > { %4887 = vmatmul.msk.f32.gmra.mxu1 %vm770_vm0, %v6291_v60 }
 0x37e   : > { %v2124_v62 = vpop.f32.mrf.mxu2  ;;  %v2403_v19 = vpop.f32.mrf.mxu3 }
 0x37f   : > { %v2214_v61 = vadd.f32 %v2124_v62, %v6263_v26  ;;  %v2495_v22 = vadd.f32 %v2403_v19, %v2213_v15  ;;  %v7691_v26 = vld [vmem:[#allocation48_spill] sm:$0xff]  ;;  %v3795_v62 = vld [vmem:[%s7506_s10 + $0x28] sm:$0xff]  ;;  %v7699_v19 = vld [vmem:[#allocation53_spill] sm:$0xff] }
 0x380   : > { %3904 = vmatpush.msrb.mxu0 %v3795_v62  ;;  %v7709_v62 = vld [vmem:[#allocation72_spill] sm:$0xff] }
 0x381   : > { %v2777_v0 = vadd.f32 %v6351_v47, %v2495_v22  ;;  %v2971_v23 = vpop.f32.mrf.mxu1 }
 0x383   : > { %4793 = vmatmul.msk.f32.gmra.mxu2 %vm770_vm0, %v6291_v60  ;;  %4824 = vmatmul.msk.f32.gmra.mxu3 %vm770_vm0, %v6265_v21  ;;  %v6626_v6 = vadd.f32 %v2968_v36, %v2777_v0  ;;  %v4116_v60 = vld [vmem:[%s7507_s11 + $0x28] sm:$0xff]  ;;  %v6635_v21 = vpop.f32.mrf.mxu0 }
 0x384   : > { %4888 = vmatmul.msk.f32.gmra.mxu1 %vm770_vm0, %v6303_v46 }
 0x385   : > { %4137 = vmatpush.msrb.mxu1 %v4116_v60 }
 0x386   : > { %v2127_v57 = vpop.f32.mrf.mxu2  ;;  %v2406_v35 = vpop.f32.mrf.mxu3 }
 0x387   : > { %v2215_v34 = vadd.f32 %v2127_v57, %v7691_v26  ;;  %v2496_v12 = vadd.f32 %v2406_v35, %v2214_v61  ;;  %4138 = vmatpush.msrb.mxu1 %v4115_v24  ;;  %v7701_v57 = vld [vmem:[#allocation54_spill] sm:$0xff] }
 0x389   : > { %v2778_v9 = vadd.f32 %v7692_v37, %v2496_v12  ;;  %v2974_v47 = vpop.f32.mrf.mxu1  ;;  %v7702_v37 = vld [vmem:[#allocation55_spill] sm:$0xff] }
 0x38b   : > { %4794 = vmatmul.msk.f32.gmra.mxu2 %vm770_vm0, %v6303_v46  ;;  %4825 = vmatmul.msk.f32.gmra.mxu3 %vm770_vm0, %v7693_v30  ;;  %v6641_v17 = vadd.f32 %v2971_v23, %v2778_v9  ;;  %v7696_v46 = vld [vmem:[#allocation51_spill] sm:$0xff]  ;;  %v6655_v29 = vpop.f32.mrf.mxu0  ;;  %v7704_v30 = vld [vmem:[#allocation57_spill] sm:$0xff] }
 0x38c   : > { %4889 = vmatmul.msk.f32.gmra.mxu1 %vm770_vm0, %v7694_v49 }
 0x38e   : > { %v2130_v54 = vpop.f32.mrf.mxu2  ;;  %v2409_v42 = vpop.f32.mrf.mxu3 }
 0x38f   : > { %v2216_v63 = vadd.f32 %v2130_v54, %v7695_v14  ;;  %v2497_v27 = vadd.f32 %v2409_v42, %v2215_v34  ;;  %v4114_v14 = vld [vmem:[%s7507_s11 + $0x18] sm:$0xff] }
 0x390   : > { %4139 = vmatpush.msrb.mxu1 %v4114_v14  ;;  %v7714_v14 = vld [vmem:[#allocation67_spill] sm:$0xff] }
 0x391   : > { %v2779_v25 = vadd.f32 %v6391_v51, %v2497_v27  ;;  %v2977_v7 = vpop.f32.mrf.mxu1  ;;  %v7705_v27 = vld [vmem:[#allocation58_spill] sm:$0xff] }
 0x393   : > { %4795 = vmatmul.msk.f32.gmra.mxu2 %vm770_vm0, %v7694_v49  ;;  %4826 = vmatmul.msk.f32.gmra.mxu3 %vm770_vm0, %v7696_v46  ;;  %v6651_v18 = vadd.f32 %v2974_v47, %v2779_v25  ;;  %v6673_v23 = vpop.f32.mrf.mxu0  ;;  %v7703_v47 = vld [vmem:[#allocation65_spill] sm:$0xff] }
 0x394   : > { %4890 = vmatmul.msk.f32.gmra.mxu1 %vm770_vm0, %v7697_v2 }
 0x396   : > { %v2133_v50 = vpop.f32.mrf.mxu2  ;;  %v2412_v15 = vpop.f32.mrf.mxu3 }
 0x397   : > { %v2217_v44 = vadd.f32 %v2133_v50, %v7698_v33  ;;  %v2498_v36 = vadd.f32 %v2412_v15, %v2216_v63  ;;  %v3123_v63 = vld [vmem:[#allocation6 + $0x1c0] sm:$0xff] }
 0x398   : > { %3242 = vmatpush.msrb.mxu2 %v3123_v63  ;;  %v7707_v50 = vld [vmem:[#allocation60_spill] sm:$0xff] }
 0x399   : > { %v2780_v51 = vadd.f32 %v6405_v39, %v2498_v36  ;;  %v2980_v16 = vpop.f32.mrf.mxu1  ;;  %v7700_v39 = vld [vmem:[#allocation62_spill] sm:$0xff] }
 0x39b   : > { %4796 = vmatmul.msk.f32.gmra.mxu2 %vm770_vm0, %v7697_v2  ;;  %4827 = vmatmul.msk.f32.gmra.mxu3 %vm770_vm0, %v7699_v19  ;;  %v6669_v61 = vadd.f32 %v2977_v7, %v2780_v51  ;;  %v6686_v54 = vpop.f32.mrf.mxu0  ;;  %v7706_v7 = vld [vmem:[#allocation68_spill] sm:$0xff] }
 0x39c   : > { %4891 = vmatmul.msk.f32.gmra.mxu1 %vm770_vm0, %v7700_v39 }
 0x39e   : > { %v2136_v22 = vpop.f32.mrf.mxu2  ;;  %v2415_v0 = vpop.f32.mrf.mxu3 }
 0x39f   : > { %v2218_v35 = vadd.f32 %v2136_v22, %v7701_v57  ;;  %v2499_v26 = vadd.f32 %v2415_v0, %v2217_v44  ;;  %v7710_v22 = vld [vmem:[#allocation63_spill] sm:$0xff] }
 0x3a1   : > { %v2781_v34 = vadd.f32 %v6422_v31, %v2499_v26  ;;  %v2983_v12 = vpop.f32.mrf.mxu1  ;;  %v4113_v26 = vld [vmem:[%s7507_s11 + $0x10] sm:$0xff] }
 0x3a2   : > { %4140 = vmatpush.msrb.mxu1 %v4113_v26 }
 0x3a3   : > { %4797 = vmatmul.msk.f32.gmra.mxu2 %vm770_vm0, %v7700_v39  ;;  %4828 = vmatmul.msk.f32.gmra.mxu3 %vm770_vm0, %v7702_v37  ;;  %v6681_v9 = vadd.f32 %v2980_v16, %v2781_v34  ;;  %v2718_v51 = vpop.f32.mrf.mxu0  ;;  %v7708_v16 = vld [vmem:[#allocation61_spill] sm:$0xff]  ;;  %v3794_v34 = vld [vmem:[%s7506_s10 + $0x20] sm:$0xff] }
 0x3a4   : > { %4892 = vmatmul.msk.f32.gmra.mxu1 %vm770_vm0, %v7703_v47  ;;  %3905 = vmatpush.msrb.mxu0 %v3794_v34  ;;  %v7719_v34 = vld [vmem:[#allocation74_spill] sm:$0xff] }
 0x3a6   : > { %v2139_v60 = vpop.f32.mrf.mxu2  ;;  %v2418_v28 = vpop.f32.mrf.mxu3 }
 0x3a7   : > { %v2219_v49 = vadd.f32 %v2139_v60, %v7704_v30  ;;  %v2500_v8 = vadd.f32 %v2418_v28, %v2218_v35  ;;  %v7713_v30 = vld [vmem:[#allocation66_spill] sm:$0xff] }
 0x3a9   : > { %v2782_v31 = vadd.f32 %v6437_v40, %v2500_v8  ;;  %v2986_v42 = vpop.f32.mrf.mxu1  ;;  %v3405_v40 = vld [vmem:[#allocation6 + $0x200] sm:$0xff] }
 0x3aa   : > { %3524 = vmatpush.msrb.mxu3 %v3405_v40 }
 0x3ab   : > { %4798 = vmatmul.msk.f32.gmra.mxu2 %vm770_vm0, %v7703_v47  ;;  %4829 = vmatmul.msk.f32.gmra.mxu3 %vm770_vm0, %v7705_v27  ;;  %v6696_v25 = vadd.f32 %v2983_v12, %v2782_v31  ;;  %v7711_v12 = vld [vmem:[#allocation64_spill] sm:$0xff]  ;;  %v2721_v47 = vpop.f32.mrf.mxu0  ;;  %v7715_v27 = vld [vmem:[#allocation77_spill] sm:$0xff] }
 0x3ac   : > { %4893 = vmatmul.msk.f32.gmra.mxu1 %vm770_vm0, %v7706_v7 }
 0x3ae   : > { %v2142_v46 = vpop.f32.mrf.mxu2  ;;  %v2421_v2 = vpop.f32.mrf.mxu3 }
 0x3af   : > { %v2220_v15 = vadd.f32 %v2142_v46, %v7707_v50  ;;  %v2501_v33 = vadd.f32 %v2421_v2, %v2219_v49  ;;  %v7716_v2 = vld [vmem:[#allocation70_spill] sm:$0xff] }
 0x3b1   : > { %v2783_v44 = vadd.f32 %v6619_v53, %v2501_v33  ;;  %v2989_v36 = vpop.f32.mrf.mxu1 }
 0x3b3   : > { %4799 = vmatmul.msk.f32.gmra.mxu2 %vm770_vm0, %v7706_v7  ;;  %4830 = vmatmul.msk.f32.gmra.mxu3 %vm770_vm0, %v7708_v16  ;;  %v6706_v24 = vadd.f32 %v2986_v42, %v2783_v44  ;;  %v2724_v46 = vpop.f32.mrf.mxu0  ;;  %v4112_v44 = vld [vmem:[%s7507_s11 + $0x8] sm:$0xff] }
 0x3b4   : > { %4894 = vmatmul.msk.f32.gmra.mxu1 %vm770_vm0, %v7709_v62  ;;  %v7717_v16 = vld [vmem:[#allocation71_spill] sm:$0xff] }
 0x3b5   : > { %4141 = vmatpush.msrb.mxu1 %v4112_v44  ;;  %v2839_v44 = vld [vmem:[#allocation2 + $0x1a0] sm:$0xff] }
 0x3b6   : > { %v2145_v19 = vpop.f32.mrf.mxu2  ;;  %v2424_v39 = vpop.f32.mrf.mxu3 }
 0x3b7   : > { %v2221_v0 = vadd.f32 %v2145_v19, %v7710_v22  ;;  %v2502_v57 = vadd.f32 %v2424_v39, %v2220_v15  ;;  %v7718_v22 = vld [vmem:[#allocation73_spill] sm:$0xff] }
 0x3b9   : > { %v2784_v53 = vadd.f32 %v6635_v21, %v2502_v57  ;;  %v2992_v35 = vpop.f32.mrf.mxu1  ;;  %v7712_v21 = vld [vmem:[#allocation75_spill] sm:$0xff] }
 0x3bb   : > { %4800 = vmatmul.msk.f32.gmra.mxu2 %vm770_vm0, %v7709_v62  ;;  %4831 = vmatmul.msk.f32.gmra.mxu3 %vm770_vm0, %v7711_v12  ;;  %v6722_v37 = vadd.f32 %v2989_v36, %v2784_v53  ;;  %v4111_v36 = vld [vmem:[%s7507_s11] sm:$0xff]  ;;  %v2727_v53 = vpop.f32.mrf.mxu0  ;;  %v2837_v12 = vld [vmem:[#allocation2 + $0x188] sm:$0xff] }
 0x3bc   : > { %4895 = vmatmul.msk.f32.gmra.mxu1 %vm770_vm0, %v7712_v21  ;;  %v2836_v62 = vld [vmem:[#allocation2 + $0x180] sm:$0xff] }
 0x3bd   : > { %4142 = vmatpush.msrb.mxu1 %v4111_v36  ;;  %v6772_v36 = vld [vmem:[#allocation2 + $0x189] sm:$0xff] }
 0x3be   : > { %v2148_v60 = vpop.f32.mrf.mxu2  ;;  %v2427_v28 = vpop.f32.mrf.mxu3 }
 0x3bf   : > { %v2222_v49 = vadd.f32 %v2148_v60, %v7713_v30  ;;  %v2503_v8 = vadd.f32 %v2427_v28, %v2221_v0  ;;  %v7720_v30 = vld [vmem:[#allocation76_spill] sm:$0xff] }
 0x3c1   : > { %v2785_v31 = vadd.f32 %v6655_v29, %v2503_v8  ;;  %v2995_v42 = vpop.f32.mrf.mxu1 }
 0x3c3   : > { %4801 = vmatmul.msk.f32.gmra.mxu2 %vm770_vm0, %v7712_v21  ;;  %4832 = vmatmul.msk.f32.gmra.mxu3 %vm770_vm0, %v7714_v14  ;;  %v6732_v63 = vadd.f32 %v2992_v35, %v2785_v31  ;;  %v2838_v14 = vld [vmem:[#allocation2 + $0x198] sm:$0xff] }
 0x3c4   : > { %4896 = vmatmul.msk.f32.gmra.mxu1 %vm770_vm0, %v7715_v27 }
 0x3c6   : > { %v2151_v7 = vpop.f32.mrf.mxu2  ;;  %v2430_v40 = vpop.f32.mrf.mxu3 }
 0x3c7   : > { %v2223_v50 = vadd.f32 %v2151_v7, %v7716_v2  ;;  %v2504_v15 = vadd.f32 %v2430_v40, %v2222_v49  ;;  %v2730_v7 = vpop.f32.mrf.mxu0 }
 0x3c9   : > { %v2786_v29 = vadd.f32 %v6673_v23, %v2504_v15  ;;  %v2998_v33 = vpop.f32.mrf.mxu1 }
 0x3cb   : > { %4802 = vmatmul.msk.f32.gmra.mxu2 %vm770_vm0, %v7715_v27  ;;  %4833 = vmatmul.msk.f32.gmra.mxu3 %vm770_vm0, %v7717_v16  ;;  %v6748_v19 = vadd.f32 %v2995_v42, %v2786_v29  ;;  %v6763_v27 = vld [vmem:[#allocation2 + $0x181] sm:$0xff]  ;;  %v3090_v16 = vld [vmem:[#allocation2 + $0x31] sm:$0xff] }
 0x3cc   : > { %4897 = vmatmul.msk.f32.gmra.mxu1 %vm770_vm0, %v2836_v62 }
 0x3ce   : > { %v2154_v23 = vpop.f32.mrf.mxu2  ;;  %v2433_v39 = vpop.f32.mrf.mxu3 }
 0x3cf   : > { %v2224_v0 = vadd.f32 %v2154_v23, %v7718_v22  ;;  %v2505_v57 = vadd.f32 %v2433_v39, %v2223_v50  ;;  %v2733_v23 = vpop.f32.mrf.mxu0 }
 0x3d1   : > { %v2787_v35 = vadd.f32 %v6686_v54, %v2505_v57  ;;  %v3001_v26 = vpop.f32.mrf.mxu1  ;;  %v3793_v54 = vld [vmem:[%s7506_s10 + $0x18] sm:$0xff] }
 0x3d2   : > { %3906 = vmatpush.msrb.mxu0 %v3793_v54 }
 0x3d3   : > { %4803 = vmatmul.msk.f32.gmra.mxu2 %vm770_vm0, %v2836_v62  ;;  %4834 = vmatmul.msk.f32.gmra.mxu3 %vm770_vm0, %v7719_v34  ;;  %v6756_v21 = vadd.f32 %v2998_v33, %v2787_v35  ;;  %v3091_v35 = vld [vmem:[#allocation2 + $0x39] sm:$0xff] }
 0x3d4   : > { %4898 = vmatmul.msk.f32.gmra.mxu1 %vm770_vm0, %v2837_v12 }
 0x3d6   : > { %v2157_v60 = vpop.f32.mrf.mxu2  ;;  %v2436_v28 = vpop.f32.mrf.mxu3 }
 0x3d7   : > { %v2225_v49 = vadd.f32 %v2157_v60, %v7720_v30  ;;  %v2506_v8 = vadd.f32 %v2436_v28, %v2224_v0  ;;  %v5095_v60 = vld [vmem:[%s7508_s12] ss:$0 sm:$0xff] }
 0x3d8   : > { %4240 = vrot.lane.b32.xlu0 %v5095_v60, %s5271_s22  ;;  %v3375_v60 = vld [vmem:[#allocation2 + $0x52] sm:$0xff] }
 0x3d9   : > { %v2788_v31 = vadd.f32 %v2718_v51, %v2506_v8  ;;  %v3004_v42 = vpop.f32.mrf.mxu1 }
 0x3db   : > { %4804 = vmatmul.msk.f32.gmra.mxu2 %vm770_vm0, %v2837_v12  ;;  %4835 = vmatmul.msk.f32.gmra.mxu3 %vm770_vm0, %v6763_v27  ;;  %v6768_v40 = vadd.f32 %v3001_v26, %v2788_v31  ;;  %v3372_v26 = vld [vmem:[#allocation2 + $0x32] sm:$0xff] }
 0x3dc   : > { %4899 = vmatmul.msk.f32.gmra.mxu1 %vm770_vm0, %v2838_v14  ;;  %v5099_v12 = vld [vmem:[%s5454_s9] sm:$0xff]  ;;  %v3373_v14 = vld [vmem:[#allocation2 + $0x3a] sm:$0xff] }
 0x3de   : > { %v2160_v51 = vpop.f32.mrf.mxu2  ;;  %v2439_v2 = vpop.f32.mrf.mxu3 }
 0x3df   : > { %v2226_v50 = vadd.f32 %v2160_v51, %v6420_v52  ;;  %v2507_v15 = vadd.f32 %v2439_v2, %v2225_v49  ;;  %v5100_v51 = vld [vmem:[%s5454_s9 + $0x8] sm:$0xff]  ;;  %v5096_v2 = vld [vmem:[%s7509_s13] ss:$0 sm:$0xff] }
 0x3e0   : > { %4275 = vrot.lane.b32.xlu0 %v5096_v2, %s5271_s22 }
 0x3e1   : > { %v2789_v29 = vadd.f32 %v2721_v47, %v2507_v15  ;;  %v3007_v33 = vpop.f32.mrf.mxu1 }
 0x3e3   : > { %4836 = vmatmul.msk.f32.gmra.mxu3 %vm770_vm0, %v6772_v36  ;;  %4901 = vmatmul.msk.f32.vlgmr.msrb.gmra.mxu2 %vm770_vm0, %v3090_v16  ;;  %v6777_v62 = vadd.f32 %v3004_v42, %v2789_v29  ;;  %v3092_v42 = vld [vmem:[#allocation2 + $0x49] sm:$0xff] }
 0x3e4   : > { %4900 = vmatmul.msk.f32.gmra.mxu1 %vm770_vm0, %v2839_v44  ;;  %v3792_v16 = vld [vmem:[%s7506_s10 + $0x10] sm:$0xff] }
 0x3e5   : > { %3907 = vmatpush.msrb.mxu0 %v3792_v16  ;;  %v3096_v16 = vld [vmem:[#allocation2 + $0x79] sm:$0xff] }
 0x3e6   : > { %v2163_v39 = vpop.f32.mrf.mxu2  ;;  %v2442_v52 = vpop.f32.mrf.mxu3 }
 0x3e7   : > { %v2227_v47 = vadd.f32 %v2163_v39, %v6431_v1  ;;  %v2508_v22 = vadd.f32 %v2442_v52, %v2226_v50  ;;  %v3093_v39 = vld [vmem:[#allocation2 + $0x51] sm:$0xff] }
 0x3e8   : > { %v3374_v52 = vld [vmem:[#allocation2 + $0x4a] sm:$0xff] }
 0x3e9   : > { %v2790_v0 = vadd.f32 %v2724_v46, %v2508_v22  ;;  %v3010_v57 = vpop.f32.mrf.mxu1  ;;  %v2736_v46 = vpop.f32.mrf.mxu0  ;;  %v5101_v22 = vld [vmem:[%s5454_s9 + $0x10] sm:$0xff] }
 0x3eb   : > { %4902 = vmatmul.msk.f32.gmra.mxu2 %vm770_vm0, %v3091_v35  ;;  %4933 = vmatmul.msk.f32.vlgmr.msrb.gmra.mxu3 %vm770_vm0, %v3372_v26  ;;  %v6783_v34 = vadd.f32 %v3007_v33, %v2790_v0 }
 0x3ec   : > { %4143 = vmatmul.f32.vlgmr.msrb.gmra.mxu1 %v5099_v12  ;;  %v3094_v12 = vld [vmem:[#allocation2 + $0x61] sm:$0xff] }
 0x3ee   : > { %v2166_v28 = vpop.f32.mrf.mxu2  ;;  %v2445_v1 = vpop.f32.mrf.mxu3 }
 0x3ef   : > { %v2228_v30 = vadd.f32 %v2166_v28, %v6445_v58  ;;  %v2509_v49 = vadd.f32 %v2445_v1, %v2227_v47 }
 0x3f1   : > { %v2791_v8 = vadd.f32 %v2727_v53, %v2509_v49  ;;  %v3013_v31 = vpop.f32.mrf.mxu1  ;;  %v2739_v29 = vpop.f32.mrf.mxu0 }
 0x3f3   : > { %4903 = vmatmul.msk.f32.gmra.mxu2 %vm770_vm0, %v3092_v42  ;;  %4934 = vmatmul.msk.f32.gmra.mxu3 %vm770_vm0, %v3373_v14  ;;  %v6793_v54 = vadd.f32 %v3010_v57, %v2791_v8  ;;  %v3095_v14 = vld [vmem:[#allocation2 + $0x69] sm:$0xff] }
 0x3f4   : > { %4146 = vmatmul.f32.gmra.mxu1 %v5100_v51  ;;  %v3376_v51 = vld [vmem:[#allocation2 + $0x62] sm:$0xff] }
 0x3f6   : > { %v2169_v50 = vpop.f32.mrf.mxu2  ;;  %v2448_v58 = vpop.f32.mrf.mxu3 }
 0x3f7   : > { %v2229_v53 = vadd.f32 %v2169_v50, %v6453_v59  ;;  %v2510_v15 = vadd.f32 %v2448_v58, %v2228_v30  ;;  %v5102_v30 = vld [vmem:[%s5454_s9 + $0x18] sm:$0xff]  ;;  %v5103_v50 = vld [vmem:[%s5454_s9 + $0x20] sm:$0xff] }
 0x3f9   : > { %v2792_v33 = vadd.f32 %v2730_v7, %v2510_v15  ;;  %v3016_v44 = vpop.f32.mrf.mxu1  ;;  %v2742_v28 = vpop.f32.mrf.mxu0 }
 0x3fb   : > { %4904 = vmatmul.msk.f32.gmra.mxu2 %vm770_vm0, %v3093_v39  ;;  %4935 = vmatmul.msk.f32.gmra.mxu3 %vm770_vm0, %v3374_v52  ;;  %v6806_v47 = vadd.f32 %v3013_v31, %v2792_v33  ;;  %v3377_v39 = vld [vmem:[#allocation2 + $0x6a] sm:$0xff] }
 0x3fc   : > { %4149 = vmatmul.f32.gmra.mxu1 %v5101_v22  ;;  %v5104_v22 = vld [vmem:[%s5454_s9 + $0x28] sm:$0xff] }
 0x3fe   : > { %v2172_v59 = vpop.f32.mrf.mxu2  ;;  %v2451_v0 = vpop.f32.mrf.mxu3 }
 0x3ff   : > { %v2230_v7 = vadd.f32 %v2172_v59, %v6464_v55  ;;  %v2511_v57 = vadd.f32 %v2451_v0, %v2229_v53 }
 0x401   : > { %v2793_v35 = vadd.f32 %v2733_v23, %v2511_v57  ;;  %v3019_v26 = vpop.f32.mrf.mxu1  ;;  %v2745_v58 = vpop.f32.mrf.mxu0 }
 0x403   : > { %4905 = vmatmul.msk.f32.gmra.mxu2 %vm770_vm0, %v3094_v12  ;;  %4936 = vmatmul.msk.f32.gmra.mxu3 %vm770_vm0, %v3375_v60  ;;  %v6812_v1 = vadd.f32 %v3016_v44, %v2793_v35  ;;  %v3097_v12 = vld [vmem:[#allocation2 + $0x81] sm:$0xff] }
 0x404   : > { %4152 = vmatmul.f32.gmra.mxu1 %v5102_v30  ;;  %v3378_v60 = vld [vmem:[#allocation2 + $0x7a] sm:$0xff] }
 0x406   : > { %v2175_v49 = vpop.f32.mrf.mxu2  ;;  %v2454_v8 = vpop.f32.mrf.mxu3 }
 0x407   : > { %v2231_v31 = vadd.f32 %v2175_v49, %v6472_v11  ;;  %v2512_v55 = vadd.f32 %v2454_v8, %v2230_v7  ;;  %v5105_v49 = vld [vmem:[%s5454_s9 + $0x30] sm:$0xff] }
 0x409   : > { %v2794_v42 = vadd.f32 %v2736_v46, %v2512_v55  ;;  %v3022_v23 = vpop.f32.mrf.mxu1  ;;  %v2748_v7 = vpop.f32.mrf.mxu0 }
 0x40b   : > { %4906 = vmatmul.msk.f32.gmra.mxu2 %vm770_vm0, %v3095_v14  ;;  %4937 = vmatmul.msk.f32.gmra.mxu3 %vm770_vm0, %v3376_v51  ;;  %v6818_v2 = vadd.f32 %v3019_v26, %v2794_v42  ;;  %v3791_v26 = vld [vmem:[%s7506_s10 + $0x8] sm:$0xff]  ;;  %v3098_v14 = vld [vmem:[#allocation2 + $0x91] sm:$0xff] }
 0x40c   : > { %4155 = vmatmul.f32.gmra.mxu1 %v5103_v50  ;;  %3908 = vmatpush.msrb.mxu0 %v3791_v26  ;;  %v3379_v51 = vld [vmem:[#allocation2 + $0x82] sm:$0xff]  ;;  %v3381_v26 = vld [vmem:[#allocation2 + $0x9a] sm:$0xff] }
 0x40e   : > { %v2178_v53 = vpop.f32.mrf.mxu2  ;;  %v2457_v15 = vpop.f32.mrf.mxu3 }
 0x40f   : > { %v2232_v33 = vadd.f32 %v2178_v53, %v6483_v3  ;;  %v2513_v11 = vadd.f32 %v2457_v15, %v2231_v31  ;;  %v5106_v53 = vld [vmem:[%s5454_s9 + $0x38] sm:$0xff] }
 0x411   : > { %v2795_v44 = vadd.f32 %v2739_v29, %v2513_v11  ;;  %v3025_v46 = vpop.f32.mrf.mxu1  ;;  %v2751_v55 = vpop.f32.mrf.mxu0 }
 0x413   : > { %4907 = vmatmul.msk.f32.gmra.mxu2 %vm770_vm0, %v3096_v16  ;;  %4938 = vmatmul.msk.f32.gmra.mxu3 %vm770_vm0, %v3377_v39  ;;  %v6824_v52 = vadd.f32 %v3022_v23, %v2795_v44  ;;  %v3380_v16 = vld [vmem:[#allocation2 + $0x92] sm:$0xff] }
 0x414   : > { %4158 = vmatmul.f32.gmra.mxu1 %v5104_v22 }
 0x416   : > { %v2181_v59 = vpop.f32.mrf.mxu2  ;;  %v2460_v0 = vpop.f32.mrf.mxu3 }
 0x417   : > { %v2233_v57 = vadd.f32 %v2181_v59, %v6491_v48  ;;  %v2514_v3 = vadd.f32 %v2460_v0, %v2232_v33  ;;  %v5107_v59 = vld [vmem:[%s5454_s9 + $0x40] sm:$0xff] }
 0x419   : > { %v2796_v35 = vadd.f32 %v2742_v28, %v2514_v3  ;;  %v3028_v29 = vpop.f32.mrf.mxu1  ;;  %v2754_v39 = vpop.f32.mrf.mxu0 }
 0x41b   : > { %4908 = vmatmul.msk.f32.gmra.mxu2 %vm770_vm0, %v3097_v12  ;;  %4939 = vmatmul.msk.f32.gmra.mxu3 %vm770_vm0, %v3378_v60  ;;  %v6833_v30 = vadd.f32 %v3025_v46, %v2796_v35  ;;  %v5108_v60 = vld [vmem:[%s5454_s9 + $0x48] sm:$0xff] }
 0x41c   : > { %4161 = vmatmul.f32.gmra.mxu1 %v5105_v49 }
 0x41e   : > { %v2184_v48 = vpop.f32.mrf.mxu2  ;;  %v2463_v8 = vpop.f32.mrf.mxu3 }
 0x41f   : > { %v2234_v28 = vadd.f32 %v2184_v48, %v6502_v5  ;;  %v2515_v31 = vadd.f32 %v2463_v8, %v2233_v57 }
 0x421   : > { %v2797_v42 = vadd.f32 %v2745_v58, %v2515_v31  ;;  %v3031_v23 = vpop.f32.mrf.mxu1  ;;  %v3099_v58 = vld [vmem:[#allocation2 + $0x99] sm:$0xff]  ;;  %v2757_v49 = vpop.f32.mrf.mxu0 }
 0x423   : > { %4909 = vmatmul.msk.f32.gmra.mxu2 %vm770_vm0, %v3098_v14  ;;  %4940 = vmatmul.msk.f32.gmra.mxu3 %vm770_vm0, %v3379_v51  ;;  %v6839_v50 = vadd.f32 %v3028_v29, %v2797_v42  ;;  %v3100_v29 = vld [vmem:[#allocation2 + $0xa9] sm:$0xff]  ;;  %v3790_v42 = vld [vmem:[%s7506_s10] sm:$0xff] }
 0x424   : > { %4164 = vmatmul.f32.gmra.mxu1 %v5106_v53  ;;  %v3382_v14 = vld [vmem:[#allocation2 + $0xaa] sm:$0xff]  ;;  %3909 = vmatpush.msrb.mxu0 %v3790_v42  ;;  %v5109_v53 = vld [vmem:[%s5454_s9 + $0x50] sm:$0xff] }
 0x425   : > { %v3385_v42 = vld [vmem:[#allocation2 + $0xca] sm:$0xff] }
 0x426   : > { %v2187_v15 = vpop.f32.mrf.mxu2  ;;  %v2466_v33 = vpop.f32.mrf.mxu3 }
 0x427   : > { %v2235_v11 = vadd.f32 %v2187_v15, %v6510_v10  ;;  %v2516_v5 = vadd.f32 %v2466_v33, %v2234_v28 }
 0x429   : > { %v2798_v44 = vadd.f32 %v2748_v7, %v2516_v5  ;;  %v3034_v46 = vpop.f32.mrf.mxu1  ;;  %v2760_v33 = vpop.f32.mrf.mxu0 }
 0x42b   : > { %4910 = vmatmul.msk.f32.gmra.mxu2 %vm770_vm0, %v3099_v58  ;;  %4941 = vmatmul.msk.f32.gmra.mxu3 %vm770_vm0, %v3380_v16  ;;  %v6845_v22 = vadd.f32 %v3031_v23, %v2798_v44  ;;  %v3101_v23 = vld [vmem:[#allocation2 + $0xb1] sm:$0xff]  ;;  %v3102_v58 = vld [vmem:[#allocation2 + $0xc1] sm:$0xff] }
 0x42c   : > { %4167 = vmatmul.f32.gmra.mxu1 %v5107_v59  ;;  %v3383_v16 = vld [vmem:[#allocation2 + $0xb2] sm:$0xff]  ;;  %v5110_v59 = vld [vmem:[%s5454_s9 + $0x58] sm:$0xff] }
 0x42e   : > { %v2190_v0 = vpop.f32.mrf.mxu2  ;;  %v2469_v57 = vpop.f32.mrf.mxu3 }
 0x42f   : > { %v2236_v3 = vadd.f32 %v2190_v0, %v6521_v20  ;;  %v2517_v10 = vadd.f32 %v2469_v57, %v2235_v11 }
 0x431   : > { %v2799_v35 = vadd.f32 %v2751_v55, %v2517_v10  ;;  %v3037_v7 = vpop.f32.mrf.mxu1 }
 0x433   : > { %4911 = vmatmul.msk.f32.gmra.mxu2 %vm770_vm0, %v3100_v29  ;;  %4942 = vmatmul.msk.f32.gmra.mxu3 %vm770_vm0, %v3381_v26  ;;  %v6851_v12 = vadd.f32 %v3034_v46, %v2799_v35  ;;  %v3103_v29 = vld [vmem:[#allocation2 + $0xc9] sm:$0xff] }
 0x434   : > { %4170 = vmatmul.f32.gmra.mxu1 %v5108_v60  ;;  %v3384_v26 = vld [vmem:[#allocation2 + $0xc2] sm:$0xff] }
 0x436   : > { %v2193_v48 = vpop.f32.mrf.mxu2  ;;  %v2472_v8 = vpop.f32.mrf.mxu3 }
 0x437   : > { %v2237_v28 = vadd.f32 %v2193_v48, %v6529_v13  ;;  %v2518_v20 = vadd.f32 %v2472_v8, %v2236_v3 }
 0x439   : > { %v2800_v31 = vadd.f32 %v2754_v39, %v2518_v20  ;;  %v3040_v55 = vpop.f32.mrf.mxu1 }
 0x43b   : > { %4912 = vmatmul.msk.f32.gmra.mxu2 %vm770_vm0, %v3101_v23  ;;  %4943 = vmatmul.msk.f32.gmra.mxu3 %vm770_vm0, %v3382_v14  ;;  %v6860_v51 = vadd.f32 %v3037_v7, %v2800_v31 }
 0x43c   : > { %4173 = vmatmul.f32.gmra.mxu1 %v5109_v53  ;;  %v5112_v53 = vld [vmem:[%s5454_s9 + $0x68] sm:$0xff] }
 0x43e   : > { %v2196_v13 = vpop.f32.mrf.mxu2  ;;  %v2475_v15 = vpop.f32.mrf.mxu3 }
 0x43f   : > { %v2238_v11 = vadd.f32 %v2196_v13, %v6540_v32  ;;  %v2519_v5 = vadd.f32 %v2475_v15, %v2237_v28  ;;  %v2763_v32 = vpop.f32.mrf.mxu0 }
 0x441   : > { %v2801_v44 = vadd.f32 %v2757_v49, %v2519_v5  ;;  %v3043_v46 = vpop.f32.mrf.mxu1  ;;  %v5111_v49 = vld [vmem:[%s5454_s9 + $0x60] sm:$0xff] }
 0x443   : > { %4913 = vmatmul.msk.f32.gmra.mxu2 %vm770_vm0, %v3102_v58  ;;  %4944 = vmatmul.msk.f32.gmra.mxu3 %vm770_vm0, %v3383_v16  ;;  %v6866_v39 = vadd.f32 %v3040_v55, %v2801_v44  ;;  %v3104_v55 = vld [vmem:[#allocation2 + $0xd9] sm:$0xff]  ;;  %v3105_v44 = vld [vmem:[#allocation2 + $0xe1] sm:$0xff] }
 0x444   : > { %4176 = vmatmul.f32.gmra.mxu1 %v5110_v59  ;;  %v5113_v16 = vld [vmem:[%s5454_s9 + $0x70] sm:$0xff] }
 0x446   : > { %v2199_v0 = vpop.f32.mrf.mxu2  ;;  %v2478_v57 = vpop.f32.mrf.mxu3 }
 0x447   : > { %v2239_v3 = vadd.f32 %v2199_v0, %v6548_v43  ;;  %v2520_v10 = vadd.f32 %v2478_v57, %v2238_v11  ;;  %v2766_v23 = vpop.f32.mrf.mxu0 }
 0x449   : > { %v2802_v35 = vadd.f32 %v2760_v33, %v2520_v10  ;;  %v3046_v7 = vpop.f32.mrf.mxu1 }
 0x44b   : > { %4914 = vmatmul.msk.f32.gmra.mxu2 %vm770_vm0, %v3103_v29  ;;  %4945 = vmatmul.msk.f32.gmra.mxu3 %vm770_vm0, %v3384_v26  ;;  %v6872_v60 = vadd.f32 %v3043_v46, %v2802_v35  ;;  %v3386_v46 = vld [vmem:[#allocation2 + $0xda] sm:$0xff]  ;;  %v3106_v35 = vld [vmem:[#allocation2 + $0xf1] sm:$0xff]  ;;  %v6888_v29 = vpop.permute.xlu0 %4240 }
 0x44c   : > { %4179 = vmatmul.f32.gmra.mxu1 %v5111_v49  ;;  %v5114_v49 = vld [vmem:[%s5454_s9 + $0x78] sm:$0xff] }
 0x44e   : > { %v2202_v48 = vpop.f32.mrf.mxu2  ;;  %v2481_v8 = vpop.f32.mrf.mxu3 }
 0x44f   : > { %v2240_v28 = vadd.f32 %v2202_v48, %v6562_v4  ;;  %v2521_v43 = vadd.f32 %v2481_v8, %v2239_v3  ;;  %v2769_v59 = vpop.f32.mrf.mxu0 }
 0x451   : > { %v2803_v20 = vadd.f32 %v2763_v32, %v2521_v43  ;;  %v3049_v31 = vpop.f32.mrf.mxu1 }
 0x453   : > { %4915 = vmatmul.msk.f32.gmra.mxu2 %vm770_vm0, %v3104_v55  ;;  %4946 = vmatmul.msk.f32.gmra.mxu3 %vm770_vm0, %v3385_v42  ;;  %v6878_v14 = vadd.f32 %v3046_v7, %v2803_v20  ;;  %v3387_v7 = vld [vmem:[#allocation2 + $0xe2] sm:$0xff]  ;;  %v3388_v55 = vld [vmem:[#allocation2 + $0xf2] sm:$0xff] }
 0x454   : > { %4182 = vmatmul.f32.gmra.mxu1 %v5112_v53  ;;  %v6900_v53 = vpop.permute.xlu0 %4275 }
 0x456   : > { %v2205_v13 = vpop.f32.mrf.mxu2  ;;  %v2484_v15 = vpop.f32.mrf.mxu3 }
 0x457   : > { %v2241_v33 = vadd.f32 %v2205_v13, %v6572_v56  ;;  %v2522_v4 = vadd.f32 %v2484_v15, %v2240_v28  ;;  %v6906_v15 = vld [vmem:[%s7721_s26] ss:$0 sm:$0xff] }
 0x459   : > { %v2804_v11 = vadd.f32 %v2766_v23, %v2522_v4  ;;  %v3052_v5 = vpop.f32.mrf.mxu1  ;;  %v5115_v23 = vld [vmem:[%s5454_s9 + $0x80] sm:$0xff] }
 0x45b   : > { %4916 = vmatmul.msk.f32.gmra.mxu2 %vm770_vm0, %v3105_v44  ;;  %4947 = vmatmul.msk.f32.gmra.mxu3 %vm770_vm0, %v3386_v46  ;;  %v6884_v58 = vadd.f32 %v3049_v31, %v2804_v11  ;;  %v3107_v31 = vld [vmem:[#allocation2 + $0xf9] sm:$0xff] }
 0x45c   : > { %4185 = vmatmul.f32.gmra.mxu1 %v5113_v16  ;;  %v6912_v44 = vld [vmem:[%s7722_s29] ss:$0 sm:$0xff] }
 0x45e   : > { %v2208_v0 = vpop.f32.mrf.mxu2  ;;  %v2487_v57 = vpop.f32.mrf.mxu3 }
 0x45f   : > { %v2242_v3 = vadd.f32 %v2208_v0, %v6584_v38  ;;  %v2523_v56 = vadd.f32 %v2487_v57, %v2241_v33  ;;  %v2772_v38 = vpop.f32.mrf.mxu0  ;;  %v3108_v0 = vld [vmem:[#allocation2 + $0x109] sm:$0xff]  ;;  %v3389_v57 = vld [vmem:[#allocation2 + $0xfa] sm:$0xff] }
 0x461   : > { %v2805_v10 = vadd.f32 %v2769_v59, %v2523_v56  ;;  %v3055_v32 = vpop.f32.mrf.mxu1  ;;  %v5116_v56 = vld [vmem:[%s5454_s9 + $0x88] sm:$0xff] }
 0x463   : > { %4917 = vmatmul.msk.f32.gmra.mxu2 %vm770_vm0, %v3106_v35  ;;  %4948 = vmatmul.msk.f32.gmra.mxu3 %vm770_vm0, %v3387_v7  ;;  %v6892_v26 = vadd.f32 %v3052_v5, %v2805_v10 }
 0x464   : > { %4188 = vmatmul.f32.gmra.mxu1 %v5114_v49 }
 0x466   : > { %v2490_v48 = vpop.f32.mrf.mxu3  ;;  %v3244_v8 = vpop.f32.mrf.mxu2 }
 0x467   : > { %v2524_v28 = vadd.f32 %v2490_v48, %v2242_v3  ;;  %v3340_v13 = vadd.f32 %v3244_v8, %v6598_v45  ;;  %v7724_v48 = vld [vmem:[#allocation27_spill] sm:$0xff] }
 0x468   : > { %v7725_v8 = vmax.f32 %v7724_v48, 0.0  ;;  %v5118_v48 = vld [vmem:[%s5454_s9 + $0x98] sm:$0xff] }
 0x469   : > { %v2806_v43 = vadd.f32 %v2772_v38, %v2524_v28  ;;  %v4144_v20 = vpop.f32.mrf.mxu1 }
 0x46a   : > { %v4243_v33 = vmul.f32 %v6888_v29, %v4144_v20 }
 0x46b   : > { %4918 = vmatmul.msk.f32.gmra.mxu2 %vm770_vm0, %v3107_v31  ;;  %4949 = vmatmul.msk.f32.gmra.mxu3 %vm770_vm0, %v3388_v55  ;;  %v6897_v42 = vadd.f32 %v3055_v32, %v2806_v43 }
 0x46c   : > { %4191 = vmatmul.f32.gmra.mxu1 %v5115_v23  ;;  %v4278_v46 = vadd.f32 %v6900_v53, %v4243_v33  ;;  %v3109_v23 = vld [vmem:[#allocation2 + $0x111] sm:$0xff]  ;;  %v5117_v33 = vld [vmem:[%s5454_s9 + $0x90] sm:$0xff] }
 0x46e   : > { %v3247_v4 = vpop.f32.mrf.mxu2  ;;  %v3526_v11 = vpop.f32.mrf.mxu3  ;;  %v4310_v59 = vmax.f32 %v4278_v46, 0.0 }
 0x46f   : > { %v3622_v5 = vadd.f32 %v3526_v11, %v3340_v13  ;;  %v3341_v10 = vadd.f32 %v3247_v4, %v6614_v41  ;;  %v3390_v41 = vld [vmem:[#allocation2 + $0x10a] sm:$0xff] }
 0x470   : > { %4406 = vrot.lane.b32.xlu1 %v4310_v59, %s5271_s22  ;;  %v7726_v59 = vld [vmem:[#allocation29_spill] sm:$0xff] }
 0x471   : > { %v3658_v45 = vmul.f32 %v6906_v15, %v3622_v5  ;;  %v4147_v16 = vpop.f32.mrf.mxu1 }
 0x472   : > { %v4244_v35 = vmul.f32 %v6888_v29, %v4147_v16 }
 0x473   : > { %v3694_v3 = vadd.f32 %v6912_v44, %v3658_v45  ;;  %4919 = vmatmul.msk.f32.gmra.mxu2 %vm770_vm0, %v3108_v0  ;;  %4950 = vmatmul.msk.f32.gmra.mxu3 %vm770_vm0, %v3389_v57  ;;  %v7727_v0 = vmax.f32 %v7726_v59, 0.0 }
 0x474   : > { %4194 = vmatmul.f32.gmra.mxu1 %v5116_v56  ;;  %v4279_v43 = vadd.f32 %v6900_v53, %v4244_v35  ;;  %v3110_v35 = vld [vmem:[#allocation2 + $0x121] sm:$0xff] }
 0x475   : > { %v3726_v32 = vmax.f32 %v3694_v3, 0.0 }
 0x476   : > { %v3250_v7 = vpop.f32.mrf.mxu2  ;;  %v3529_v49 = vpop.f32.mrf.mxu3  ;;  %v4311_v55 = vmax.f32 %v4279_v43, 0.0 }
 0x477   : > { %v3758_v28 = vadd.f32 %v3726_v32, %v7725_v8  ;;  %v3623_v38 = vadd.f32 %v3529_v49, %v3341_v10  ;;  %v3342_v4 = vadd.f32 %v3250_v7, %v6626_v6  ;;  %v3391_v7 = vld [vmem:[#allocation2 + $0x112] sm:$0xff] }
 0x478   : > { %4408 = vrot.lane.b32.xlu1 %v4311_v55, %s5271_s22  ;;  %v7728_v55 = vld [vmem:[#allocation31_spill] sm:$0xff] }
 0x479   : > { %v3659_v20 = vmul.f32 %v6906_v15, %v3623_v38  ;;  %v4150_v31 = vpop.f32.mrf.mxu1  ;;  %4965 = vmatmul.msk.f32.vlgmr.msrb.gmra.mxu0 %vm770_vm0, %v3758_v28 }
 0x47a   : > { %v4245_v5 = vmul.f32 %v6888_v29, %v4150_v31 }
 0x47b   : > { %v3695_v13 = vadd.f32 %v6912_v44, %v3659_v20  ;;  %4920 = vmatmul.msk.f32.gmra.mxu2 %vm770_vm0, %v3109_v23  ;;  %4951 = vmatmul.msk.f32.gmra.mxu3 %vm770_vm0, %v3390_v41  ;;  %v7729_v23 = vmax.f32 %v7728_v55, 0.0 }
 0x47c   : > { %4197 = vmatmul.f32.gmra.mxu1 %v5117_v33  ;;  %v4280_v3 = vadd.f32 %v6900_v53, %v4245_v5  ;;  %v3111_v5 = vld [vmem:[#allocation2 + $0x129] sm:$0xff] }
 0x47d   : > { %v3727_v11 = vmax.f32 %v3695_v13, 0.0 }
 0x47e   : > { %v3253_v46 = vpop.f32.mrf.mxu2  ;;  %v3532_v45 = vpop.f32.mrf.mxu3  ;;  %v4312_v32 = vmax.f32 %v4280_v3, 0.0 }
 0x47f   : > { %v3624_v16 = vadd.f32 %v3532_v45, %v3342_v4  ;;  %v3759_v57 = vadd.f32 %v3727_v11, %v7727_v0  ;;  %v3343_v8 = vadd.f32 %v3253_v46, %v6641_v17  ;;  %v3392_v17 = vld [vmem:[#allocation2 + $0x122] sm:$0xff] }
 0x480   : > { %4410 = vrot.lane.b32.xlu2 %v4312_v32, %s5271_s22  ;;  %v7730_v32 = vld [vmem:[#allocation33_spill] sm:$0xff] }
 0x481   : > { %v3660_v56 = vmul.f32 %v6906_v15, %v3624_v16  ;;  %v4153_v10 = vpop.f32.mrf.mxu1  ;;  %4966 = vmatmul.msk.f32.gmra.mxu0 %vm770_vm0, %v3759_v57  ;;  %v5119_v16 = vld [vmem:[%s5454_s9 + $0xa0] sm:$0xff] }
 0x482   : > { %v4246_v6 = vmul.f32 %v6888_v29, %v4153_v10 }
 0x483   : > { %v3696_v49 = vadd.f32 %v6912_v44, %v3660_v56  ;;  %4921 = vmatmul.msk.f32.gmra.mxu2 %vm770_vm0, %v3110_v35  ;;  %4952 = vmatmul.msk.f32.gmra.mxu3 %vm770_vm0, %v3391_v7 }
 0x484   : > { %4200 = vmatmul.f32.gmra.mxu1 %v5118_v48  ;;  %v4281_v38 = vadd.f32 %v6900_v53, %v4246_v6  ;;  %v7731_v6 = vmax.f32 %v7730_v32, 0.0 }
 0x485   : > { %v3728_v28 = vmax.f32 %v3696_v49, 0.0 }
 0x486   : > { %v3256_v43 = vpop.f32.mrf.mxu2  ;;  %v3535_v20 = vpop.f32.mrf.mxu3  ;;  %v4313_v13 = vmax.f32 %v4281_v38, 0.0 }
 0x487   : > { %v3625_v31 = vadd.f32 %v3535_v20, %v3343_v8  ;;  %v3760_v41 = vadd.f32 %v3728_v28, %v7729_v23  ;;  %v3344_v59 = vadd.f32 %v3256_v43, %v6651_v18  ;;  %v3112_v8 = vld [vmem:[#allocation2 + $0x139] sm:$0xff]  ;;  %v3393_v18 = vld [vmem:[#allocation2 + $0x12a] sm:$0xff] }
 0x488   : > { %4412 = vrot.lane.b32.xlu2 %v4313_v13, %s5271_s22  ;;  %v5120_v43 = vld [vmem:[%s5454_s9 + $0xa8] sm:$0xff]  ;;  %v7732_v13 = vld [vmem:[#allocation35_spill] sm:$0xff] }
 0x489   : > { %v3661_v33 = vmul.f32 %v6906_v15, %v3625_v31  ;;  %v4156_v4 = vpop.f32.mrf.mxu1  ;;  %4967 = vmatmul.msk.f32.gmra.mxu0 %vm770_vm0, %v3760_v41 }
 0x48a   : > { %v4247_v11 = vmul.f32 %v6888_v29, %v4156_v4 }
 0x48b   : > { %v3697_v46 = vadd.f32 %v6912_v44, %v3661_v33  ;;  %4922 = vmatmul.msk.f32.gmra.mxu2 %vm770_vm0, %v3111_v5  ;;  %4953 = vmatmul.msk.f32.gmra.mxu3 %vm770_vm0, %v3392_v17  ;;  %v7733_v33 = vmax.f32 %v7732_v13, 0.0 }
 0x48c   : > { %v4282_v45 = vadd.f32 %v6900_v53, %v4247_v11  ;;  %4203 = vmatmul.f32.gmra.mxu1 %v5119_v16 }
 0x48d   : > { %v3729_v0 = vmax.f32 %v3697_v46, 0.0 }
 0x48e   : > { %v3259_v57 = vpop.f32.mrf.mxu2  ;;  %v3538_v3 = vpop.f32.mrf.mxu3  ;;  %v4314_v56 = vmax.f32 %v4282_v45, 0.0  ;;  %v3113_v45 = vld [vmem:[#allocation2 + $0x141] sm:$0xff] }
 0x48f   : > { %v3626_v10 = vadd.f32 %v3538_v3, %v3344_v59  ;;  %v3761_v35 = vadd.f32 %v3729_v0, %v7731_v6  ;;  %v3345_v20 = vadd.f32 %v3259_v57, %v6669_v61  ;;  %v3394_v61 = vld [vmem:[#allocation2 + $0x13a] sm:$0xff]  ;;  %v7734_v6 = vld [vmem:[#allocation16_spill] sm:$0xff] }
 0x490   : > { %4414 = vrot.lane.b32.xlu0 %v4314_v56, %s5271_s22  ;;  %v5121_v0 = vld [vmem:[%s5454_s9 + $0xb0] sm:$0xff] }
 0x491   : > { %v3662_v7 = vmul.f32 %v6906_v15, %v3626_v10  ;;  %v4159_v49 = vpop.f32.mrf.mxu1  ;;  %4968 = vmatmul.msk.f32.gmra.mxu0 %vm770_vm0, %v3761_v35  ;;  %v7735_v35 = vmax.f32 %v7734_v6, 0.0 }
 0x492   : > { %v4248_v48 = vmul.f32 %v6888_v29, %v4159_v49 }
 0x493   : > { %v3698_v28 = vadd.f32 %v6912_v44, %v3662_v7  ;;  %4923 = vmatmul.msk.f32.gmra.mxu2 %vm770_vm0, %v3112_v8  ;;  %4954 = vmatmul.msk.f32.gmra.mxu3 %vm770_vm0, %v3393_v18 }
 0x494   : > { %v4283_v38 = vadd.f32 %v6900_v53, %v4248_v48  ;;  %4206 = vmatmul.f32.gmra.mxu1 %v5120_v43 }
 0x495   : > { %v3730_v31 = vmax.f32 %v3698_v28, 0.0  ;;  %v3114_v28 = vld [vmem:[#allocation2 + $0x151] sm:$0xff] }
 0x496   : > { %v3262_v55 = vpop.f32.mrf.mxu2  ;;  %v3541_v23 = vpop.f32.mrf.mxu3  ;;  %v4315_v11 = vmax.f32 %v4283_v38, 0.0 }
 0x497   : > { %v3627_v41 = vadd.f32 %v3541_v23, %v3345_v20  ;;  %v3762_v4 = vadd.f32 %v3730_v31, %v7733_v33  ;;  %v3346_v57 = vadd.f32 %v3262_v55, %v6681_v9  ;;  %v3395_v9 = vld [vmem:[#allocation2 + $0x142] sm:$0xff]  ;;  %v7736_v33 = vld [vmem:[#allocation17_spill] sm:$0xff] }
 0x498   : > { %4416 = vrot.lane.b32.xlu1 %v4315_v11, %s5271_s22  ;;  %v5122_v20 = vld [vmem:[%s5454_s9 + $0xb8] sm:$0xff] }
 0x499   : > { %v3663_v5 = vmul.f32 %v6906_v15, %v3627_v41  ;;  %v4162_v17 = vpop.f32.mrf.mxu1  ;;  %4969 = vmatmul.msk.f32.gmra.mxu0 %vm770_vm0, %v3762_v4  ;;  %v7737_v4 = vmax.f32 %v7736_v33, 0.0 }
 0x49a   : > { %v4249_v46 = vmul.f32 %v6888_v29, %v4162_v17 }
 0x49b   : > { %v3699_v16 = vadd.f32 %v6912_v44, %v3663_v5  ;;  %4924 = vmatmul.msk.f32.gmra.mxu2 %vm770_vm0, %v3113_v45  ;;  %4955 = vmatmul.msk.f32.gmra.mxu3 %vm770_vm0, %v3394_v61  ;;  %v3115_v61 = vld [vmem:[#allocation2 + $0x159] sm:$0xff] }
 0x49c   : > { %v4284_v59 = vadd.f32 %v6900_v53, %v4249_v46  ;;  %4209 = vmatmul.f32.gmra.mxu1 %v5121_v0  ;;  %v5123_v0 = vld [vmem:[%s5454_s9 + $0xc0] sm:$0xff] }
 0x49d   : > { %v3731_v3 = vmax.f32 %v3699_v16, 0.0 }
 0x49e   : > { %v3265_v56 = vpop.f32.mrf.mxu2  ;;  %v3544_v10 = vpop.f32.mrf.mxu3  ;;  %v4316_v49 = vmax.f32 %v4284_v59, 0.0 }
 0x49f   : > { %v3628_v32 = vadd.f32 %v3544_v10, %v3346_v57  ;;  %v3763_v7 = vadd.f32 %v3731_v3, %v7735_v35  ;;  %v3347_v31 = vadd.f32 %v3265_v56, %v6696_v25  ;;  %v3396_v25 = vld [vmem:[#allocation2 + $0x152] sm:$0xff]  ;;  %v7738_v35 = vld [vmem:[#allocation18_spill] sm:$0xff] }
 0x4a0   : > { %4418 = vrot.lane.b32.xlu2 %v4316_v49, %s5271_s22 }
 0x4a1   : > { %v3664_v48 = vmul.f32 %v6906_v15, %v3628_v32  ;;  %v4165_v8 = vpop.f32.mrf.mxu1  ;;  %4970 = vmatmul.msk.f32.gmra.mxu0 %vm770_vm0, %v3763_v7  ;;  %v7739_v7 = vmax.f32 %v7738_v35, 0.0 }
 0x4a2   : > { %v4250_v18 = vmul.f32 %v6888_v29, %v4165_v8 }
 0x4a3   : > { %v3700_v38 = vadd.f32 %v6912_v44, %v3664_v48  ;;  %4925 = vmatmul.msk.f32.gmra.mxu2 %vm770_vm0, %v3114_v28  ;;  %4956 = vmatmul.msk.f32.gmra.mxu3 %vm770_vm0, %v3395_v9  ;;  %v3116_v28 = vld [vmem:[#allocation2 + $0x169] sm:$0xff] }
 0x4a4   : > { %v4285_v43 = vadd.f32 %v6900_v53, %v4250_v18  ;;  %4212 = vmatmul.f32.gmra.mxu1 %v5122_v20 }
 0x4a5   : > { %v3732_v55 = vmax.f32 %v3700_v38, 0.0 }
 0x4a6   : > { %v3268_v23 = vpop.f32.mrf.mxu2  ;;  %v3547_v41 = vpop.f32.mrf.mxu3  ;;  %v4317_v5 = vmax.f32 %v4285_v43, 0.0  ;;  %v5124_v43 = vld [vmem:[%s5454_s9 + $0xc8] sm:$0xff] }
 0x4a7   : > { %v3629_v13 = vadd.f32 %v3547_v41, %v3347_v31  ;;  %v3764_v11 = vadd.f32 %v3732_v55, %v7737_v4  ;;  %v3348_v57 = vadd.f32 %v3268_v23, %v6706_v24  ;;  %v3397_v24 = vld [vmem:[#allocation2 + $0x15a] sm:$0xff] }
 0x4a8   : > { %4420 = vrot.lane.b32.xlu0 %v4317_v5, %s5271_s22 }
 0x4a9   : > { %v3665_v17 = vmul.f32 %v6906_v15, %v3629_v13  ;;  %v4168_v46 = vpop.f32.mrf.mxu1  ;;  %4971 = vmatmul.msk.f32.gmra.mxu0 %vm770_vm0, %v3764_v11  ;;  %v7740_v13 = vld [vmem:[#allocation19_spill] sm:$0xff] }
 0x4aa   : > { %v4251_v45 = vmul.f32 %v6888_v29, %v4168_v46  ;;  %v7741_v33 = vmax.f32 %v7740_v13, 0.0 }
 0x4ab   : > { %v3701_v16 = vadd.f32 %v6912_v44, %v3665_v17  ;;  %4926 = vmatmul.msk.f32.gmra.mxu2 %vm770_vm0, %v3115_v61  ;;  %4957 = vmatmul.msk.f32.gmra.mxu3 %vm770_vm0, %v3396_v25 }
 0x4ac   : > { %v4286_v59 = vadd.f32 %v6900_v53, %v4251_v45  ;;  %4215 = vmatmul.f32.gmra.mxu1 %v5123_v0  ;;  %v3117_v45 = vld [vmem:[#allocation2 + $0x171] sm:$0xff] }
 0x4ad   : > { %v3733_v3 = vmax.f32 %v3701_v16, 0.0  ;;  %v5125_v16 = vld [vmem:[%s5454_s9 + $0xd0] sm:$0xff] }
 0x4ae   : > { %v4318_v56 = vmax.f32 %v4286_v59, 0.0  ;;  %v3271_v10 = vpop.f32.mrf.mxu2  ;;  %v3550_v32 = vpop.f32.mrf.mxu3 }
 0x4af   : > { %v3630_v6 = vadd.f32 %v3550_v32, %v3348_v57  ;;  %v3765_v49 = vadd.f32 %v3733_v3, %v7739_v7  ;;  %v3349_v20 = vadd.f32 %v3271_v10, %v6722_v37  ;;  %v3398_v37 = vld [vmem:[#allocation2 + $0x16a] sm:$0xff] }
 0x4b0   : > { %4422 = vrot.lane.b32.xlu1 %v4318_v56, %s5271_s22  ;;  %v7742_v10 = vld [vmem:[#allocation20_spill] sm:$0xff] }
 0x4b1   : > { %v3666_v48 = vmul.f32 %v6906_v15, %v3630_v6  ;;  %v4171_v8 = vpop.f32.mrf.mxu1  ;;  %4972 = vmatmul.msk.f32.gmra.mxu0 %vm770_vm0, %v3765_v49  ;;  %v7743_v32 = vmax.f32 %v7742_v10, 0.0 }
 0x4b2   : > { %v4252_v18 = vmul.f32 %v6888_v29, %v4171_v8  ;;  %v3399_v8 = vld [vmem:[#allocation2 + $0x172] sm:$0xff] }
 0x4b3   : > { %v3702_v9 = vadd.f32 %v6912_v44, %v3666_v48  ;;  %4927 = vmatmul.msk.f32.gmra.mxu2 %vm770_vm0, %v3116_v28  ;;  %4958 = vmatmul.msk.f32.gmra.mxu3 %vm770_vm0, %v3397_v24  ;;  %v5126_v28 = vld [vmem:[%s5454_s9 + $0xd8] sm:$0xff] }
 0x4b4   : > { %v4287_v38 = vadd.f32 %v6900_v53, %v4252_v18  ;;  %4218 = vmatmul.f32.gmra.mxu1 %v5124_v43 }
 0x4b5   : > { %v3734_v31 = vmax.f32 %v3702_v9, 0.0 }
 0x4b6   : > { %v4319_v55 = vmax.f32 %v4287_v38, 0.0  ;;  %v3274_v23 = vpop.f32.mrf.mxu2  ;;  %v3553_v41 = vpop.f32.mrf.mxu3 }
 0x4b7   : > { %v3766_v4 = vadd.f32 %v3734_v31, %v7741_v33  ;;  %v3631_v11 = vadd.f32 %v3553_v41, %v3349_v20  ;;  %v3350_v59 = vadd.f32 %v3274_v23, %v6732_v63  ;;  %v7744_v31 = vld [vmem:[#allocation21_spill] sm:$0xff] }
 0x4b8   : > { %4424 = vrot.lane.b32.xlu2 %v4319_v55, %s5271_s22  ;;  %v7745_v55 = vmax.f32 %v7744_v31, 0.0 }
 0x4b9   : > { %v3667_v5 = vmul.f32 %v6906_v15, %v3631_v11  ;;  %v4174_v17 = vpop.f32.mrf.mxu1  ;;  %4973 = vmatmul.msk.f32.gmra.mxu0 %vm770_vm0, %v3766_v4  ;;  %v3400_v4 = vld [vmem:[#allocation2 + $0x182] sm:$0xff] }
 0x4ba   : > { %v4253_v46 = vmul.f32 %v6888_v29, %v4174_v17 }
 0x4bb   : > { %v3703_v61 = vadd.f32 %v6912_v44, %v3667_v5  ;;  %4928 = vmatmul.msk.f32.gmra.mxu2 %vm770_vm0, %v3117_v45  ;;  %4959 = vmatmul.msk.f32.gmra.mxu3 %vm770_vm0, %v3398_v37  ;;  %v5127_v5 = vld [vmem:[%s5454_s9 + $0xe0] sm:$0xff] }
 0x4bc   : > { %v4288_v25 = vadd.f32 %v6900_v53, %v4253_v46  ;;  %4221 = vmatmul.f32.gmra.mxu1 %v5125_v16 }
 0x4bd   : > { %v3735_v0 = vmax.f32 %v3703_v61, 0.0 }
 0x4be   : > { %v4320_v57 = vmax.f32 %v4288_v25, 0.0  ;;  %v3277_v3 = vpop.f32.mrf.mxu2  ;;  %v3556_v56 = vpop.f32.mrf.mxu3  ;;  %v7746_v25 = vld [vmem:[#allocation22_spill] sm:$0xff] }
 0x4bf   : > { %v3767_v6 = vadd.f32 %v3735_v0, %v7743_v32  ;;  %v3632_v35 = vadd.f32 %v3556_v56, %v3350_v59  ;;  %v3351_v24 = vadd.f32 %v3277_v3, %v6748_v19  ;;  %v7747_v16 = vmax.f32 %v7746_v25, 0.0 }
 0x4c0   : > { %4426 = vrot.lane.b32.xlu0 %v4320_v57, %s5271_s22  ;;  %v3120_v57 = vld [vmem:[#allocation2 + $0x199] sm:$0xff] }
 0x4c1   : > { %v3668_v7 = vmul.f32 %v6906_v15, %v3632_v35  ;;  %v4177_v49 = vpop.f32.mrf.mxu1  ;;  %4974 = vmatmul.msk.f32.gmra.mxu0 %vm770_vm0, %v3767_v6  ;;  %v5128_v6 = vld [vmem:[%s5454_s9 + $0xe8] sm:$0xff] }
 0x4c2   : > { %v4254_v48 = vmul.f32 %v6888_v29, %v4177_v49 }
 0x4c3   : > { %v3704_v63 = vadd.f32 %v6912_v44, %v3668_v7  ;;  %4929 = vmatmul.msk.f32.gmra.mxu2 %vm770_vm0, %v6763_v27  ;;  %4960 = vmatmul.msk.f32.gmra.mxu3 %vm770_vm0, %v3399_v8 }
 0x4c4   : > { %v4289_v18 = vadd.f32 %v6900_v53, %v4254_v48  ;;  %4224 = vmatmul.f32.gmra.mxu1 %v5126_v28 }
 0x4c5   : > { %v3736_v9 = vmax.f32 %v3704_v63, 0.0  ;;  %v7748_v63 = vld [vmem:[#allocation23_spill] sm:$0xff] }
 0x4c6   : > { %v4321_v38 = vmax.f32 %v4289_v18, 0.0  ;;  %v3280_v43 = vpop.f32.mrf.mxu2  ;;  %v3559_v20 = vpop.f32.mrf.mxu3  ;;  %v7749_v18 = vmax.f32 %v7748_v63, 0.0 }
 0x4c7   : > { %v3768_v23 = vadd.f32 %v3736_v9, %v7745_v55  ;;  %v3633_v41 = vadd.f32 %v3559_v20, %v3351_v24  ;;  %v3352_v17 = vadd.f32 %v3280_v43, %v6756_v21  ;;  %v3401_v21 = vld [vmem:[#allocation2 + $0x18a] sm:$0xff]  ;;  %v3121_v9 = vld [vmem:[#allocation2 + $0x1a1] sm:$0xff] }
 0x4c8   : > { %4428 = vrot.lane.b32.xlu1 %v4321_v38, %s5271_s22  ;;  %v3402_v38 = vld [vmem:[#allocation2 + $0x19a] sm:$0xff] }
 0x4c9   : > { %v3669_v27 = vmul.f32 %v6906_v15, %v3633_v41  ;;  %v4180_v13 = vpop.f32.mrf.mxu1  ;;  %4975 = vmatmul.msk.f32.gmra.mxu0 %vm770_vm0, %v3768_v23  ;;  %v5129_v23 = vld [vmem:[%s5454_s9 + $0xf0] sm:$0xff] }
 0x4ca   : > { %v4255_v33 = vmul.f32 %v6888_v29, %v4180_v13 }
 0x4cb   : > { %v3705_v19 = vadd.f32 %v6912_v44, %v3669_v27  ;;  %4930 = vmatmul.msk.f32.gmra.mxu2 %vm770_vm0, %v6772_v36  ;;  %4961 = vmatmul.msk.f32.gmra.mxu3 %vm770_vm0, %v3400_v4 }
 0x4cc   : > { %v4290_v11 = vadd.f32 %v6900_v53, %v4255_v33  ;;  %4227 = vmatmul.f32.gmra.mxu1 %v5127_v5 }
 0x4cd   : > { %v3737_v46 = vmax.f32 %v3705_v19, 0.0  ;;  %v7750_v19 = vld [vmem:[#allocation24_spill] sm:$0xff] }
 0x4ce   : > { %v4322_v45 = vmax.f32 %v4290_v11, 0.0  ;;  %v3283_v37 = vpop.f32.mrf.mxu2  ;;  %v3562_v61 = vpop.f32.mrf.mxu3  ;;  %v7751_v11 = vmax.f32 %v7750_v19, 0.0 }
 0x4cf   : > { %v3769_v59 = vadd.f32 %v3737_v46, %v7747_v16  ;;  %v3634_v0 = vadd.f32 %v3562_v61, %v3352_v17  ;;  %v3353_v35 = vadd.f32 %v3283_v37, %v6768_v40  ;;  %v3403_v46 = vld [vmem:[#allocation2 + $0x1a2] sm:$0xff] }
 0x4d0   : > { %4430 = vrot.lane.b32.xlu2 %v4322_v45, %s5271_s22  ;;  %v5130_v16 = vld [vmem:[%s5454_s9 + $0xf8] sm:$0xff]  ;;  %s7788_s9 = sld [smem:[#allocation83_spill]] }
 0x4d1   : > { %v3670_v36 = vmul.f32 %v6906_v15, %v3634_v0  ;;  %v4183_v3 = vpop.f32.mrf.mxu1  ;;  %4976 = vmatmul.msk.f32.gmra.mxu0 %vm770_vm0, %v3769_v59 }
 0x4d2   : > { %v4256_v56 = vmul.f32 %v6888_v29, %v4183_v3 }
 0x4d3   : > { %v3706_v10 = vadd.f32 %v6912_v44, %v3670_v36  ;;  %4931 = vmatmul.msk.f32.gmra.mxu2 %vm770_vm0, %v3120_v57  ;;  %4962 = vmatmul.msk.f32.gmra.mxu3 %vm770_vm0, %v3401_v21 }
 0x4d4   : > { %v4291_v32 = vadd.f32 %v6900_v53, %v4256_v56  ;;  %4230 = vmatmul.f32.gmra.mxu1 %v5128_v6  ;;  %v7752_v56 = vld [vmem:[#allocation25_spill] sm:$0xff] }
 0x4d5   : > { %v3738_v7 = vmax.f32 %v3706_v10, 0.0  ;;  %v7753_v21 = vmax.f32 %v7752_v56, 0.0 }
 0x4d6   : > { %v4323_v49 = vmax.f32 %v4291_v32, 0.0  ;;  %v3286_v48 = vpop.f32.mrf.mxu2  ;;  %v3565_v8 = vpop.f32.mrf.mxu3 }
 0x4d7   : > { %v3770_v28 = vadd.f32 %v3738_v7, %v7749_v18  ;;  %v3635_v24 = vadd.f32 %v3565_v8, %v3353_v35  ;;  %v3354_v41 = vadd.f32 %v3286_v48, %v6777_v62 }
 0x4d8   : > { %4432 = vrot.lane.b32.xlu0 %v4323_v49, %s5271_s22 }
 0x4d9   : > { %v3671_v43 = vmul.f32 %v6906_v15, %v3635_v24  ;;  %v4186_v20 = vpop.f32.mrf.mxu1  ;;  %4977 = vmatmul.msk.f32.gmra.mxu0 %vm770_vm0, %v3770_v28  ;;  %v7754_v24 = vld [vmem:[#allocation26_spill] sm:$0xff] }
 0x4da   : > { %v4257_v40 = vmul.f32 %v6888_v29, %v4186_v20 }
 0x4db   : > { %v3707_v31 = vadd.f32 %v6912_v44, %v3671_v43  ;;  %4932 = vmatmul.msk.f32.gmra.mxu2 %vm770_vm0, %v3121_v9  ;;  %4963 = vmatmul.msk.f32.gmra.mxu3 %vm770_vm0, %v3402_v38  ;;  %v7755_v9 = vmax.f32 %v7754_v24, 0.0 }
 0x4dc   : > { %v4292_v55 = vadd.f32 %v6900_v53, %v4257_v40  ;;  %4233 = vmatmul.f32.gmra.mxu1 %v5129_v23 }
 0x4dd   : > { %v3739_v27 = vmax.f32 %v3707_v31, 0.0 }
 0x4de   : > { %v4324_v13 = vmax.f32 %v4292_v55, 0.0  ;;  %v3289_v33 = vpop.f32.mrf.mxu2  ;;  %v3568_v4 = vpop.f32.mrf.mxu3 }
 0x4df   : > { %v3771_v5 = vadd.f32 %v3739_v27, %v7751_v11  ;;  %v3636_v17 = vadd.f32 %v3568_v4, %v3354_v41  ;;  %v3355_v59 = vadd.f32 %v3289_v33, %v6783_v34  ;;  %v7756_v4 = vld [vmem:[#allocation28_spill] sm:$0xff] }
 0x4e0   : > { %4434 = vrot.lane.b32.xlu1 %v4324_v13, %s5271_s22  ;;  %v7757_v19 = vmax.f32 %v7756_v4, 0.0 }
 0x4e1   : > { %v3672_v45 = vmul.f32 %v6906_v15, %v3636_v17  ;;  %v4189_v37 = vpop.f32.mrf.mxu1  ;;  %4978 = vmatmul.msk.f32.gmra.mxu0 %vm770_vm0, %v3771_v5 }
 0x4e2   : > { %v4258_v61 = vmul.f32 %v6888_v29, %v4189_v37 }
 0x4e3   : > { %v3708_v62 = vadd.f32 %v6912_v44, %v3672_v45  ;;  %4964 = vmatmul.msk.f32.gmra.mxu3 %vm770_vm0, %v3403_v46  ;;  %v7116_v46 = vld [vmem:[%s7508_s12] ss:$0 sm:$0xff] }
 0x4e4   : > { %v4293_v25 = vadd.f32 %v6900_v53, %v4258_v61  ;;  %4236 = vmatmul.f32.gmra.mxu1 %v5130_v16  ;;  %v7125_v61 = vld [vmem:[%s7509_s13] ss:$0 sm:$0xff]  ;;  %v4407_v16 = vpop.permute.xlu1 %4406 }
 0x4e5   : > { %v3740_v0 = vmax.f32 %v3708_v62, 0.0 }
 0x4e6   : > { %v4325_v57 = vmax.f32 %v4293_v25, 0.0  ;;  %v3292_v36 = vpop.f32.mrf.mxu2  ;;  %v3571_v3 = vpop.f32.mrf.mxu3 }
 0x4e7   : > { %v3772_v10 = vadd.f32 %v3740_v0, %v7753_v21  ;;  %v3637_v32 = vadd.f32 %v3571_v3, %v3355_v59  ;;  %v3356_v48 = vadd.f32 %v3292_v36, %v6793_v54 }
 0x4e8   : > { %4436 = vrot.lane.b32.xlu2 %v4325_v57, %s5271_s22 }
 0x4e9   : > { %v3673_v6 = vmul.f32 %v6906_v15, %v3637_v32  ;;  %v4192_v35 = vpop.f32.mrf.mxu1  ;;  %4979 = vmatmul.msk.f32.gmra.mxu0 %vm770_vm0, %v3772_v10  ;;  %v7758_v32 = vld [vmem:[#allocation30_spill] sm:$0xff] }
 0x4ea   : > { %v4259_v7 = vmul.f32 %v6888_v29, %v4192_v35 }
 0x4eb   : > { %v3709_v49 = vadd.f32 %v6912_v44, %v3673_v6  ;;  %v7759_v6 = vmax.f32 %v7758_v32, 0.0 }
 0x4ec   : > { %v4294_v34 = vadd.f32 %v6900_v53, %v4259_v7 }
 0x4ed   : > { %v3741_v8 = vmax.f32 %v3709_v49, 0.0 }
 0x4ee   : > { %v4326_v63 = vmax.f32 %v4294_v34, 0.0  ;;  %v3295_v18 = vpop.f32.mrf.mxu2  ;;  %v3574_v28 = vpop.f32.mrf.mxu3 }
 0x4ef   : > { %v3773_v38 = vadd.f32 %v3741_v8, %v7755_v9  ;;  %v3638_v43 = vadd.f32 %v3574_v28, %v3356_v48  ;;  %v3357_v23 = vadd.f32 %v3295_v18, %v6806_v47  ;;  %v4409_v9 = vpop.permute.xlu1 %4408 }
 0x4f0   : > { %4438 = vrot.lane.b32.xlu0 %v4326_v63, %s5271_s22 }
 0x4f1   : > { %v3674_v20 = vmul.f32 %v6906_v15, %v3638_v43  ;;  %v4195_v40 = vpop.f32.mrf.mxu1  ;;  %4980 = vmatmul.msk.f32.gmra.mxu0 %vm770_vm0, %v3773_v38 }
 0x4f2   : > { %v4260_v31 = vmul.f32 %v6888_v29, %v4195_v40 }
 0x4f3   : > { %v3710_v55 = vadd.f32 %v6912_v44, %v3674_v20 }
 0x4f4   : > { %v4295_v54 = vadd.f32 %v6900_v53, %v4260_v31 }
 0x4f5   : > { %v3742_v41 = vmax.f32 %v3710_v55, 0.0  ;;  %v7760_v55 = vld [vmem:[#allocation32_spill] sm:$0xff] }
 0x4f6   : > { %v4327_v27 = vmax.f32 %v4295_v54, 0.0  ;;  %v3298_v13 = vpop.f32.mrf.mxu2  ;;  %v3577_v33 = vpop.f32.mrf.mxu3  ;;  %v7761_v54 = vmax.f32 %v7760_v55, 0.0 }
 0x4f7   : > { %v3774_v11 = vadd.f32 %v3742_v41, %v7757_v19  ;;  %v3639_v5 = vadd.f32 %v3577_v33, %v3357_v23  ;;  %v3911_v17 = vpop.f32.mrf.mxu0  ;;  %v3358_v36 = vadd.f32 %v3298_v13, %v6812_v1 }
 0x4f8   : > { %v4011_v45 = vmul.f32 %v7116_v46, %v3911_v17  ;;  %4440 = vrot.lane.b32.xlu1 %v4327_v27, %s5271_s22 }
 0x4f9   : > { %v3675_v47 = vmul.f32 %v6906_v15, %v3639_v5  ;;  %v4198_v37 = vpop.f32.mrf.mxu1  ;;  %4981 = vmatmul.msk.f32.gmra.mxu0 %vm770_vm0, %v3774_v11  ;;  %v4411_v11 = vpop.permute.xlu2 %4410 }
 0x4fa   : > { %v4047_v62 = vadd.f32 %v7125_v61, %v4011_v45  ;;  %v4261_v25 = vmul.f32 %v6888_v29, %v4198_v37 }
 0x4fb   : > { %v3711_v59 = vadd.f32 %v6912_v44, %v3675_v47 }
 0x4fc   : > { %v4079_v0 = vmax.f32 %v4047_v62, 0.0  ;;  %v4296_v57 = vadd.f32 %v6900_v53, %v4261_v25 }
 0x4fd   : > { %v3743_v3 = vmax.f32 %v3711_v59, 0.0  ;;  %v7762_v59 = vld [vmem:[#allocation34_spill] sm:$0xff] }
 0x4fe   : > { %v4328_v56 = vmax.f32 %v4296_v57, 0.0  ;;  %4342 = vst.msk [vmem:[%s7134_s24] sm:$0xff] %vm770_vm0, %v4079_v0  ;;  %v3301_v21 = vpop.f32.mrf.mxu2  ;;  %v3580_v10 = vpop.f32.mrf.mxu3  ;;  %v7763_v0 = vmax.f32 %v7762_v59, 0.0 }
 0x4ff   : > { %v3775_v35 = vadd.f32 %v3743_v3, %v7759_v6  ;;  %4503 = vst.msk [vmem:[%s7134_s24] sm:$0xff] %vm4502_vm2, %v4407_v16  ;;  %v3640_v7 = vadd.f32 %v3580_v10, %v3358_v36  ;;  %v3914_v49 = vpop.f32.mrf.mxu0  ;;  %v3359_v38 = vadd.f32 %v3301_v21, %v6818_v2 }
 0x500   : > { %v4012_v1 = vmul.f32 %v7116_v46, %v3914_v49  ;;  %4442 = vrot.lane.b32.xlu2 %v4328_v56, %s5271_s22 }
 0x501   : > { %v3676_v34 = vmul.f32 %v6906_v15, %v3640_v7  ;;  %v4201_v48 = vpop.f32.mrf.mxu1  ;;  %4982 = vmatmul.msk.f32.gmra.mxu0 %vm770_vm0, %v3775_v35  ;;  %v4413_v49 = vpop.permute.xlu2 %4412 }
 0x502   : > { %v4048_v8 = vadd.f32 %v7125_v61, %v4012_v1  ;;  %v4262_v63 = vmul.f32 %v6888_v29, %v4201_v48 }
 0x503   : > { %v3712_v18 = vadd.f32 %v6912_v44, %v3676_v34 }
 0x504   : > { %v4080_v28 = vmax.f32 %v4048_v8, 0.0  ;;  %v4297_v24 = vadd.f32 %v6900_v53, %v4262_v63 }
 0x505   : > { %v3744_v43 = vmax.f32 %v3712_v18, 0.0  ;;  %v7764_v18 = vld [vmem:[#allocation36_spill] sm:$0xff] }
 0x506   : > { %4343 = vst.msk [vmem:[%s7134_s24 + $0x8] sm:$0xff] %vm770_vm0, %v4080_v28  ;;  %v4329_v20 = vmax.f32 %v4297_v24, 0.0  ;;  %v3304_v40 = vpop.f32.mrf.mxu2  ;;  %v3583_v31 = vpop.f32.mrf.mxu3  ;;  %v7765_v28 = vmax.f32 %v7764_v18, 0.0 }
 0x507   : > { %v3776_v23 = vadd.f32 %v3744_v43, %v7761_v54  ;;  %4504 = vst.msk [vmem:[%s7134_s24 + $0x8] sm:$0xff] %vm4502_vm2, %v4409_v9  ;;  %v3641_v41 = vadd.f32 %v3583_v31, %v3359_v38  ;;  %v3917_v27 = vpop.f32.mrf.mxu0  ;;  %v3360_v47 = vadd.f32 %v3304_v40, %v6824_v52 }
 0x508   : > { %v4013_v13 = vmul.f32 %v7116_v46, %v3917_v27  ;;  %4444 = vrot.lane.b32.xlu0 %v4329_v20, %s5271_s22 }
 0x509   : > { %v3677_v2 = vmul.f32 %v6906_v15, %v3641_v41  ;;  %v4204_v33 = vpop.f32.mrf.mxu1  ;;  %4983 = vmatmul.msk.f32.gmra.mxu0 %vm770_vm0, %v3776_v23  ;;  %v4415_v41 = vpop.permute.xlu0 %4414 }
 0x50a   : > { %v4049_v4 = vadd.f32 %v7125_v61, %v4013_v13  ;;  %v4263_v19 = vmul.f32 %v6888_v29, %v4204_v33 }
 0x50b   : > { %v3713_v5 = vadd.f32 %v6912_v44, %v3677_v2 }
 0x50c   : > { %v4081_v17 = vmax.f32 %v4049_v4, 0.0  ;;  %v4298_v45 = vadd.f32 %v6900_v53, %v4263_v19  ;;  %v7766_v19 = vld [vmem:[#allocation37_spill] sm:$0xff] }
 0x50d   : > { %v3745_v37 = vmax.f32 %v3713_v5, 0.0 }
 0x50e   : > { %4344 = vst.msk [vmem:[%s7134_s24 + $0x10] sm:$0xff] %vm770_vm0, %v4081_v17  ;;  %v4330_v62 = vmax.f32 %v4298_v45, 0.0  ;;  %v3307_v25 = vpop.f32.mrf.mxu2  ;;  %v3586_v16 = vpop.f32.mrf.mxu3 }
 0x50f   : > { %v3777_v57 = vadd.f32 %v3745_v37, %v7763_v0  ;;  %4505 = vst.msk [vmem:[%s7134_s24 + $0x10] sm:$0xff] %vm4502_vm2, %v4411_v11  ;;  %v3642_v36 = vadd.f32 %v3586_v16, %v3360_v47  ;;  %v3920_v3 = vpop.f32.mrf.mxu0  ;;  %v3361_v1 = vadd.f32 %v3307_v25, %v6833_v30  ;;  %v7767_v11 = vmax.f32 %v7766_v19, 0.0 }
 0x510   : > { %v4014_v56 = vmul.f32 %v7116_v46, %v3920_v3  ;;  %4446 = vrot.lane.b32.xlu1 %v4330_v62, %s5271_s22 }
 0x511   : > { %v3678_v52 = vmul.f32 %v6906_v15, %v3642_v36  ;;  %v4207_v21 = vpop.f32.mrf.mxu1  ;;  %4984 = vmatmul.msk.f32.gmra.mxu0 %vm770_vm0, %v3777_v57  ;;  %v4417_v57 = vpop.permute.xlu1 %4416 }
 0x512   : > { %v4050_v10 = vadd.f32 %v7125_v61, %v4014_v56  ;;  %v4264_v32 = vmul.f32 %v6888_v29, %v4207_v21 }
 0x513   : > { %v3714_v6 = vadd.f32 %v6912_v44, %v3678_v52 }
 0x514   : > { %v4082_v35 = vmax.f32 %v4050_v10, 0.0  ;;  %v4299_v7 = vadd.f32 %v6900_v53, %v4264_v32  ;;  %v7768_v10 = vld [vmem:[#allocation38_spill] sm:$0xff] }
 0x515   : > { %v3746_v34 = vmax.f32 %v3714_v6, 0.0  ;;  %v7769_v32 = vmax.f32 %v7768_v10, 0.0 }
 0x516   : > { %4345 = vst.msk [vmem:[%s7134_s24 + $0x18] sm:$0xff] %vm770_vm0, %v4082_v35  ;;  %v4331_v48 = vmax.f32 %v4299_v7, 0.0  ;;  %v3310_v8 = vpop.f32.mrf.mxu2  ;;  %v3589_v63 = vpop.f32.mrf.mxu3 }
 0x517   : > { %v3778_v24 = vadd.f32 %v3746_v34, %v7765_v28  ;;  %4506 = vst.msk [vmem:[%s7134_s24 + $0x18] sm:$0xff] %vm4502_vm2, %v4413_v49  ;;  %v3643_v9 = vadd.f32 %v3589_v63, %v3361_v1  ;;  %v3923_v38 = vpop.f32.mrf.mxu0  ;;  %v3362_v27 = vadd.f32 %v3310_v8, %v6839_v50  ;;  %v4419_v28 = vpop.permute.xlu2 %4418 }
 0x518   : > { %v4015_v43 = vmul.f32 %v7116_v46, %v3923_v38  ;;  %4448 = vrot.lane.b32.xlu2 %v4331_v48, %s5271_s22 }
 0x519   : > { %v3679_v30 = vmul.f32 %v6906_v15, %v3643_v9  ;;  %v4210_v20 = vpop.f32.mrf.mxu1  ;;  %4985 = vmatmul.msk.f32.gmra.mxu0 %vm770_vm0, %v3778_v24 }
 0x51a   : > { %v4051_v40 = vadd.f32 %v7125_v61, %v4015_v43  ;;  %v4265_v31 = vmul.f32 %v6888_v29, %v4210_v20  ;;  %v7770_v20 = vld [vmem:[#allocation39_spill] sm:$0xff]  ;;  %v4421_v19 = vpop.permute.xlu0 %4420 }
 0x51b   : > { %v3715_v55 = vadd.f32 %v6912_v44, %v3679_v30 }
 0x51c   : > { %v4083_v54 = vmax.f32 %v4051_v40, 0.0  ;;  %v4300_v23 = vadd.f32 %v6900_v53, %v4265_v31  ;;  %v7771_v40 = vmax.f32 %v7770_v20, 0.0 }
 0x51d   : > { %v3747_v13 = vmax.f32 %v3715_v55, 0.0 }
 0x51e   : > { %4346 = vst.msk [vmem:[%s7134_s24 + $0x20] sm:$0xff] %vm770_vm0, %v4083_v54  ;;  %v4332_v2 = vmax.f32 %v4300_v23, 0.0  ;;  %v3313_v33 = vpop.f32.mrf.mxu2  ;;  %v3592_v4 = vpop.f32.mrf.mxu3 }
 0x51f   : > { %v3779_v5 = vadd.f32 %v3747_v13, %v7767_v11  ;;  %4507 = vst.msk [vmem:[%s7134_s24 + $0x20] sm:$0xff] %vm4502_vm2, %v4415_v41  ;;  %v3644_v17 = vadd.f32 %v3592_v4, %v3362_v27  ;;  %v3926_v45 = vpop.f32.mrf.mxu0  ;;  %v3363_v36 = vadd.f32 %v3313_v33, %v6845_v22 }
 0x520   : > { %v4016_v47 = vmul.f32 %v7116_v46, %v3926_v45  ;;  %4450 = vrot.lane.b32.xlu0 %v4332_v2, %s5271_s22 }
 0x521   : > { %v3680_v50 = vmul.f32 %v6906_v15, %v3644_v17  ;;  %v4213_v37 = vpop.f32.mrf.mxu1  ;;  %4986 = vmatmul.msk.f32.gmra.mxu0 %vm770_vm0, %v3779_v5 }
 0x522   : > { %v4052_v62 = vadd.f32 %v7125_v61, %v4016_v47  ;;  %v4266_v25 = vmul.f32 %v6888_v29, %v4213_v37 }
 0x523   : > { %v3716_v16 = vadd.f32 %v6912_v44, %v3680_v50  ;;  %v7772_v50 = vld [vmem:[#allocation40_spill] sm:$0xff] }
 0x524   : > { %v4084_v59 = vmax.f32 %v4052_v62, 0.0  ;;  %v4301_v0 = vadd.f32 %v6900_v53, %v4266_v25  ;;  %v7773_v37 = vmax.f32 %v7772_v50, 0.0 }
 0x525   : > { %v3748_v3 = vmax.f32 %v3716_v16, 0.0 }
 0x526   : > { %4347 = vst.msk [vmem:[%s7134_s24 + $0x28] sm:$0xff] %vm770_vm0, %v4084_v59  ;;  %v4333_v56 = vmax.f32 %v4301_v0, 0.0  ;;  %v3316_v52 = vpop.f32.mrf.mxu2  ;;  %v3595_v21 = vpop.f32.mrf.mxu3 }
 0x527   : > { %v3780_v6 = vadd.f32 %v3748_v3, %v7769_v32  ;;  %4508 = vst.msk [vmem:[%s7134_s24 + $0x28] sm:$0xff] %vm4502_vm2, %v4417_v57  ;;  %v3645_v35 = vadd.f32 %v3595_v21, %v3363_v36  ;;  %v3929_v7 = vpop.f32.mrf.mxu0  ;;  %v3364_v24 = vadd.f32 %v3316_v52, %v6851_v12  ;;  %v4423_v21 = vpop.permute.xlu1 %4422 }
 0x528   : > { %v4017_v49 = vmul.f32 %v7116_v46, %v3929_v7  ;;  %4452 = vrot.lane.b32.xlu1 %v4333_v56, %s5271_s22 }
 0x529   : > { %v3681_v22 = vmul.f32 %v6906_v15, %v3645_v35  ;;  %v4216_v1 = vpop.f32.mrf.mxu1  ;;  %4987 = vmatmul.msk.f32.gmra.mxu0 %vm770_vm0, %v3780_v6 }
 0x52a   : > { %v4053_v34 = vadd.f32 %v7125_v61, %v4017_v49  ;;  %v4267_v48 = vmul.f32 %v6888_v29, %v4216_v1  ;;  %v7774_v49 = vld [vmem:[#allocation41_spill] sm:$0xff] }
 0x52b   : > { %v3717_v8 = vadd.f32 %v6912_v44, %v3681_v22  ;;  %v7775_v22 = vmax.f32 %v7774_v49, 0.0 }
 0x52c   : > { %v4085_v63 = vmax.f32 %v4053_v34, 0.0  ;;  %v4302_v18 = vadd.f32 %v6900_v53, %v4267_v48 }
 0x52d   : > { %v3749_v9 = vmax.f32 %v3717_v8, 0.0 }
 0x52e   : > { %4348 = vst.msk [vmem:[%s7134_s24 + $0x30] sm:$0xff] %vm770_vm0, %v4085_v63  ;;  %v4334_v38 = vmax.f32 %v4302_v18, 0.0  ;;  %v3319_v43 = vpop.f32.mrf.mxu2  ;;  %v3598_v30 = vpop.f32.mrf.mxu3 }
 0x52f   : > { %v3781_v31 = vadd.f32 %v3749_v9, %v7771_v40  ;;  %4509 = vst.msk [vmem:[%s7134_s24 + $0x30] sm:$0xff] %vm4502_vm2, %v4419_v28  ;;  %v3646_v55 = vadd.f32 %v3598_v30, %v3364_v24  ;;  %v3932_v54 = vpop.f32.mrf.mxu0  ;;  %v3365_v11 = vadd.f32 %v3319_v43, %v6860_v51  ;;  %v4425_v43 = vpop.permute.xlu2 %4424 }
 0x530   : > { %v4018_v23 = vmul.f32 %v7116_v46, %v3932_v54  ;;  %4454 = vrot.lane.b32.xlu2 %v4334_v38, %s5271_s22 }
 0x531   : > { %v3682_v12 = vmul.f32 %v6906_v15, %v3646_v55  ;;  %v4219_v41 = vpop.f32.mrf.mxu1  ;;  %4988 = vmatmul.msk.f32.gmra.mxu0 %vm770_vm0, %v3781_v31  ;;  %v7776_v55 = vld [vmem:[#allocation42_spill] sm:$0xff] }
 0x532   : > { %v4054_v27 = vadd.f32 %v7125_v61, %v4018_v23  ;;  %v4268_v13 = vmul.f32 %v6888_v29, %v4219_v41  ;;  %v7777_v54 = vmax.f32 %v7776_v55, 0.0  ;;  %v7782_v55 = vld [vmem:[#allocation45_spill] sm:$0xff] }
 0x533   : > { %v3718_v2 = vadd.f32 %v6912_v44, %v3682_v12 }
 0x534   : > { %v4086_v33 = vmax.f32 %v4054_v27, 0.0  ;;  %v4303_v4 = vadd.f32 %v6900_v53, %v4268_v13 }
 0x535   : > { %v3750_v5 = vmax.f32 %v3718_v2, 0.0 }
 0x536   : > { %4349 = vst.msk [vmem:[%s7134_s24 + $0x38] sm:$0xff] %vm770_vm0, %v4086_v33  ;;  %v4335_v17 = vmax.f32 %v4303_v4, 0.0  ;;  %v3322_v45 = vpop.f32.mrf.mxu2  ;;  %v3601_v47 = vpop.f32.mrf.mxu3  ;;  %v7291_v4 = vld [vmem:[%s7723_s23] ss:$0 sm:$0xff] }
 0x537   : > { %v3782_v62 = vadd.f32 %v3750_v5, %v7773_v37  ;;  %4510 = vst.msk [vmem:[%s7134_s24 + $0x38] sm:$0xff] %vm4502_vm2, %v4421_v19  ;;  %v3647_v25 = vadd.f32 %v3601_v47, %v3365_v11  ;;  %v3935_v16 = vpop.f32.mrf.mxu0  ;;  %v3366_v10 = vadd.f32 %v3322_v45, %v6866_v39 }
 0x538   : > { %v4019_v59 = vmul.f32 %v7116_v46, %v3935_v16  ;;  %4456 = vrot.lane.b32.xlu0 %v4335_v17, %s5271_s22  ;;  %v4427_v17 = vpop.permute.xlu0 %4426 }
 0x539   : > { %v3683_v51 = vmul.f32 %v6906_v15, %v3647_v25  ;;  %v4222_v0 = vpop.f32.mrf.mxu1  ;;  %4989 = vmatmul.msk.f32.gmra.mxu0 %vm770_vm0, %v3782_v62  ;;  %v7778_v25 = vld [vmem:[#allocation43_spill] sm:$0xff] }
 0x53a   : > { %v4055_v57 = vadd.f32 %v7125_v61, %v4019_v59  ;;  %v4269_v36 = vmul.f32 %v6888_v29, %v4222_v0  ;;  %v7779_v16 = vmax.f32 %v7778_v25, 0.0 }
 0x53b   : > { %v3719_v3 = vadd.f32 %v6912_v44, %v3683_v51 }
 0x53c   : > { %v4087_v56 = vmax.f32 %v4055_v57, 0.0  ;;  %v4304_v52 = vadd.f32 %v6900_v53, %v4269_v36 }
 0x53d   : > { %v3751_v32 = vmax.f32 %v3719_v3, 0.0 }
 0x53e   : > { %4350 = vst.msk [vmem:[%s7134_s24 + $0x40] sm:$0xff] %vm770_vm0, %v4087_v56  ;;  %v4336_v6 = vmax.f32 %v4304_v52, 0.0  ;;  %v3325_v35 = vpop.f32.mrf.mxu2  ;;  %v3604_v7 = vpop.f32.mrf.mxu3 }
 0x53f   : > { %v3783_v1 = vadd.f32 %v3751_v32, %v7775_v22  ;;  %4511 = vst.msk [vmem:[%s7134_s24 + $0x40] sm:$0xff] %vm4502_vm2, %v4423_v21  ;;  %v3648_v34 = vadd.f32 %v3604_v7, %v3366_v10  ;;  %v3938_v48 = vpop.f32.mrf.mxu0  ;;  %v3367_v30 = vadd.f32 %v3325_v35, %v6872_v60  ;;  %v7282_v60 = vld [vmem:[%s7721_s26] ss:$0 sm:$0xff]  ;;  %v4429_v32 = vpop.permute.xlu1 %4428  ;;  %v7780_v22 = vld [vmem:[#allocation44_spill] sm:$0xff] }
 0x540   : > { %v4020_v8 = vmul.f32 %v7116_v46, %v3938_v48  ;;  %4458 = vrot.lane.b32.xlu1 %v4336_v6, %s5271_s22 }
 0x541   : > { %v3684_v39 = vmul.f32 %v6906_v15, %v3648_v34  ;;  %v4225_v63 = vpop.f32.mrf.mxu1  ;;  %4990 = vmatmul.msk.f32.gmra.mxu0 %vm770_vm0, %v3783_v1  ;;  %v7781_v1 = vmax.f32 %v7780_v22, 0.0 }
 0x542   : > { %v4056_v18 = vadd.f32 %v7125_v61, %v4020_v8  ;;  %v4270_v28 = vmul.f32 %v6888_v29, %v4225_v63 }
 0x543   : > { %v3720_v24 = vadd.f32 %v6912_v44, %v3684_v39 }
 0x544   : > { %v4088_v9 = vmax.f32 %v4056_v18, 0.0  ;;  %v4305_v38 = vadd.f32 %v6900_v53, %v4270_v28 }
 0x545   : > { %v3752_v20 = vmax.f32 %v3720_v24, 0.0 }
 0x546   : > { %4351 = vst.msk [vmem:[%s7134_s24 + $0x48] sm:$0xff] %vm770_vm0, %v4088_v9  ;;  %v4337_v15 = vmax.f32 %v4305_v38, 0.0  ;;  %v3328_v40 = vpop.f32.mrf.mxu2  ;;  %v3607_v31 = vpop.f32.mrf.mxu3 }
 0x547   : > { %v3784_v23 = vadd.f32 %v3752_v20, %v7777_v54  ;;  %4512 = vst.msk [vmem:[%s7134_s24 + $0x48] sm:$0xff] %vm4502_vm2, %v4425_v43  ;;  %v3649_v12 = vadd.f32 %v3607_v31, %v3367_v30  ;;  %v3941_v41 = vpop.f32.mrf.mxu0  ;;  %v3368_v45 = vadd.f32 %v3328_v40, %v6878_v14  ;;  %v7783_v54 = vmax.f32 %v7782_v55, 0.0 }
 0x548   : > { %v4021_v44 = vmul.f32 %v7116_v46, %v3941_v41  ;;  %4460 = vrot.lane.b32.xlu2 %v4337_v15, %s5271_s22  ;;  %v4431_v15 = vpop.permute.xlu2 %4430 }
 0x549   : > { %v3685_v27 = vmul.f32 %v7282_v60, %v3649_v12  ;;  %v4228_v13 = vpop.f32.mrf.mxu1  ;;  %4991 = vmatmul.msk.f32.gmra.mxu0 %vm770_vm0, %v3784_v23 }
 0x54a   : > { %v4057_v2 = vadd.f32 %v7125_v61, %v4021_v44  ;;  %v4271_v33 = vmul.f32 %v6888_v29, %v4228_v13 }
 0x54b   : > { %v3721_v19 = vadd.f32 %v7291_v4, %v3685_v27 }
 0x54c   : > { %v4089_v11 = vmax.f32 %v4057_v2, 0.0  ;;  %v4306_v5 = vadd.f32 %v6900_v53, %v4271_v33 }
 0x54d   : > { %v3753_v47 = vmax.f32 %v3721_v19, 0.0 }
 0x54e   : > { %4352 = vst.msk [vmem:[%s7134_s24 + $0x50] sm:$0xff] %vm770_vm0, %v4089_v11  ;;  %v4338_v50 = vmax.f32 %v4306_v5, 0.0  ;;  %v3331_v37 = vpop.f32.mrf.mxu2  ;;  %v3610_v62 = vpop.f32.mrf.mxu3 }
 0x54f   : > { %v3785_v59 = vadd.f32 %v3753_v47, %v7779_v16  ;;  %4513 = vst.msk [vmem:[%s7134_s24 + $0x50] sm:$0xff] %vm4502_vm2, %v4427_v17  ;;  %v3650_v51 = vadd.f32 %v3610_v62, %v3368_v45  ;;  %v3944_v0 = vpop.f32.mrf.mxu0  ;;  %v3369_v6 = vadd.f32 %v3331_v37, %v6884_v58  ;;  %v4433_v17 = vpop.permute.xlu0 %4432  ;;  %v7784_v62 = vld [vmem:[#allocation46_spill] sm:$0xff] }
 0x550   : > { %v4022_v57 = vmul.f32 %v7116_v46, %v3944_v0  ;;  %4462 = vrot.lane.b32.xlu0 %v4338_v50, %s5271_s22  ;;  %v7785_v25 = vmax.f32 %v7784_v62, 0.0 }
 0x551   : > { %v3686_v14 = vmul.f32 %v7282_v60, %v3650_v51  ;;  %v4231_v36 = vpop.f32.mrf.mxu1  ;;  %4992 = vmatmul.msk.f32.gmra.mxu0 %vm770_vm0, %v3785_v59 }
 0x552   : > { %v4058_v3 = vadd.f32 %v7125_v61, %v4022_v57  ;;  %v4272_v56 = vmul.f32 %v6888_v29, %v4231_v36 }
 0x553   : > { %v3722_v52 = vadd.f32 %v7291_v4, %v3686_v14  ;;  %v4435_v14 = vpop.permute.xlu1 %4434 }
 0x554   : > { %v4090_v21 = vmax.f32 %v4058_v3, 0.0  ;;  %v4307_v10 = vadd.f32 %v6900_v53, %v4272_v56  ;;  %v7786_v3 = vld [vmem:[#allocation47_spill] sm:$0xff] }
 0x555   : > { %v3754_v35 = vmax.f32 %v3722_v52, 0.0  ;;  %v7787_v56 = vmax.f32 %v7786_v3, 0.0 }
 0x556   : > { %4353 = vst.msk [vmem:[%s7134_s24 + $0x58] sm:$0xff] %vm770_vm0, %v4090_v21  ;;  %v4339_v7 = vmax.f32 %v4307_v10, 0.0  ;;  %v3613_v49 = vpop.f32.mrf.mxu3  ;;  %v3334_v39 = vpop.f32.mrf.mxu2 }
 0x557   : > { %v3786_v34 = vadd.f32 %v3754_v35, %v7781_v1  ;;  %4514 = vst.msk [vmem:[%s7134_s24 + $0x58] sm:$0xff] %vm4502_vm2, %v4429_v32  ;;  %v3651_v48 = vadd.f32 %v3613_v49, %v3369_v6  ;;  %v3947_v8 = vpop.f32.mrf.mxu0  ;;  %v3370_v30 = vadd.f32 %v3334_v39, %v6892_v26  ;;  %v4437_v32 = vpop.permute.xlu2 %4436 }
 0x558   : > { %v4023_v63 = vmul.f32 %v7116_v46, %v3947_v8  ;;  %4464 = vrot.lane.b32.xlu1 %v4339_v7, %s5271_s22 }
 0x559   : > { %v3687_v58 = vmul.f32 %v7282_v60, %v3651_v48  ;;  %v4234_v18 = vpop.f32.mrf.mxu1  ;;  %4993 = vmatmul.msk.f32.gmra.mxu0 %vm770_vm0, %v3786_v34 }
 0x55a   : > { %v4059_v28 = vadd.f32 %v7125_v61, %v4023_v63  ;;  %v4273_v24 = vmul.f32 %v6888_v29, %v4234_v18 }
 0x55b   : > { %v3723_v9 = vadd.f32 %v7291_v4, %v3687_v58 }
 0x55c   : > { %v4091_v38 = vmax.f32 %v4059_v28, 0.0  ;;  %v4308_v43 = vadd.f32 %v6900_v53, %v4273_v24 }
 0x55d   : > { %v3755_v20 = vmax.f32 %v3723_v9, 0.0 }
 0x55e   : > { %4354 = vst.msk [vmem:[%s7134_s24 + $0x60] sm:$0xff] %vm770_vm0, %v4091_v38  ;;  %v4340_v40 = vmax.f32 %v4308_v43, 0.0  ;;  %v3616_v31 = vpop.f32.mrf.mxu3  ;;  %v3337_v13 = vpop.f32.mrf.mxu2 }
 0x55f   : > { %v3787_v23 = vadd.f32 %v3755_v20, %v7783_v54  ;;  %4515 = vst.msk [vmem:[%s7134_s24 + $0x60] sm:$0xff] %vm4502_vm2, %v4431_v15  ;;  %v3652_v12 = vadd.f32 %v3616_v31, %v3370_v30  ;;  %v3950_v41 = vpop.f32.mrf.mxu0  ;;  %v3371_v45 = vadd.f32 %v3337_v13, %v6897_v42  ;;  %v4443_v24 = vpop.permute.xlu2 %4442 }
 0x560   : > { %v4024_v44 = vmul.f32 %v7116_v46, %v3950_v41  ;;  %4466 = vrot.lane.b32.xlu2 %v4340_v40, %s5271_s22 }
 0x561   : > { %v3688_v26 = vmul.f32 %v7282_v60, %v3652_v12  ;;  %v4237_v27 = vpop.f32.mrf.mxu1  ;;  %4994 = vmatmul.msk.f32.gmra.mxu0 %vm770_vm0, %v3787_v23 }
 0x562   : > { %v4060_v2 = vadd.f32 %v7125_v61, %v4024_v44  ;;  %v4274_v33 = vmul.f32 %v6888_v29, %v4237_v27  ;;  %v4439_v22 = vpop.permute.xlu0 %4438 }
 0x563   : > { %v3724_v19 = vadd.f32 %v7291_v4, %v3688_v26 }
 0x564   : > { %v4092_v11 = vmax.f32 %v4060_v2, 0.0  ;;  %v4309_v5 = vadd.f32 %v6900_v53, %v4274_v33 }
 0x565   : > { %v3756_v47 = vmax.f32 %v3724_v19, 0.0 }
 0x566   : > { %4355 = vst.msk [vmem:[%s7134_s24 + $0x68] sm:$0xff] %vm770_vm0, %v4092_v11  ;;  %v4341_v50 = vmax.f32 %v4309_v5, 0.0  ;;  %v3619_v37 = vpop.f32.mrf.mxu3 }
 0x567   : > { %v3788_v16 = vadd.f32 %v3756_v47, %v7785_v25  ;;  %4516 = vst.msk [vmem:[%s7134_s24 + $0x68] sm:$0xff] %vm4502_vm2, %v4433_v17  ;;  %v3653_v29 = vadd.f32 %v3619_v37, %v3371_v45  ;;  %v3953_v59 = vpop.f32.mrf.mxu0 }
 0x568   : > { %v4025_v51 = vmul.f32 %v7116_v46, %v3953_v59  ;;  %4468 = vrot.lane.b32.xlu0 %v4341_v50, %s5271_s22  ;;  %s5003_s22 = sshll.u32 %s5370_s17, 8  ;;  %s4536_s17 = scalar_lea.sflag [#allocation5], %s5448_s8 }
 0x569   : > { %v3689_v42 = vmul.f32 %v7282_v60, %v3653_v29  ;;  %4995 = vmatmul.msk.f32.gmra.mxu0 %vm770_vm0, %v3788_v16  ;;  %s4547_s20 = scalar_lea.hbm %s7788_s9, %s5003_s22  ;;  %s5215_s22 = scalar_lea.hbm %s7788_s9, 512 }
 0x56a   : > { %v4061_v53 = vadd.f32 %v7125_v61, %v4025_v51  ;;  %v4441_v39 = vpop.permute.xlu1 %4440  ;;  %s4550_s25 = sshll.u32 %s4547_s20, 4  ;;  %s4551_s25 = int_to_ptr.hbm [resolvable:$true] %s4550_s25 }
 0x56b   : > { %v3725_v0 = vadd.f32 %v7291_v4, %v3689_v42  ;;  %s5209_s15 = sshra.s32 %s4551_s25, 4  ;;  %s5210_s15 = int_to_ptr.hbm [resolvable:$true] %s5209_s15 }
 0x56c   : > { %v4093_v57 = vmax.f32 %v4061_v53, 0.0  ;;  %s5211_s28 = scalar_lea.hbm %s5210_s15, 256  ;;  %p5216_p11 = scmp.lt.s32.totalorder %s5210_s15, %s7788_s9 }
 0x56d   : > { %v3757_v36 = vmax.f32 %v3725_v0, 0.0  ;;  %p5212_p1 = scmp.ne.s32.totalorder %s5210_s15, %s5211_s28  ;;  %p5217_p9 = scmp.lt.s32.totalorder %s5215_s22, %s5211_s28 }
 0x56e   : > { %4356 = vst.msk [vmem:[%s7134_s24 + $0x70] sm:$0xff] %vm770_vm0, %v4093_v57 }
 0x56f   : > { %v3789_v52 = vadd.f32 %v3757_v36, %v7787_v56  ;;  %4517 = vst.msk [vmem:[%s7134_s24 + $0x70] sm:$0xff] %vm4502_vm2, %v4435_v14  ;;  %v3956_v60 = vpop.f32.mrf.mxu0  ;;  %p5213_p4 = pnand %p5212_p1, %p5418_p3  ;;  %p5218_p2 = por %p5217_p9, %p5216_p11 }
 0x570   : > { %v4026_v21 = vmul.f32 %v7116_v46, %v3956_v60 }
 0x571   : > { %4996 = vmatmul.msk.f32.gmra.mxu0 %vm770_vm0, %v3789_v52  ;;  %p5214_p8 = pneg %p5213_p4 }
 0x572   : > { %v4062_v10 = vadd.f32 %v7125_v61, %v4026_v21  ;;  %v4449_v26 = vpop.permute.xlu2 %4448 }
 0x573   : > { %p5219_p10 = pnand %p5218_p2, %p5214_p8 }
 0x574   : > { %v4094_v4 = vmax.f32 %v4062_v10, 0.0 }
 0x576   : > { %4357 = vst.msk [vmem:[%s7134_s24 + $0x78] sm:$0xff] %vm770_vm0, %v4094_v4 }
 0x577   : > { %4518 = vst.msk [vmem:[%s7134_s24 + $0x78] sm:$0xff] %vm4502_vm2, %v4437_v32  ;;  %v3959_v6 = vpop.f32.mrf.mxu0 }
 0x578   : > { %v4027_v35 = vmul.f32 %v7116_v46, %v3959_v6 }
 0x57a   : > { %v4063_v7 = vadd.f32 %v7125_v61, %v4027_v35  ;;  %v4445_v20 = vpop.permute.xlu0 %4444 }
 0x57c   : > { %v4095_v49 = vmax.f32 %v4063_v7, 0.0 }
 0x57e   : > { %4358 = vst.msk [vmem:[%s7134_s24 + $0x80] sm:$0xff] %vm770_vm0, %v4095_v49 }
 0x57f   : > { %4519 = vst.msk [vmem:[%s7134_s24 + $0x80] sm:$0xff] %vm4502_vm2, %v4439_v22  ;;  %v3962_v1 = vpop.f32.mrf.mxu0 }
 0x580   : > { %v4028_v34 = vmul.f32 %v7116_v46, %v3962_v1 }
 0x582   : > { %v4064_v48 = vadd.f32 %v7125_v61, %v4028_v34  ;;  %v4447_v54 = vpop.permute.xlu1 %4446 }
 0x584   : > { %v4096_v8 = vmax.f32 %v4064_v48, 0.0 }
 0x586   : > { %4359 = vst.msk [vmem:[%s7134_s24 + $0x88] sm:$0xff] %vm770_vm0, %v4096_v8 }
 0x587   : > { %4520 = vst.msk [vmem:[%s7134_s24 + $0x88] sm:$0xff] %vm4502_vm2, %v4441_v39  ;;  %v3965_v63 = vpop.f32.mrf.mxu0 }
 0x588   : > { %v4029_v58 = vmul.f32 %v7116_v46, %v3965_v63 }
 0x58a   : > { %v4065_v18 = vadd.f32 %v7125_v61, %v4029_v58  ;;  %v4455_v16 = vpop.permute.xlu2 %4454 }
 0x58c   : > { %v4097_v28 = vmax.f32 %v4065_v18, 0.0 }
 0x58e   : > { %4360 = vst.msk [vmem:[%s7134_s24 + $0x90] sm:$0xff] %vm770_vm0, %v4097_v28 }
 0x58f   : > { %4521 = vst.msk [vmem:[%s7134_s24 + $0x90] sm:$0xff] %vm4502_vm2, %v4443_v24  ;;  %v3968_v9 = vpop.f32.mrf.mxu0 }
 0x590   : > { %v4030_v38 = vmul.f32 %v7116_v46, %v3968_v9 }
 0x592   : > { %v4066_v43 = vadd.f32 %v7125_v61, %v4030_v38  ;;  %v4451_v19 = vpop.permute.xlu0 %4450 }
 0x594   : > { %v4098_v30 = vmax.f32 %v4066_v43, 0.0 }
 0x596   : > { %4361 = vst.msk [vmem:[%s7134_s24 + $0x98] sm:$0xff] %vm770_vm0, %v4098_v30 }
 0x597   : > { %4522 = vst.msk [vmem:[%s7134_s24 + $0x98] sm:$0xff] %vm4502_vm2, %v4445_v20  ;;  %v3971_v15 = vpop.f32.mrf.mxu0 }
 0x598   : > { %v4031_v40 = vmul.f32 %v7116_v46, %v3971_v15 }
 0x59a   : > { %v4067_v31 = vadd.f32 %v7125_v61, %v4031_v40  ;;  %v4453_v47 = vpop.permute.xlu1 %4452 }
 0x59c   : > { %v4099_v55 = vmax.f32 %v4067_v31, 0.0 }
 0x59e   : > { %4362 = vst.msk [vmem:[%s7134_s24 + $0xa0] sm:$0xff] %vm770_vm0, %v4099_v55 }
 0x59f   : > { %4523 = vst.msk [vmem:[%s7134_s24 + $0xa0] sm:$0xff] %vm4502_vm2, %v4447_v54  ;;  %v3974_v23 = vpop.f32.mrf.mxu0 }
 0x5a0   : > { %v4032_v12 = vmul.f32 %v7116_v46, %v3974_v23 }
 0x5a2   : > { %v4068_v41 = vadd.f32 %v7125_v61, %v4032_v12  ;;  %v4461_v10 = vpop.permute.xlu2 %4460 }
 0x5a4   : > { %v4100_v44 = vmax.f32 %v4068_v41, 0.0 }
 0x5a6   : > { %4363 = vst.msk [vmem:[%s7134_s24 + $0xa8] sm:$0xff] %vm770_vm0, %v4100_v44 }
 0x5a7   : > { %4524 = vst.msk [vmem:[%s7134_s24 + $0xa8] sm:$0xff] %vm4502_vm2, %v4449_v26  ;;  %v3977_v27 = vpop.f32.mrf.mxu0 }
 0x5a8   : > { %v4033_v13 = vmul.f32 %v7116_v46, %v3977_v27 }
 0x5aa   : > { %v4069_v2 = vadd.f32 %v7125_v61, %v4033_v13  ;;  %v4457_v53 = vpop.permute.xlu0 %4456 }
 0x5ac   : > { %v4101_v33 = vmax.f32 %v4069_v2, 0.0 }
 0x5ae   : > { %4364 = vst.msk [vmem:[%s7134_s24 + $0xb0] sm:$0xff] %vm770_vm0, %v4101_v33 }
 0x5af   : > { %4525 = vst.msk [vmem:[%s7134_s24 + $0xb0] sm:$0xff] %vm4502_vm2, %v4451_v19  ;;  %v3980_v11 = vpop.f32.mrf.mxu0 }
 0x5b0   : > { %v4034_v5 = vmul.f32 %v7116_v46, %v3980_v11 }
 0x5b2   : > { %v4070_v17 = vadd.f32 %v7125_v61, %v4034_v5  ;;  %v4459_v3 = vpop.permute.xlu1 %4458 }
 0x5b4   : > { %v4102_v45 = vmax.f32 %v4070_v17, 0.0 }
 0x5b6   : > { %4365 = vst.msk [vmem:[%s7134_s24 + $0xb8] sm:$0xff] %vm770_vm0, %v4102_v45 }
 0x5b7   : > { %4526 = vst.msk [vmem:[%s7134_s24 + $0xb8] sm:$0xff] %vm4502_vm2, %v4453_v47  ;;  %v3983_v50 = vpop.f32.mrf.mxu0 }
 0x5b8   : > { %v4035_v37 = vmul.f32 %v7116_v46, %v3983_v50 }
 0x5ba   : > { %v4071_v62 = vadd.f32 %v7125_v61, %v4035_v37  ;;  %v4467_v18 = vpop.permute.xlu2 %4466 }
 0x5bc   : > { %v4103_v25 = vmax.f32 %v4071_v62, 0.0 }
 0x5be   : > { %4366 = vst.msk [vmem:[%s7134_s24 + $0xc0] sm:$0xff] %vm770_vm0, %v4103_v25 }
 0x5bf   : > { %4527 = vst.msk [vmem:[%s7134_s24 + $0xc0] sm:$0xff] %vm4502_vm2, %v4455_v16  ;;  %v3986_v29 = vpop.f32.mrf.mxu0 }
 0x5c0   : > { %v4036_v59 = vmul.f32 %v7116_v46, %v3986_v29 }
 0x5c2   : > { %v4072_v51 = vadd.f32 %v7125_v61, %v4036_v59  ;;  %v4463_v7 = vpop.permute.xlu0 %4462 }
 0x5c4   : > { %v4104_v42 = vmax.f32 %v4072_v51, 0.0 }
 0x5c6   : > { %4367 = vst.msk [vmem:[%s7134_s24 + $0xc8] sm:$0xff] %vm770_vm0, %v4104_v42 }
 0x5c7   : > { %4528 = vst.msk [vmem:[%s7134_s24 + $0xc8] sm:$0xff] %vm4502_vm2, %v4457_v53  ;;  %v3989_v0 = vpop.f32.mrf.mxu0 }
 0x5c8   : > { %v4037_v57 = vmul.f32 %v7116_v46, %v3989_v0 }
 0x5ca   : > { %v4073_v14 = vadd.f32 %v7125_v61, %v4037_v57  ;;  %v4465_v48 = vpop.permute.xlu1 %4464 }
 0x5cc   : > { %v4105_v36 = vmax.f32 %v4073_v14, 0.0 }
 0x5ce   : > { %4368 = vst.msk [vmem:[%s7134_s24 + $0xd0] sm:$0xff] %vm770_vm0, %v4105_v36 }
 0x5cf   : > { %4529 = vst.msk [vmem:[%s7134_s24 + $0xd0] sm:$0xff] %vm4502_vm2, %v4459_v3  ;;  %v3992_v56 = vpop.f32.mrf.mxu0 }
 0x5d0   : > { %v4038_v52 = vmul.f32 %v7116_v46, %v3992_v56 }
 0x5d2   : > { %v4074_v60 = vadd.f32 %v7125_v61, %v4038_v52 }
 0x5d4   : > { %v4106_v21 = vmax.f32 %v4074_v60, 0.0 }
 0x5d6   : > { %4369 = vst.msk [vmem:[%s7134_s24 + $0xd8] sm:$0xff] %vm770_vm0, %v4106_v21 }
 0x5d7   : > { %4530 = vst.msk [vmem:[%s7134_s24 + $0xd8] sm:$0xff] %vm4502_vm2, %v4461_v10  ;;  %v3995_v4 = vpop.f32.mrf.mxu0 }
 0x5d8   : > { %v4039_v32 = vmul.f32 %v7116_v46, %v3995_v4 }
 0x5da   : > { %v4075_v6 = vadd.f32 %v7125_v61, %v4039_v32  ;;  %v4469_v43 = vpop.permute.xlu0 %4468 }
 0x5dc   : > { %v4107_v35 = vmax.f32 %v4075_v6, 0.0 }
 0x5de   : > { %4370 = vst.msk [vmem:[%s7134_s24 + $0xe0] sm:$0xff] %vm770_vm0, %v4107_v35 }
 0x5df   : > { %4531 = vst.msk [vmem:[%s7134_s24 + $0xe0] sm:$0xff] %vm4502_vm2, %v4463_v7  ;;  %v3998_v49 = vpop.f32.mrf.mxu0 }
 0x5e0   : > { %v4040_v22 = vmul.f32 %v7116_v46, %v3998_v49 }
 0x5e2   : > { %v4076_v1 = vadd.f32 %v7125_v61, %v4040_v22 }
 0x5e4   : > { %v4108_v34 = vmax.f32 %v4076_v1, 0.0 }
 0x5e6   : > { %4371 = vst.msk [vmem:[%s7134_s24 + $0xe8] sm:$0xff] %vm770_vm0, %v4108_v34 }
 0x5e7   : > { %4532 = vst.msk [vmem:[%s7134_s24 + $0xe8] sm:$0xff] %vm4502_vm2, %v4465_v48  ;;  %v4001_v8 = vpop.f32.mrf.mxu0 }
 0x5e8   : > { %v4041_v39 = vmul.f32 %v7116_v46, %v4001_v8 }
 0x5ea   : > { %v4077_v63 = vadd.f32 %v7125_v61, %v4041_v39 }
 0x5ec   : > { %v4109_v58 = vmax.f32 %v4077_v63, 0.0 }
 0x5ee   : > { %4372 = vst.msk [vmem:[%s7134_s24 + $0xf0] sm:$0xff] %vm770_vm0, %v4109_v58 }
 0x5ef   : > { %4533 = vst.msk [vmem:[%s7134_s24 + $0xf0] sm:$0xff] %vm4502_vm2, %v4467_v18  ;;  %v4004_v28 = vpop.f32.mrf.mxu0 }
 0x5f0   : > { %v4042_v24 = vmul.f32 %v7116_v46, %v4004_v28 }
 0x5f2   : > { %v4078_v9 = vadd.f32 %v7125_v61, %v4042_v24 }
 0x5f4   : > { %v4110_v38 = vmax.f32 %v4078_v9, 0.0 }
 0x5f6   : > { %4373 = vst.msk [vmem:[%s7134_s24 + $0xf8] sm:$0xff] %vm770_vm0, %v4110_v38 }
 0x5f7   : > { %4534 = vst.msk [vmem:[%s7134_s24 + $0xf8] sm:$0xff] %vm4502_vm2, %v4469_v43 }
 0x5f8   : > { %5222 = shalt.err (!%p5219_p10)
}
 0x5f9   : > { %s5272_s8 = smov 128   ;;  %s5273_s24 = smov 8  }
 0x5fa   : > { %5034 = dma.vmem_to_hbm [thread:$0]  (%p5418_p3), %s4549_s21, 4096, %s4551_s25, %s4536_s17, %s5272_s8, %s5272_s8, %s5273_s24  }
 0x5fb PF: > { %s7789_s20 = sld [smem:[#allocation12_spill]]  ;;  %p7791_p12 = scmp.ge.s32.totalorder %s5265_s16, 2 }
 0x5fd   : > { %p5045_p13 = pnand %p7791_p12, %p5384_p6 }
 0x5ff   : > { %p5046_p0 = pneg %p5045_p13 }
 0x601   : > { %s4565_s1 = sand.u32 1, %s7789_s20  }
 0x602   : > { %s4566_s18 = scalar_lea.sflag [#allocation5], %s4565_s1 }
 0x603   : > { %5248 = dma.done.wait (%p5046_p0), %s4566_s18, 4096  }
 0x604   : > { %5250 = vsyncadd (%p5046_p0), %s4566_s18, 4294963200  ;;  %s7792_s15 = sld [smem:[#allocation13_spill]]  ;;  %p28_p5 = scmp.ge.s32.totalorder %s5402_s27, 4  }
 0x605   : > { %s7793_s28 = sld [smem:[#allocation15_spill]]  ;;  %s7794_s29 = smov %s5257_s30 }
 0x606   : > { %s7797_s16 = smov %s5402_s27 }
 0x607   :  { %30 = sbr.rel (!%p28_p5) target bundleno = 13 (0xd), region = 135 }
 0x60a   : > { %s7795_s30 = smov %s7792_s15 }
 0x60b   : > { %s7796_s15 = smov %s7793_s28 }
 0x60c   :  { %4572 = vsyncpa [#allocation4], 1 }
 0x60d   :  { %4574 = vsyncpa [#allocation4 + $0x1], 1 }
 0x60e   :  { %4575 = vsyncpa [#allocation7], 1 }
 0x60f   :  { %4576 = vsyncpa [#allocation5], 1 }
 0x610   :  { %4578 = vsyncpa [#allocation5 + $0x1], 1 }

</bundles_post_ra>
